<compile_context>
chip_gen: v7x
topology: tpu7x:2x2x1
jax: 0.10.0
libtpu: 0.0.40
codegen_flags: <defaults>
</compile_context>

<pallas_src>
import numpy as np
import jax
import jax.numpy as jnp
from jax import lax
from jax.experimental import pallas as pl
from jax.experimental.pallas import tpu as pltpu

EPS = 1e-9  # matches var(...) + 1e-09 in shaDowLayer._f_norm_feat


def graphsage_kernel(bids_ref, bcnt_ref,               # scalar-prefetch (SMEM)
                     adj_ref, featk_ref, feats_ref,    # tiled inputs
                     ws_ref, bs_ref, wn_ref, bn_ref,
                     scale_ref, offset_ref,
                     out_ref,
                     neigh_acc, hself_acc):            # VMEM scratch
    # adj_ref:   [tn, tk]      featk_ref: [tk, D_in]     feats_ref: [tn, D_in]
    # ws/wn:     [D_in, D_out] bs/bn:     [1, D_out]     scale/offset: [2, D_out]
    # out_ref:   [tn, D_out]   neigh_acc: [tn, D_in] f32 hself_acc: [tn, D_out] f32
    i = pl.program_id(0)
    k = pl.program_id(1)
    nk = bcnt_ref[i]          # number of nonzero adjacency column blocks for this row block

    @pl.when(k == 0)
    def _init():
        neigh_acc[...] = jnp.zeros_like(neigh_acc)
        # Self branch is k-invariant: do it once at k==0 to balance per-step compute.
        h = jnp.dot(feats_ref[...], ws_ref[...], preferred_element_type=jnp.float32)
        hself_acc[...] = jnp.maximum(h + bs_ref[...], 0.0)

    # Neighbor aggregation over *nonzero* adjacency blocks only; padded steps reuse the
    # resident block (same index_map result -> no DMA) and are skipped here.
    @pl.when(k < nk)
    def _accumulate():
        neigh_acc[...] += jnp.dot(adj_ref[...], featk_ref[...],
                                  preferred_element_type=jnp.float32)

    @pl.when(k == pl.num_programs(1) - 1)
    def _epilogue():
        h_neigh = jnp.dot(neigh_acc[...].astype(wn_ref.dtype), wn_ref[...],
                          preferred_element_type=jnp.float32)
        h_neigh = jnp.maximum(h_neigh + bn_ref[...], 0.0)
        h_self = hself_acc[...]

        # 'norm_feat': per-node feature normalization with per-branch affine params.
        def f_norm_feat(h, row):
            mean = jnp.mean(h, axis=1, keepdims=True)
            c = h - mean                                    # reused (single pass)
            var = jnp.mean(c * c, axis=1, keepdims=True) + EPS
            sc = scale_ref[row:row + 1, :]                  # [1, D_out] static slice
            off = offset_ref[row:row + 1, :]
            return c * (sc * lax.rsqrt(var)) + off

        out = f_norm_feat(h_self, 0) + f_norm_feat(h_neigh, 1)
        out_ref[...] = out.astype(out_ref.dtype)


def _vmem_capacity_bytes():
    try:
        return int(pltpu.get_tpu_info().vmem_capacity_bytes)
    except Exception:
        return 64 * 1024 * 1024   # conservative: v7x per-TensorCore VMEM


def graphsage_forward(feat_in, adj_norm, w_self, b_self, w_neigh, b_neigh,
                      scale, offset, *, tile_n=256, tile_k=512,
                      stream_dtype=jnp.bfloat16):
    """feat_in: [N, D_in], adj_norm: [N, N] (row-normalized, dense),
       w_*: [D_in, D_out] (transpose of torch nn.Linear.weight), b_*: [D_out],
       scale/offset: [2, D_out]  ->  feat_out: [N, D_out]."""
    N, D_in = feat_in.shape
    D_out = w_self.shape[1]
    assert adj_norm.shape == (N, N)

    tile_n = min(tile_n, N)
    tile_k = min(tile_k, N)
    # Keep >= 2 row blocks where possible so both TensorCores get work on v7x.
    if N // tile_n < 2 and tile_n % 16 == 0 and N % (tile_n // 2) == 0:
        tile_n //= 2
    assert N % tile_n == 0 and N % tile_k == 0, "N must be divisible by tile sizes"
    nb_r, nb_c = N // tile_n, N // tile_k

    # ---- Block-sparsity structure (host side): per row-block list of nonzero k blocks.
    adj_np = np.asarray(jax.device_get(adj_norm))
    blk = adj_np.reshape(nb_r, tile_n, nb_c, tile_k)
    nnz = (blk != 0).any(axis=(1, 3))                        # [nb_r, nb_c] bool
    counts_np = nnz.sum(axis=1).astype(np.int32)
    max_k = max(int(counts_np.max()), 1)
    bids_np = np.zeros((nb_r, max_k), dtype=np.int32)
    for r in range(nb_r):
        cols = np.nonzero(nnz[r])[0].astype(np.int32)
        if cols.size == 0:
            cols = np.zeros((1,), np.int32)
        bids_np[r, :cols.size] = cols
        bids_np[r, cols.size:] = cols[-1]   # repeat last id -> padded steps cause no new DMA
    bids_flat = jnp.asarray(bids_np.reshape(-1))
    counts = jnp.asarray(counts_np)
    MAXK = max_k

    # ---- dtype handling: stream adj/feat/weights in stream_dtype, accumulate in f32.
    sd = jnp.dtype(stream_dtype)
    adj_s = adj_norm.astype(sd)
    feat_s = feat_in.astype(sd)
    ws = w_self.astype(sd)
    wn = w_neigh.astype(sd)
    bs2 = b_self.reshape(1, D_out).astype(jnp.float32)
    bn2 = b_neigh.reshape(1, D_out).astype(jnp.float32)
    scale2 = scale.astype(jnp.float32)
    offset2 = offset.astype(jnp.float32)

    sbytes = sd.itemsize
    obytes = jnp.dtype(feat_in.dtype).itemsize

    def est_vmem(inv_bufs):
        b = 2 * tile_n * tile_k * sbytes          # adj tile (double buffered)
        b += 2 * tile_k * D_in * sbytes           # gathered feat_in k-block
        b += 2 * tile_n * D_in * sbytes           # feat_in row block
        b += inv_bufs * 2 * D_in * D_out * sbytes # W_self + W_neigh
        b += inv_bufs * 6 * D_out * 4             # biases + scale/offset
        b += 2 * tile_n * D_out * obytes          # output tile
        b += tile_n * (D_in + D_out) * 4          # f32 scratch accumulators
        return b

    def run(single_buffer_invariants):
        inv_kwargs = {}
        if single_buffer_invariants:
            inv_kwargs = dict(pipeline_mode=pl.Buffered(1))

        def inv_spec(shape):
            return pl.BlockSpec(shape, lambda i, k, b, c: (0, 0), **inv_kwargs)

        in_specs = [
            # adjacency tile: row block i, column block gathered from the nonzero list
            pl.BlockSpec((tile_n, tile_k), lambda i, k, b, c: (i, b[i * MAXK + k])),
            # feat_in k-block gathered to match the adjacency column block
            pl.BlockSpec((tile_k, D_in), lambda i, k, b, c: (b[i * MAXK + k], 0)),
            # feat_in row block (self branch)
            pl.BlockSpec((tile_n, D_in), lambda i, k, b, c: (i, 0)),
            inv_spec((D_in, D_out)),   # W_self
            inv_spec((1, D_out)),      # b_self
            inv_spec((D_in, D_out)),   # W_neigh
            inv_spec((1, D_out)),      # b_neigh
            inv_spec((2, D_out)),      # scale  (2 branches)
            inv_spec((2, D_out)),      # offset (2 branches)
        ]

        needed = est_vmem(1 if single_buffer_invariants else 2)
        cap = _vmem_capacity_bytes()
        vmem_limit = int(min(max(needed + (8 << 20), 32 << 20), int(0.85 * cap)))

        return pl.pallas_call(
            graphsage_kernel,
            out_shape=jax.ShapeDtypeStruct((N, D_out), feat_in.dtype),
            grid_spec=pltpu.PrefetchScalarGridSpec(
                num_scalar_prefetch=2,
                grid=(nb_r, MAXK),
                in_specs=in_specs,
                out_specs=pl.BlockSpec((tile_n, D_out), lambda i, k, b, c: (i, 0)),
                scratch_shapes=[pltpu.VMEM((tile_n, D_in), jnp.float32),
                                pltpu.VMEM((tile_n, D_out), jnp.float32)],
            ),
            compiler_params=pltpu.CompilerParams(
                dimension_semantics=("parallel", "arbitrary"),
                vmem_limit_bytes=vmem_limit,
            ),
        )(bids_flat, counts, adj_s, feat_s, feat_s, ws, bs2, wn, bn2, scale2, offset2)

    try:
        return run(True)
    except Exception:
        # Fallback for jax versions without pipeline_mode / pl.Buffered support.
        return run(False)


def graphsage_ref(feat_in, adj_norm, w_self, b_self, w_neigh, b_neigh, scale, offset,
                  stream_dtype=jnp.float32):
    """Pure-JAX reference mirroring the PyTorch forward (eval mode)."""
    sd = jnp.dtype(stream_dtype)
    a = adj_norm.astype(sd)
    x = feat_in.astype(sd)
    ws = w_self.astype(sd)
    wn = w_neigh.astype(sd)
    feat_neigh = jnp.dot(a, x, preferred_element_type=jnp.float32).astype(sd)
    h_self = jnp.maximum(jnp.dot(x, ws, preferred_element_type=jnp.float32)
                         + b_self[None, :], 0.0)
    h_neigh = jnp.maximum(jnp.dot(feat_neigh, wn, preferred_element_type=jnp.float32)
                          + b_neigh[None, :], 0.0)

    def f_norm_feat(h, i):
        mean = jnp.mean(h, axis=1, keepdims=True)
        c = h - mean
        var = jnp.mean(c * c, axis=1, keepdims=True) + EPS
        return c * scale[i][None, :] * lax.rsqrt(var) + offset[i][None, :]

    return f_norm_feat(h_self, 0) + f_norm_feat(h_neigh, 1)


if __name__ == "__main__":
    # Small but lane-aligned shapes (multiples of 128) so tiles are lane-dense.
    N, D_in, D_out = 256, 128, 128

    key = jax.random.PRNGKey(0)
    kx, ka, kws, kbs, kwn, kbn, ksc, kof = jax.random.split(key, 8)

    feat_in = jax.random.normal(kx, (N, D_in), dtype=jnp.float32)

    # Deterministic random-walk-normalized dense adjacency with self-loops
    # (corresponds to the is_normed=True branch of the forward).
    a = (jax.random.uniform(ka, (N, N)) < 0.05).astype(jnp.float32)
    a = a + jnp.eye(N, dtype=jnp.float32)
    adj_norm = a / jnp.sum(a, axis=1, keepdims=True)

    # Synthetic parameters (W stored as [D_in, D_out] = torch weight transposed).
    w_self = 0.1 * jax.random.normal(kws, (D_in, D_out), dtype=jnp.float32)
    b_self = 0.1 * jax.random.normal(kbs, (D_out,), dtype=jnp.float32)
    w_neigh = 0.1 * jax.random.normal(kwn, (D_in, D_out), dtype=jnp.float32)
    b_neigh = 0.1 * jax.random.normal(kbn, (D_out,), dtype=jnp.float32)
    scale = 1.0 + 0.1 * jax.random.normal(ksc, (2, D_out), dtype=jnp.float32)
    offset = 0.1 * jax.random.normal(kof, (2, D_out), dtype=jnp.float32)

    # f32 streaming path: exact check against the f32 reference.
    y32 = graphsage_forward(feat_in, adj_norm, w_self, b_self, w_neigh, b_neigh,
                            scale, offset, tile_n=128, tile_k=128,
                            stream_dtype=jnp.float32)
    y32 = jax.block_until_ready(y32)
    ref32 = graphsage_ref(feat_in, adj_norm, w_self, b_self, w_neigh, b_neigh,
                          scale, offset, stream_dtype=jnp.float32)
    assert y32.shape == (N, D_out)
    assert jnp.allclose(y32, ref32, atol=1e-3, rtol=1e-3)

    # bf16 streaming + f32 accumulation path: check against a bf16-consistent reference.
    ybf = graphsage_forward(feat_in, adj_norm, w_self, b_self, w_neigh, b_neigh,
                            scale, offset, tile_n=128, tile_k=128,
                            stream_dtype=jnp.bfloat16)
    ybf = jax.block_until_ready(ybf)
    refbf = graphsage_ref(feat_in, adj_norm, w_self, b_self, w_neigh, b_neigh,
                          scale, offset, stream_dtype=jnp.bfloat16)
    assert jnp.allclose(ybf, refbf, atol=2e-2, rtol=2e-2)

    print("KERNEL_OK")
</pallas_src>

<mosaic_0001>
module attributes {stable_mosaic.version = 11 : i64} {
  func.func @graphsage_kernel(%arg0: i32, %arg1: i32, %arg2: memref<4xi32, #tpu.memory_space<smem>>, %arg3: memref<2xi32, #tpu.memory_space<smem>>, %arg4: memref<128x128xf32, #tpu.memory_space<vmem>>, %arg5: memref<128x128xf32, #tpu.memory_space<vmem>>, %arg6: memref<128x128xf32, #tpu.memory_space<vmem>>, %arg7: memref<128x128xf32, #tpu.memory_space<vmem>>, %arg8: memref<1x128xf32, #tpu.memory_space<vmem>>, %arg9: memref<128x128xf32, #tpu.memory_space<vmem>>, %arg10: memref<1x128xf32, #tpu.memory_space<vmem>>, %arg11: memref<2x128xf32, #tpu.memory_space<vmem>>, %arg12: memref<2x128xf32, #tpu.memory_space<vmem>>, %arg13: memref<128x128xf32, #tpu.memory_space<vmem>>, %arg14: memref<128x128xf32, #tpu.memory_space<vmem>>, %arg15: memref<128x128xf32, #tpu.memory_space<vmem>>) attributes {dimension_semantics = [#tpu.dimension_semantics<parallel>, #tpu.dimension_semantics<arbitrary>], iteration_bounds = array<i64: 2, 2>, scalar_prefetch = 2 : i64, scratch_operands = 2 : i64, tpu.core_type = #tpu.core_type<tc>, window_params = [{transform_indices = @transform_0, window_bounds = array<i64: 128, 128>}, {transform_indices = @transform_1, window_bounds = array<i64: 128, 128>}, {transform_indices = @transform_2, window_bounds = array<i64: 128, 128>}, {pipeline_mode = #tpu.pipeline_mode<synchronous>, transform_indices = @transform_3, window_bounds = array<i64: 128, 128>}, {pipeline_mode = #tpu.pipeline_mode<synchronous>, transform_indices = @transform_4, window_bounds = array<i64: 1, 128>}, {pipeline_mode = #tpu.pipeline_mode<synchronous>, transform_indices = @transform_5, window_bounds = array<i64: 128, 128>}, {pipeline_mode = #tpu.pipeline_mode<synchronous>, transform_indices = @transform_6, window_bounds = array<i64: 1, 128>}, {pipeline_mode = #tpu.pipeline_mode<synchronous>, transform_indices = @transform_7, window_bounds = array<i64: 2, 128>}, {pipeline_mode = #tpu.pipeline_mode<synchronous>, transform_indices = @transform_8, window_bounds = array<i64: 2, 128>}, {transform_indices = @transform_9, window_bounds = array<i64: 128, 128>}]} {
    %0 = arith.index_cast %arg0 : i32 to index
    %1 = memref.load %arg3[%0] : memref<2xi32, #tpu.memory_space<smem>>
    %c0_i32 = arith.constant 0 : i32
    %2 = arith.cmpi eq, %arg1, %c0_i32 : i32
    %3 = arith.extui %2 : i1 to i32
    %c0_i32_0 = arith.constant 0 : i32
    %4 = arith.cmpi ne, %3, %c0_i32_0 : i32
    scf.if %4 {
      %cst = arith.constant 0.000000e+00 : f32
      %11 = vector.broadcast %cst : f32 to vector<128x128xf32>
      %c0 = arith.constant 0 : index
      %c0_3 = arith.constant 0 : index
      %12 = vector.load %arg14[%c0, %c0_3] : memref<128x128xf32, #tpu.memory_space<vmem>>, vector<128x128xf32>
      tpu.vector_store %arg14[%c0, %c0_3], %11 {strides = array<i32>} : memref<128x128xf32, #tpu.memory_space<vmem>>, vector<128x128xf32>,
      %c0_4 = arith.constant 0 : index
      %c0_5 = arith.constant 0 : index
      %13 = vector.load %arg6[%c0_4, %c0_5] : memref<128x128xf32, #tpu.memory_space<vmem>>, vector<128x128xf32>
      %c0_6 = arith.constant 0 : index
      %c0_7 = arith.constant 0 : index
      %14 = vector.load %arg7[%c0_6, %c0_7] : memref<128x128xf32, #tpu.memory_space<vmem>>, vector<128x128xf32>
      %cst_8 = arith.constant dense<0.000000e+00> : vector<128x128xf32>
      %15 = tpu.matmul %13, %14, %cst_8 {dimension_numbers = #tpu.dot_dimension_numbers<[1], [0], [0], [1], [0, 0, 1, 1], [], []>} : vector<128x128xf32>, vector<128x128xf32>, vector<128x128xf32> -> vector<128x128xf32>
      %c0_9 = arith.constant 0 : index
      %c0_10 = arith.constant 0 : index
      %16 = vector.load %arg8[%c0_9, %c0_10] : memref<1x128xf32, #tpu.memory_space<vmem>>, vector<1x128xf32>
      %17 = vector.broadcast %16 : vector<1x128xf32> to vector<128x128xf32>
      %18 = arith.addf %15, %17 : vector<128x128xf32>
      %cst_11 = arith.constant 0.000000e+00 : f32
      %19 = vector.broadcast %cst_11 : f32 to vector<128x128xf32>
      %20 = arith.maximumf %18, %19 : vector<128x128xf32>
      %c0_12 = arith.constant 0 : index
      %c0_13 = arith.constant 0 : index
      %21 = vector.load %arg15[%c0_12, %c0_13] : memref<128x128xf32, #tpu.memory_space<vmem>>, vector<128x128xf32>
      tpu.vector_store %arg15[%c0_12, %c0_13], %20 {strides = array<i32>} : memref<128x128xf32, #tpu.memory_space<vmem>>, vector<128x128xf32>,
    } else {
    }
    %5 = arith.cmpi slt, %arg1, %1 : i32
    %6 = arith.extui %5 : i1 to i32
    %c0_i32_1 = arith.constant 0 : i32
    %7 = arith.cmpi ne, %6, %c0_i32_1 : i32
    scf.if %7 {
      %c0 = arith.constant 0 : index
      %c0_3 = arith.constant 0 : index
      %11 = vector.load %arg14[%c0, %c0_3] : memref<128x128xf32, #tpu.memory_space<vmem>>, vector<128x128xf32>
      %c0_4 = arith.constant 0 : index
      %c0_5 = arith.constant 0 : index
      %12 = vector.load %arg4[%c0_4, %c0_5] : memref<128x128xf32, #tpu.memory_space<vmem>>, vector<128x128xf32>
      %c0_6 = arith.constant 0 : index
      %c0_7 = arith.constant 0 : index
      %13 = vector.load %arg5[%c0_6, %c0_7] : memref<128x128xf32, #tpu.memory_space<vmem>>, vector<128x128xf32>
      %cst = arith.constant dense<0.000000e+00> : vector<128x128xf32>
      %14 = tpu.matmul %12, %13, %cst {dimension_numbers = #tpu.dot_dimension_numbers<[1], [0], [0], [1], [0, 0, 1, 1], [], []>} : vector<128x128xf32>, vector<128x128xf32>, vector<128x128xf32> -> vector<128x128xf32>
      %15 = arith.addf %11, %14 : vector<128x128xf32>
      %c0_8 = arith.constant 0 : index
      %c0_9 = arith.constant 0 : index
      %16 = vector.load %arg14[%c0_8, %c0_9] : memref<128x128xf32, #tpu.memory_space<vmem>>, vector<128x128xf32>
      tpu.vector_store %arg14[%c0_8, %c0_9], %15 {strides = array<i32>} : memref<128x128xf32, #tpu.memory_space<vmem>>, vector<128x128xf32>,
    } else {
    }
    %c1_i32 = arith.constant 1 : i32
    %8 = arith.cmpi eq, %arg1, %c1_i32 : i32
    %9 = arith.extui %8 : i1 to i32
    %c0_i32_2 = arith.constant 0 : i32
    %10 = arith.cmpi ne, %9, %c0_i32_2 : i32
    scf.if %10 {
      %c0 = arith.constant 0 : index
      %c0_3 = arith.constant 0 : index
      %11 = vector.load %arg14[%c0, %c0_3] : memref<128x128xf32, #tpu.memory_space<vmem>>, vector<128x128xf32>
      %c0_4 = arith.constant 0 : index
      %c0_5 = arith.constant 0 : index
      %12 = vector.load %arg9[%c0_4, %c0_5] : memref<128x128xf32, #tpu.memory_space<vmem>>, vector<128x128xf32>
      %cst = arith.constant dense<0.000000e+00> : vector<128x128xf32>
      %13 = tpu.matmul %11, %12, %cst {dimension_numbers = #tpu.dot_dimension_numbers<[1], [0], [0], [1], [0, 0, 1, 1], [], []>} : vector<128x128xf32>, vector<128x128xf32>, vector<128x128xf32> -> vector<128x128xf32>
      %c0_6 = arith.constant 0 : index
      %c0_7 = arith.constant 0 : index
      %14 = vector.load %arg10[%c0_6, %c0_7] : memref<1x128xf32, #tpu.memory_space<vmem>>, vector<1x128xf32>
      %15 = vector.broadcast %14 : vector<1x128xf32> to vector<128x128xf32>
      %16 = arith.addf %13, %15 : vector<128x128xf32>
      %cst_8 = arith.constant 0.000000e+00 : f32
      %17 = vector.broadcast %cst_8 : f32 to vector<128x128xf32>
      %18 = arith.maximumf %16, %17 : vector<128x128xf32>
      %c0_9 = arith.constant 0 : index
      %c0_10 = arith.constant 0 : index
      %19 = vector.load %arg15[%c0_9, %c0_10] : memref<128x128xf32, #tpu.memory_space<vmem>>, vector<128x128xf32>
      %cst_11 = arith.constant dense<0.000000e+00> : vector<128xf32>
      %20 = vector.multi_reduction <add>, %19, %cst_11 [1] : vector<128x128xf32> to vector<128xf32>
      %21 = vector.shape_cast %20 : vector<128xf32> to vector<128x1xf32>
      %cst_12 = arith.constant 1.280000e+02 : f32
      %22 = vector.broadcast %cst_12 : f32 to vector<128x1xf32>
      %23 = arith.divf %21, %22 : vector<128x1xf32>
      %24 = vector.broadcast %23 : vector<128x1xf32> to vector<128x128xf32>
      %25 = arith.subf %19, %24 : vector<128x128xf32>
      %26 = arith.mulf %25, %25 : vector<128x128xf32>
      %cst_13 = arith.constant dense<0.000000e+00> : vector<128xf32>
      %27 = vector.multi_reduction <add>, %26, %cst_13 [1] : vector<128x128xf32> to vector<128xf32>
      %28 = vector.shape_cast %27 : vector<128xf32> to vector<128x1xf32>
      %cst_14 = arith.constant 1.280000e+02 : f32
      %29 = vector.broadcast %cst_14 : f32 to vector<128x1xf32>
      %30 = arith.divf %28, %29 : vector<128x1xf32>
      %cst_15 = arith.constant 9.99999971E-10 : f32
      %31 = vector.broadcast %cst_15 : f32 to vector<128x1xf32>
      %32 = arith.addf %30, %31 : vector<128x1xf32>
      %c0_16 = arith.constant 0 : index
      %c0_17 = arith.constant 0 : index
      %33 = vector.load %arg11[%c0_16, %c0_17] : memref<2x128xf32, #tpu.memory_space<vmem>>, vector<1x128xf32>
      %c0_18 = arith.constant 0 : index
      %c0_19 = arith.constant 0 : index
      %34 = vector.load %arg12[%c0_18, %c0_19] : memref<2x128xf32, #tpu.memory_space<vmem>>, vector<1x128xf32>
      %35 = math.rsqrt %32 : vector<128x1xf32>
      %36 = vector.broadcast %33 : vector<1x128xf32> to vector<128x128xf32>
      %37 = vector.broadcast %35 : vector<128x1xf32> to vector<128x128xf32>
      %38 = arith.mulf %36, %37 : vector<128x128xf32>
      %39 = arith.mulf %25, %38 : vector<128x128xf32>
      %40 = vector.broadcast %34 : vector<1x128xf32> to vector<128x128xf32>
      %41 = arith.addf %39, %40 : vector<128x128xf32>
      %cst_20 = arith.constant dense<0.000000e+00> : vector<128xf32>
      %42 = vector.multi_reduction <add>, %18, %cst_20 [1] : vector<128x128xf32> to vector<128xf32>
      %43 = vector.shape_cast %42 : vector<128xf32> to vector<128x1xf32>
      %cst_21 = arith.constant 1.280000e+02 : f32
      %44 = vector.broadcast %cst_21 : f32 to vector<128x1xf32>
      %45 = arith.divf %43, %44 : vector<128x1xf32>
      %46 = vector.broadcast %45 : vector<128x1xf32> to vector<128x128xf32>
      %47 = arith.subf %18, %46 : vector<128x128xf32>
      %48 = arith.mulf %47, %47 : vector<128x128xf32>
      %cst_22 = arith.constant dense<0.000000e+00> : vector<128xf32>
      %49 = vector.multi_reduction <add>, %48, %cst_22 [1] : vector<128x128xf32> to vector<128xf32>
      %50 = vector.shape_cast %49 : vector<128xf32> to vector<128x1xf32>
      %cst_23 = arith.constant 1.280000e+02 : f32
      %51 = vector.broadcast %cst_23 : f32 to vector<128x1xf32>
      %52 = arith.divf %50, %51 : vector<128x1xf32>
      %cst_24 = arith.constant 9.99999971E-10 : f32
      %53 = vector.broadcast %cst_24 : f32 to vector<128x1xf32>
      %54 = arith.addf %52, %53 : vector<128x1xf32>
      %c1 = arith.constant 1 : index
      %c0_25 = arith.constant 0 : index
      %55 = vector.load %arg11[%c1, %c0_25] : memref<2x128xf32, #tpu.memory_space<vmem>>, vector<1x128xf32>
      %c1_26 = arith.constant 1 : index
      %c0_27 = arith.constant 0 : index
      %56 = vector.load %arg12[%c1_26, %c0_27] : memref<2x128xf32, #tpu.memory_space<vmem>>, vector<1x128xf32>
      %57 = math.rsqrt %54 : vector<128x1xf32>
      %58 = vector.broadcast %55 : vector<1x128xf32> to vector<128x128xf32>
      %59 = vector.broadcast %57 : vector<128x1xf32> to vector<128x128xf32>
      %60 = arith.mulf %58, %59 : vector<128x128xf32>
      %61 = arith.mulf %47, %60 : vector<128x128xf32>
      %62 = vector.broadcast %56 : vector<1x128xf32> to vector<128x128xf32>
      %63 = arith.addf %61, %62 : vector<128x128xf32>
      %64 = arith.addf %41, %63 : vector<128x128xf32>
      %c0_28 = arith.constant 0 : index
      %c0_29 = arith.constant 0 : index
      %65 = vector.load %arg13[%c0_28, %c0_29] : memref<128x128xf32, #tpu.memory_space<vmem>>, vector<128x128xf32>
      tpu.vector_store %arg13[%c0_28, %c0_29], %64 {strides = array<i32>} : memref<128x128xf32, #tpu.memory_space<vmem>>, vector<128x128xf32>,
    } else {
    }
    return
  }
  func.func @transform_0(%arg0: i32, %arg1: i32, %arg2: memref<4xi32, #tpu.memory_space<smem>>, %arg3: memref<2xi32, #tpu.memory_space<smem>>) -> (i32, i32) {
    %c2_i32 = arith.constant 2 : i32
    %0 = arith.muli %arg0, %c2_i32 : i32
    %1 = arith.addi %0, %arg1 : i32
    %2 = arith.index_cast %1 : i32 to index
    %3 = memref.load %arg2[%2] : memref<4xi32, #tpu.memory_space<smem>>
    %c0_i32 = arith.constant 0 : i32
    return %arg0, %3 : i32, i32
  }
  func.func @transform_1(%arg0: i32, %arg1: i32, %arg2: memref<4xi32, #tpu.memory_space<smem>>, %arg3: memref<2xi32, #tpu.memory_space<smem>>) -> (i32, i32) {
    %c2_i32 = arith.constant 2 : i32
    %0 = arith.muli %arg0, %c2_i32 : i32
    %1 = arith.addi %0, %arg1 : i32
    %2 = arith.index_cast %1 : i32 to index
    %3 = memref.load %arg2[%2] : memref<4xi32, #tpu.memory_space<smem>>
    %c0_i32 = arith.constant 0 : i32
    %c0_i32_0 = arith.constant 0 : i32
    return %3, %c0_i32 : i32, i32
  }
  func.func @transform_2(%arg0: i32, %arg1: i32, %arg2: memref<4xi32, #tpu.memory_space<smem>>, %arg3: memref<2xi32, #tpu.memory_space<smem>>) -> (i32, i32) {
    %c0_i32 = arith.constant 0 : i32
    %c0_i32_0 = arith.constant 0 : i32
    return %arg0, %c0_i32 : i32, i32
  }
  func.func @transform_3(%arg0: i32, %arg1: i32, %arg2: memref<4xi32, #tpu.memory_space<smem>>, %arg3: memref<2xi32, #tpu.memory_space<smem>>) -> (i32, i32) {
    %c0_i32 = arith.constant 0 : i32
    %c0_i32_0 = arith.constant 0 : i32
    %c0_i32_1 = arith.constant 0 : i32
    return %c0_i32, %c0_i32_0 : i32, i32
  }
  func.func @transform_4(%arg0: i32, %arg1: i32, %arg2: memref<4xi32, #tpu.memory_space<smem>>, %arg3: memref<2xi32, #tpu.memory_space<smem>>) -> (i32, i32) {
    %c0_i32 = arith.constant 0 : i32
    %c0_i32_0 = arith.constant 0 : i32
    %c0_i32_1 = arith.constant 0 : i32
    return %c0_i32, %c0_i32_0 : i32, i32
  }
  func.func @transform_5(%arg0: i32, %arg1: i32, %arg2: memref<4xi32, #tpu.memory_space<smem>>, %arg3: memref<2xi32, #tpu.memory_space<smem>>) -> (i32, i32) {
    %c0_i32 = arith.constant 0 : i32
    %c0_i32_0 = arith.constant 0 : i32
    %c0_i32_1 = arith.constant 0 : i32
    return %c0_i32, %c0_i32_0 : i32, i32
  }
  func.func @transform_6(%arg0: i32, %arg1: i32, %arg2: memref<4xi32, #tpu.memory_space<smem>>, %arg3: memref<2xi32, #tpu.memory_space<smem>>) -> (i32, i32) {
    %c0_i32 = arith.constant 0 : i32
    %c0_i32_0 = arith.constant 0 : i32
    %c0_i32_1 = arith.constant 0 : i32
    return %c0_i32, %c0_i32_0 : i32, i32
  }
  func.func @transform_7(%arg0: i32, %arg1: i32, %arg2: memref<4xi32, #tpu.memory_space<smem>>, %arg3: memref<2xi32, #tpu.memory_space<smem>>) -> (i32, i32) {
    %c0_i32 = arith.constant 0 : i32
    %c0_i32_0 = arith.constant 0 : i32
    %c0_i32_1 = arith.constant 0 : i32
    return %c0_i32, %c0_i32_0 : i32, i32
  }
  func.func @transform_8(%arg0: i32, %arg1: i32, %arg2: memref<4xi32, #tpu.memory_space<smem>>, %arg3: memref<2xi32, #tpu.memory_space<smem>>) -> (i32, i32) {
    %c0_i32 = arith.constant 0 : i32
    %c0_i32_0 = arith.constant 0 : i32
    %c0_i32_1 = arith.constant 0 : i32
    return %c0_i32, %c0_i32_0 : i32, i32
  }
  func.func @transform_9(%arg0: i32, %arg1: i32, %arg2: memref<4xi32, #tpu.memory_space<smem>>, %arg3: memref<2xi32, #tpu.memory_space<smem>>) -> (i32, i32) {
    %c0_i32 = arith.constant 0 : i32
    %c0_i32_0 = arith.constant 0 : i32
    return %arg0, %c0_i32 : i32, i32
  }
}

module attributes {stable_mosaic.version = 11 : i64} {
  func.func @graphsage_kernel(%arg0: i32, %arg1: i32, %arg2: memref<4xi32, #tpu.memory_space<smem>>, %arg3: memref<2xi32, #tpu.memory_space<smem>>, %arg4: memref<128x128xf32, #tpu.memory_space<vmem>>, %arg5: memref<128x128xf32, #tpu.memory_space<vmem>>, %arg6: memref<128x128xf32, #tpu.memory_space<vmem>>, %arg7: memref<128x128xf32, #tpu.memory_space<vmem>>, %arg8: memref<1x128xf32, #tpu.memory_space<vmem>>, %arg9: memref<128x128xf32, #tpu.memory_space<vmem>>, %arg10: memref<1x128xf32, #tpu.memory_space<vmem>>, %arg11: memref<2x128xf32, #tpu.memory_space<vmem>>, %arg12: memref<2x128xf32, #tpu.memory_space<vmem>>, %arg13: memref<128x128xf32, #tpu.memory_space<vmem>>, %arg14: memref<128x128xf32, #tpu.memory_space<vmem>>, %arg15: memref<128x128xf32, #tpu.memory_space<vmem>>) attributes {dimension_semantics = [#tpu.dimension_semantics<parallel>, #tpu.dimension_semantics<arbitrary>], iteration_bounds = array<i64: 2, 2>, scalar_prefetch = 2 : i64, scratch_operands = 2 : i64, tpu.core_type = #tpu.core_type<tc>, window_params = [{transform_indices = @transform_0, window_bounds = array<i64: 128, 128>}, {transform_indices = @transform_1, window_bounds = array<i64: 128, 128>}, {transform_indices = @transform_2, window_bounds = array<i64: 128, 128>}, {pipeline_mode = #tpu.pipeline_mode<synchronous>, transform_indices = @transform_3, window_bounds = array<i64: 128, 128>}, {pipeline_mode = #tpu.pipeline_mode<synchronous>, transform_indices = @transform_4, window_bounds = array<i64: 1, 128>}, {pipeline_mode = #tpu.pipeline_mode<synchronous>, transform_indices = @transform_5, window_bounds = array<i64: 128, 128>}, {pipeline_mode = #tpu.pipeline_mode<synchronous>, transform_indices = @transform_6, window_bounds = array<i64: 1, 128>}, {pipeline_mode = #tpu.pipeline_mode<synchronous>, transform_indices = @transform_7, window_bounds = array<i64: 2, 128>}, {pipeline_mode = #tpu.pipeline_mode<synchronous>, transform_indices = @transform_8, window_bounds = array<i64: 2, 128>}, {transform_indices = @transform_9, window_bounds = array<i64: 128, 128>}]} {
    %0 = arith.index_cast %arg0 : i32 to index
    %1 = memref.load %arg3[%0] : memref<2xi32, #tpu.memory_space<smem>>
    %c0_i32 = arith.constant 0 : i32
    %2 = arith.cmpi eq, %arg1, %c0_i32 : i32
    %3 = arith.extui %2 : i1 to i32
    %c0_i32_0 = arith.constant 0 : i32
    %4 = arith.cmpi ne, %3, %c0_i32_0 : i32
    scf.if %4 {
      %cst = arith.constant 0.000000e+00 : f32
      %11 = vector.broadcast %cst : f32 to vector<128x128xf32>
      %c0 = arith.constant 0 : index
      %c0_3 = arith.constant 0 : index
      %12 = vector.load %arg14[%c0, %c0_3] : memref<128x128xf32, #tpu.memory_space<vmem>>, vector<128x128xf32>
      tpu.vector_store %arg14[%c0, %c0_3], %11 {strides = array<i32>} : memref<128x128xf32, #tpu.memory_space<vmem>>, vector<128x128xf32>,
      %c0_4 = arith.constant 0 : index
      %c0_5 = arith.constant 0 : index
      %13 = vector.load %arg6[%c0_4, %c0_5] : memref<128x128xf32, #tpu.memory_space<vmem>>, vector<128x128xf32>
      %c0_6 = arith.constant 0 : index
      %c0_7 = arith.constant 0 : index
      %14 = vector.load %arg7[%c0_6, %c0_7] : memref<128x128xf32, #tpu.memory_space<vmem>>, vector<128x128xf32>
      %cst_8 = arith.constant dense<0.000000e+00> : vector<128x128xf32>
      %15 = tpu.matmul %13, %14, %cst_8 {dimension_numbers = #tpu.dot_dimension_numbers<[1], [0], [0], [1], [0, 0, 1, 1], [], []>} : vector<128x128xf32>, vector<128x128xf32>, vector<128x128xf32> -> vector<128x128xf32>
      %c0_9 = arith.constant 0 : index
      %c0_10 = arith.constant 0 : index
      %16 = vector.load %arg8[%c0_9, %c0_10] : memref<1x128xf32, #tpu.memory_space<vmem>>, vector<1x128xf32>
      %17 = vector.broadcast %16 : vector<1x128xf32> to vector<128x128xf32>
      %18 = arith.addf %15, %17 : vector<128x128xf32>
      %cst_11 = arith.constant 0.000000e+00 : f32
      %19 = vector.broadcast %cst_11 : f32 to vector<128x128xf32>
      %20 = arith.maximumf %18, %19 : vector<128x128xf32>
      %c0_12 = arith.constant 0 : index
      %c0_13 = arith.constant 0 : index
      %21 = vector.load %arg15[%c0_12, %c0_13] : memref<128x128xf32, #tpu.memory_space<vmem>>, vector<128x128xf32>
      tpu.vector_store %arg15[%c0_12, %c0_13], %20 {strides = array<i32>} : memref<128x128xf32, #tpu.memory_space<vmem>>, vector<128x128xf32>,
    } else {
    }
    %5 = arith.cmpi slt, %arg1, %1 : i32
    %6 = arith.extui %5 : i1 to i32
    %c0_i32_1 = arith.constant 0 : i32
    %7 = arith.cmpi ne, %6, %c0_i32_1 : i32
    scf.if %7 {
      %c0 = arith.constant 0 : index
      %c0_3 = arith.constant 0 : index
      %11 = vector.load %arg14[%c0, %c0_3] : memref<128x128xf32, #tpu.memory_space<vmem>>, vector<128x128xf32>
      %c0_4 = arith.constant 0 : index
      %c0_5 = arith.constant 0 : index
      %12 = vector.load %arg4[%c0_4, %c0_5] : memref<128x128xf32, #tpu.memory_space<vmem>>, vector<128x128xf32>
      %c0_6 = arith.constant 0 : index
      %c0_7 = arith.constant 0 : index
      %13 = vector.load %arg5[%c0_6, %c0_7] : memref<128x128xf32, #tpu.memory_space<vmem>>, vector<128x128xf32>
      %cst = arith.constant dense<0.000000e+00> : vector<128x128xf32>
      %14 = tpu.matmul %12, %13, %cst {dimension_numbers = #tpu.dot_dimension_numbers<[1], [0], [0], [1], [0, 0, 1, 1], [], []>} : vector<128x128xf32>, vector<128x128xf32>, vector<128x128xf32> -> vector<128x128xf32>
      %15 = arith.addf %11, %14 : vector<128x128xf32>
      %c0_8 = arith.constant 0 : index
      %c0_9 = arith.constant 0 : index
      %16 = vector.load %arg14[%c0_8, %c0_9] : memref<128x128xf32, #tpu.memory_space<vmem>>, vector<128x128xf32>
      tpu.vector_store %arg14[%c0_8, %c0_9], %15 {strides = array<i32>} : memref<128x128xf32, #tpu.memory_space<vmem>>, vector<128x128xf32>,
    } else {
    }
    %c1_i32 = arith.constant 1 : i32
    %8 = arith.cmpi eq, %arg1, %c1_i32 : i32
    %9 = arith.extui %8 : i1 to i32
    %c0_i32_2 = arith.constant 0 : i32
    %10 = arith.cmpi ne, %9, %c0_i32_2 : i32
    scf.if %10 {
      %c0 = arith.constant 0 : index
      %c0_3 = arith.constant 0 : index
      %11 = vector.load %arg14[%c0, %c0_3] : memref<128x128xf32, #tpu.memory_space<vmem>>, vector<128x128xf32>
      %c0_4 = arith.constant 0 : index
      %c0_5 = arith.constant 0 : index
      %12 = vector.load %arg9[%c0_4, %c0_5] : memref<128x128xf32, #tpu.memory_space<vmem>>, vector<128x128xf32>
      %cst = arith.constant dense<0.000000e+00> : vector<128x128xf32>
      %13 = tpu.matmul %11, %12, %cst {dimension_numbers = #tpu.dot_dimension_numbers<[1], [0], [0], [1], [0, 0, 1, 1], [], []>} : vector<128x128xf32>, vector<128x128xf32>, vector<128x128xf32> -> vector<128x128xf32>
      %c0_6 = arith.constant 0 : index
      %c0_7 = arith.constant 0 : index
      %14 = vector.load %arg10[%c0_6, %c0_7] : memref<1x128xf32, #tpu.memory_space<vmem>>, vector<1x128xf32>
      %15 = vector.broadcast %14 : vector<1x128xf32> to vector<128x128xf32>
      %16 = arith.addf %13, %15 : vector<128x128xf32>
      %cst_8 = arith.constant 0.000000e+00 : f32
      %17 = vector.broadcast %cst_8 : f32 to vector<128x128xf32>
      %18 = arith.maximumf %16, %17 : vector<128x128xf32>
      %c0_9 = arith.constant 0 : index
      %c0_10 = arith.constant 0 : index
      %19 = vector.load %arg15[%c0_9, %c0_10] : memref<128x128xf32, #tpu.memory_space<vmem>>, vector<128x128xf32>
      %cst_11 = arith.constant dense<0.000000e+00> : vector<128xf32>
      %20 = vector.multi_reduction <add>, %19, %cst_11 [1] : vector<128x128xf32> to vector<128xf32>
      %21 = vector.shape_cast %20 : vector<128xf32> to vector<128x1xf32>
      %cst_12 = arith.constant 1.280000e+02 : f32
      %22 = vector.broadcast %cst_12 : f32 to vector<128x1xf32>
      %23 = arith.divf %21, %22 : vector<128x1xf32>
      %24 = vector.broadcast %23 : vector<128x1xf32> to vector<128x128xf32>
      %25 = arith.subf %19, %24 : vector<128x128xf32>
      %26 = arith.mulf %25, %25 : vector<128x128xf32>
      %cst_13 = arith.constant dense<0.000000e+00> : vector<128xf32>
      %27 = vector.multi_reduction <add>, %26, %cst_13 [1] : vector<128x128xf32> to vector<128xf32>
      %28 = vector.shape_cast %27 : vector<128xf32> to vector<128x1xf32>
      %cst_14 = arith.constant 1.280000e+02 : f32
      %29 = vector.broadcast %cst_14 : f32 to vector<128x1xf32>
      %30 = arith.divf %28, %29 : vector<128x1xf32>
      %cst_15 = arith.constant 9.99999971E-10 : f32
      %31 = vector.broadcast %cst_15 : f32 to vector<128x1xf32>
      %32 = arith.addf %30, %31 : vector<128x1xf32>
      %c0_16 = arith.constant 0 : index
      %c0_17 = arith.constant 0 : index
      %33 = vector.load %arg11[%c0_16, %c0_17] : memref<2x128xf32, #tpu.memory_space<vmem>>, vector<1x128xf32>
      %c0_18 = arith.constant 0 : index
      %c0_19 = arith.constant 0 : index
      %34 = vector.load %arg12[%c0_18, %c0_19] : memref<2x128xf32, #tpu.memory_space<vmem>>, vector<1x128xf32>
      %35 = math.rsqrt %32 : vector<128x1xf32>
      %36 = vector.broadcast %33 : vector<1x128xf32> to vector<128x128xf32>
      %37 = vector.broadcast %35 : vector<128x1xf32> to vector<128x128xf32>
      %38 = arith.mulf %36, %37 : vector<128x128xf32>
      %39 = arith.mulf %25, %38 : vector<128x128xf32>
      %40 = vector.broadcast %34 : vector<1x128xf32> to vector<128x128xf32>
      %41 = arith.addf %39, %40 : vector<128x128xf32>
      %cst_20 = arith.constant dense<0.000000e+00> : vector<128xf32>
      %42 = vector.multi_reduction <add>, %18, %cst_20 [1] : vector<128x128xf32> to vector<128xf32>
      %43 = vector.shape_cast %42 : vector<128xf32> to vector<128x1xf32>
      %cst_21 = arith.constant 1.280000e+02 : f32
      %44 = vector.broadcast %cst_21 : f32 to vector<128x1xf32>
      %45 = arith.divf %43, %44 : vector<128x1xf32>
      %46 = vector.broadcast %45 : vector<128x1xf32> to vector<128x128xf32>
      %47 = arith.subf %18, %46 : vector<128x128xf32>
      %48 = arith.mulf %47, %47 : vector<128x128xf32>
      %cst_22 = arith.constant dense<0.000000e+00> : vector<128xf32>
      %49 = vector.multi_reduction <add>, %48, %cst_22 [1] : vector<128x128xf32> to vector<128xf32>
      %50 = vector.shape_cast %49 : vector<128xf32> to vector<128x1xf32>
      %cst_23 = arith.constant 1.280000e+02 : f32
      %51 = vector.broadcast %cst_23 : f32 to vector<128x1xf32>
      %52 = arith.divf %50, %51 : vector<128x1xf32>
      %cst_24 = arith.constant 9.99999971E-10 : f32
      %53 = vector.broadcast %cst_24 : f32 to vector<128x1xf32>
      %54 = arith.addf %52, %53 : vector<128x1xf32>
      %c1 = arith.constant 1 : index
      %c0_25 = arith.constant 0 : index
      %55 = vector.load %arg11[%c1, %c0_25] : memref<2x128xf32, #tpu.memory_space<vmem>>, vector<1x128xf32>
      %c1_26 = arith.constant 1 : index
      %c0_27 = arith.constant 0 : index
      %56 = vector.load %arg12[%c1_26, %c0_27] : memref<2x128xf32, #tpu.memory_space<vmem>>, vector<1x128xf32>
      %57 = math.rsqrt %54 : vector<128x1xf32>
      %58 = vector.broadcast %55 : vector<1x128xf32> to vector<128x128xf32>
      %59 = vector.broadcast %57 : vector<128x1xf32> to vector<128x128xf32>
      %60 = arith.mulf %58, %59 : vector<128x128xf32>
      %61 = arith.mulf %47, %60 : vector<128x128xf32>
      %62 = vector.broadcast %56 : vector<1x128xf32> to vector<128x128xf32>
      %63 = arith.addf %61, %62 : vector<128x128xf32>
      %64 = arith.addf %41, %63 : vector<128x128xf32>
      %c0_28 = arith.constant 0 : index
      %c0_29 = arith.constant 0 : index
      %65 = vector.load %arg13[%c0_28, %c0_29] : memref<128x128xf32, #tpu.memory_space<vmem>>, vector<128x128xf32>
      tpu.vector_store %arg13[%c0_28, %c0_29], %64 {strides = array<i32>} : memref<128x128xf32, #tpu.memory_space<vmem>>, vector<128x128xf32>,
    } else {
    }
    return
  }
  func.func @transform_0(%arg0: i32, %arg1: i32, %arg2: memref<4xi32, #tpu.memory_space<smem>>, %arg3: memref<2xi32, #tpu.memory_space<smem>>) -> (i32, i32) {
    %c2_i32 = arith.constant 2 : i32
    %0 = arith.muli %arg0, %c2_i32 : i32
    %1 = arith.addi %0, %arg1 : i32
    %2 = arith.index_cast %1 : i32 to index
    %3 = memref.load %arg2[%2] : memref<4xi32, #tpu.memory_space<smem>>
    %c0_i32 = arith.constant 0 : i32
    return %arg0, %3 : i32, i32
  }
  func.func @transform_1(%arg0: i32, %arg1: i32, %arg2: memref<4xi32, #tpu.memory_space<smem>>, %arg3: memref<2xi32, #tpu.memory_space<smem>>) -> (i32, i32) {
    %c2_i32 = arith.constant 2 : i32
    %0 = arith.muli %arg0, %c2_i32 : i32
    %1 = arith.addi %0, %arg1 : i32
    %2 = arith.index_cast %1 : i32 to index
    %3 = memref.load %arg2[%2] : memref<4xi32, #tpu.memory_space<smem>>
    %c0_i32 = arith.constant 0 : i32
    %c0_i32_0 = arith.constant 0 : i32
    return %3, %c0_i32 : i32, i32
  }
  func.func @transform_2(%arg0: i32, %arg1: i32, %arg2: memref<4xi32, #tpu.memory_space<smem>>, %arg3: memref<2xi32, #tpu.memory_space<smem>>) -> (i32, i32) {
    %c0_i32 = arith.constant 0 : i32
    %c0_i32_0 = arith.constant 0 : i32
    return %arg0, %c0_i32 : i32, i32
  }
  func.func @transform_3(%arg0: i32, %arg1: i32, %arg2: memref<4xi32, #tpu.memory_space<smem>>, %arg3: memref<2xi32, #tpu.memory_space<smem>>) -> (i32, i32) {
    %c0_i32 = arith.constant 0 : i32
    %c0_i32_0 = arith.constant 0 : i32
    %c0_i32_1 = arith.constant 0 : i32
    return %c0_i32, %c0_i32_0 : i32, i32
  }
  func.func @transform_4(%arg0: i32, %arg1: i32, %arg2: memref<4xi32, #tpu.memory_space<smem>>, %arg3: memref<2xi32, #tpu.memory_space<smem>>) -> (i32, i32) {
    %c0_i32 = arith.constant 0 : i32
    %c0_i32_0 = arith.constant 0 : i32
    %c0_i32_1 = arith.constant 0 : i32
    return %c0_i32, %c0_i32_0 : i32, i32
  }
  func.func @transform_5(%arg0: i32, %arg1: i32, %arg2: memref<4xi32, #tpu.memory_space<smem>>, %arg3: memref<2xi32, #tpu.memory_space<smem>>) -> (i32, i32) {
    %c0_i32 = arith.constant 0 : i32
    %c0_i32_0 = arith.constant 0 : i32
    %c0_i32_1 = arith.constant 0 : i32
    return %c0_i32, %c0_i32_0 : i32, i32
  }
  func.func @transform_6(%arg0: i32, %arg1: i32, %arg2: memref<4xi32, #tpu.memory_space<smem>>, %arg3: memref<2xi32, #tpu.memory_space<smem>>) -> (i32, i32) {
    %c0_i32 = arith.constant 0 : i32
    %c0_i32_0 = arith.constant 0 : i32
    %c0_i32_1 = arith.constant 0 : i32
    return %c0_i32, %c0_i32_0 : i32, i32
  }
  func.func @transform_7(%arg0: i32, %arg1: i32, %arg2: memref<4xi32, #tpu.memory_space<smem>>, %arg3: memref<2xi32, #tpu.memory_space<smem>>) -> (i32, i32) {
    %c0_i32 = arith.constant 0 : i32
    %c0_i32_0 = arith.constant 0 : i32
    %c0_i32_1 = arith.constant 0 : i32
    return %c0_i32, %c0_i32_0 : i32, i32
  }
  func.func @transform_8(%arg0: i32, %arg1: i32, %arg2: memref<4xi32, #tpu.memory_space<smem>>, %arg3: memref<2xi32, #tpu.memory_space<smem>>) -> (i32, i32) {
    %c0_i32 = arith.constant 0 : i32
    %c0_i32_0 = arith.constant 0 : i32
    %c0_i32_1 = arith.constant 0 : i32
    return %c0_i32, %c0_i32_0 : i32, i32
  }
  func.func @transform_9(%arg0: i32, %arg1: i32, %arg2: memref<4xi32, #tpu.memory_space<smem>>, %arg3: memref<2xi32, #tpu.memory_space<smem>>) -> (i32, i32) {
    %c0_i32 = arith.constant 0 : i32
    %c0_i32_0 = arith.constant 0 : i32
    return %arg0, %c0_i32 : i32, i32
  }
}

</mosaic_0001>

<bundles_post_ra>
// kernel: tpu_custom_call.1
= control target key start
LH: loop header
LB: loop body
LE: loop exit
PB: predicated region body
PF: predicated region fallthrough
CT: control target
= control target key end

     0   :  { %s4011_s0 = inlined_call_operand.hbm [shape: s32[4], index: 0, kind: input, shape index: {}]   ;;  %s4012_s2 = inlined_call_operand.hbm [shape: f32[256,256], index: 2, kind: input, shape index: {}]   ;;  %s4013_s3 = inlined_call_operand.hbm [shape: f32[256,128], index: 3, kind: input, shape index: {}]   ;;  %s4014_s4 = inlined_call_operand.hbm [shape: f32[256,128], index: 4, kind: input, shape index: {}]   ;;  %s4015_s5 = inlined_call_operand.hbm [shape: f32[128,128], index: 5, kind: input, shape index: {}]   ;;  %s4016_s6 = inlined_call_operand.vmem [shape: f32[1,128], index: 6, kind: input, shape index: {}]   ;;  %s4017_s7 = inlined_call_operand.hbm [shape: f32[128,128], index: 7, kind: input, shape index: {}]   ;;  %s4018_s8 = inlined_call_operand.vmem [shape: f32[1,128], index: 8, kind: input, shape index: {}]   ;;  %s4019_s9 = inlined_call_operand.vmem [shape: f32[2,128], index: 9, kind: input, shape index: {}]   ;;  %s4020_s10 = inlined_call_operand.vmem [shape: f32[2,128], index: 10, kind: input, shape index: {}]   ;;  %s4021_s11 = inlined_call_operand.hbm [shape: f32[256,128], index: 11, kind: output, shape index: {}]   ;;  %s4022_s1 = inlined_call_operand.vmem [shape: s32[2], index: 1, kind: input, shape index: {}]  }
   0x1   :  { %4055 = sst [smem:[#allocation38_spill]] %s4012_s2  ;;  %s2520_s19 = scalar_lea.hbm %s4011_s0, 16 }
   0x2   :  { %4056 = sst [smem:[#allocation39_spill]] %s4013_s3  ;;  %p2521_p0 = scmp.ne.s32.totalorder %s4011_s0, %s2520_s19 }
   0x3   :  { %4057 = sst [smem:[#allocation40_spill]] %s4014_s4  ;;  %p2524_p1 = scmp.lt.u32.totalorder %s2520_s19, %s4011_s0 }
   0x4   :  { %4058 = sst [smem:[#allocation41_spill]] %s4015_s5 }
   0x5   :  { %4059 = sst [smem:[#allocation42_spill]] %s4016_s6  ;;  %p2526_p2 = pnand %p2524_p1, %p2521_p0 }
   0x6   :  { %4060 = sst [smem:[#allocation43_spill]] %s4017_s7 }
   0x7   :  { %4061 = sst [smem:[#allocation44_spill]] %s4018_s8 }
   0x8   :  { %4062 = sst [smem:[#allocation45_spill]] %s4019_s9 }
   0x9   :  { %4063 = sst [smem:[#allocation46_spill]] %s4020_s10 }
   0xa   :  { %4064 = sst [smem:[#allocation47_spill]] %s4021_s11 }
   0xb   :  { %2529 = shalt.err (!%p2526_p2)  }
   0xc   :  { %s2850_s24 = smov [#allocation5]   ;;  %s18_s29 = sshll.u32 %s4022_s1, 4  ;;  %s19_s29 = int_to_ptr.vmem [resolvable:$true] %s18_s29 }
   0xd   :  { %17 = dma.hbm_to_smem %s4011_s0, 16, %s2850_s24, [#allocation4] }
   0xe   :  { %s2530_s30 = scalar_lea.vmem %s19_s29, 16  ;;  %p2535_p4 = scmp.lt.s32.totalorder %s19_s29, %s19_s29 }
   0xf   :  { %p2531_p3 = scmp.ne.s32.totalorder %s19_s29, %s2530_s30  ;;  %p2536_p5 = scmp.lt.s32.totalorder %s2530_s30, %s2530_s30 }
  0x11   :  { %p2537_p6 = por %p2536_p5, %p2535_p4 }
  0x13   :  { %p2538_p7 = pnand %p2537_p6, %p2531_p3 }
  0x15   :  { %2541 = shalt.err (!%p2538_p7)  }
  0x16   :  { %s2851_s12 = smov [#allocation6]  }
  0x17   :  { %21 = dma.vmem_to_smem %s19_s29, 16, %s2851_s12, [#allocation4] }
  0x18   :  { %2772 = dma.done.wait [#allocation4], 32 }
  0x19   :  { %2773 = vsyncadd [#allocation4], 4294967264 }
  0x1a   :  { %23 = sfence }
  0x1b   :  { %24 = vsyncpa [#allocation8], 0 }
  0x1c   :  { %26 = vsyncpa [#allocation8 + $0x1], 0 }
  0x1d   :  { %27 = vsyncpa [#allocation11], 0 }
  0x1e   :  { %29 = vsyncpa [#allocation11 + $0x1], 0 }
  0x1f   :  { %30 = vsyncpa [#allocation14], 0 }
  0x20   :  { %31 = vsyncpa [#allocation9], 0 }
  0x21   :  { %33 = vsyncpa [#allocation9 + $0x1], 0  ;;  %s2939_s0 = smov 0   ;;  %s2941_s1 = smov 0  }
  0x22   :  { %s2943_s13 = smov 0   ;;  %s2945_s14 = smov 0  }
  0x23   :  { %s2947_s15 = smov 0   ;;  %s2949_s16 = smov 0  }
  0x24   :  { %s2951_s17 = smov 0   ;;  %s2953_s18 = smov 0  }
  0x25   :  { %s2955_s19 = smov 0   ;;  %s2957_s20 = smov 0  }
  0x26   :  { %s2959_s21 = smov 0   ;;  %s2961_s22 = smov 0  }
  0x27   :  { %s2963_s23 = smov 0   ;;  %s2965_s24 = smov 0  }
  0x28 LB: > { %4065 = sst [smem:[#allocation27_spill]] %s2796_s0  ;;  %s3010_s25 = sadd.s32 4294967295, %s2848_s24   ;;  %s2848_s24 = sphi %s2965_s24, %s39_s24   ;;  %s2844_s23 = sphi %s2963_s23, %s4156_s23   ;;  %s2840_s22 = sphi %s2961_s22, %s4146_s22   ;;  %s2836_s21 = sphi %s2959_s21, %s4155_s21   ;;  %s2832_s20 = sphi %s2957_s20, %s4145_s20   ;;  %s2828_s19 = sphi %s2955_s19, %s4154_s19   ;;  %s2824_s18 = sphi %s2953_s18, %s4153_s18   ;;  %s2820_s17 = sphi %s2951_s17, %s4152_s17   ;;  %s2816_s16 = sphi %s2949_s16, %s4151_s16   ;;  %s2812_s15 = sphi %s2947_s15, %s4150_s15   ;;  %s2808_s14 = sphi %s2945_s14, %s4144_s14   ;;  %s2804_s13 = sphi %s2943_s13, %s4149_s13   ;;  %s2800_s1 = sphi %s2941_s1, %s4143_s1   ;;  %s2796_s0 = sphi %s2939_s0, %s4142_s0  }
  0x29   : > { %4066 = sst [smem:[#allocation28_spill]] %s2800_s1  ;;  %p1834_p8 = scmp.ge.s32.totalorder %s2848_s24, 1 }
  0x2a   : > { %4067 = sst [smem:[#allocation29_spill]] %s2804_s13  ;;  %p4026_p9 = scmp.eq.s32.totalorder %s3010_s25, 0 }
  0x2b   : > { %4068 = sst [smem:[#allocation30_spill]] %s2812_s15  ;;  %p300_p11 = scmp.lt.s32.totalorder %s2848_s24, 5 }
  0x2c   : > { %4069 = sst [smem:[#allocation31_spill]] %s2832_s20  ;;  %s2852_s27 = smov [#allocation13]  }
  0x2d   : > { %4070 = sst [smem:[#allocation32_spill]] %s2836_s21  ;;  %p3016_p12 = pnand %p1834_p8, %p300_p11 }
  0x2e   : > { %4071 = sst [smem:[#allocation33_spill]] %s2840_s22  ;;  %s312_s28 = sshll.u32 %s2852_s27, 4  ;;  %s313_s28 = int_to_ptr.vmem [resolvable:$true] %s312_s28 }
  0x2f   : > { %s4072_s26 = scalar_select %p3016_p12, 1, 0 }
  0x30   : > { %p2303_p13 = pneg %p3016_p12  ;;  %s4075_s5 = sld [smem:[#allocation41_spill]] }
  0x31   : > { %4073 = sst [smem:[#allocation34_spill]] %s4072_s26 }
  0x32   : > { %p3024_p0 = pnand %p2303_p13, %p4026_p9 }
  0x34   : > { %p2544_p2 = pneg %p3024_p0 }
  0x36   : > { %s2542_s11 = scalar_lea.hbm %s4075_s5, 2048 }
  0x37   : > { %p2543_p1 = scmp.ne.s32.totalorder %s4075_s5, %s2542_s11  ;;  %p2549_p5 = scmp.lt.u32.totalorder %s2542_s11, %s4075_s5 }
  0x39   : > { %p2545_p3 = pnand %p2544_p2, %p2543_p1 }
  0x3b   : > { %p2546_p4 = pneg %p2545_p3 }
  0x3d   : > { %p2551_p6 = pnand %p2549_p5, %p2546_p4 }
  0x3f   : > { %2554 = shalt.err (!%p2551_p6)
}
  0x40   : > { %s2555_s30 = scalar_lea.vmem %s313_s28, 2048  ;;  %p2563_p13 = scmp.lt.s32.totalorder %s313_s28, %s313_s28 }
  0x41   : > { %p2556_p7 = scmp.ne.s32.totalorder %s313_s28, %s2555_s30  ;;  %p2564_p10 = scmp.lt.s32.totalorder %s2555_s30, %s2555_s30 }
  0x43   : > { %p2558_p8 = pnand %p2556_p7, %p2544_p2  ;;  %p2565_p9 = por %p2564_p10, %p2563_p13 }
  0x45   : > { %p2559_p11 = pneg %p2558_p8 }
  0x47   : > { %p2566_p12 = pnand %p2565_p9, %p2559_p11 }
  0x49   : > { %2569 = shalt.err (!%p2566_p12)
}
  0x4a   : > { %s4028_s9 = smov 128   ;;  %s4030_s8 = smov 8  }
  0x4b   : > { %2306 = dma.hbm_to_vmem [thread:$0]  (!%p3024_p0), %s4075_s5, 2048, %s313_s28, [#allocation14], %s4028_s9, %s4028_s9, %s4030_s8  }
  0x4c   : > { %s48_s12 = sadd.s32 1, %s2840_s22  ;;  %s51_s27 = sadd.s32 1, %s2844_s23 }
  0x4d   : > { %p49_p9 = scmp.ge.s32.totalorder %s48_s12, 2  ;;  %s1830_s30 = sshll.u32 %s2844_s23, 1 }
  0x4e   : > { %s3057_s6 = sadd.s32 %s2840_s22, %s1830_s30  ;;  %p4045_p10 = scmp.eq.s32.totalorder %s2848_s24, 0 }
  0x4f   : > { %s4158_s12 = smov (%p49_p9, %s48_s12), 0  ;;  %s4160_s27 = smov (!%p49_p9, %s51_s27), %s2844_s23 }
  0x50   : > { %4076 = sst [smem:[#allocation35_spill]] %s4158_s12  ;;  %p53_p12 = scmp.ge.s32.totalorder %s4160_s27, 2 }
  0x51   : > { %s3064_s10 = sld [smem:[#allocation5 + %s3057_s6]]  ;;  %s98_s11 = sadd.s32 1, %s2816_s16 }
  0x52   : > { %s91_s28 = sld [smem:[#allocation5 + %s3057_s6]]  ;;  %p105_p1 = scmp.ne.s32.totalorder %s2816_s16, %s2812_s15 }
  0x53   : > { %p111_p3 = scmp.ne.s32.totalorder %s2812_s15, %s2808_s14  ;;  %s4162_s27 = smov (%p53_p12, %s4160_s27), 0 }
  0x54   : > { %4077 = sst [smem:[#allocation36_spill]] %s4162_s27  ;;  %p3076_p4 = por %p105_p1, %p4045_p10 }
  0x55   : > { %p4079_p5 = scmp.eq.s32.totalorder %s3010_s25, 0  ;;  %s1831_s8 = sshll.u32 %s4162_s27, 1 }
  0x56   : > { %p4044_p7 = scmp.lt.s32.totalorder %s2848_s24, 4  ;;  %s59_s14 = sadd.s32 %s1831_s8, %s4158_s12 }
  0x57   : > { %p3082_p6 = por %p111_p3, %p4079_p5  ;;  %s3090_s22 = sld [smem:[#allocation5 + %s59_s14]] }
  0x58   : > { %s94_s20 = sld [smem:[#allocation5 + %s59_s14]]  ;;  %s379_s21 = sand.u32 1, %s2816_s16  }
  0x59   : > { %s4080_s9 = scalar_select %p3082_p6, 1, 0 }
  0x5a   : > { %s1843_s15 = sshll.u32 %s379_s21, 7  ;;  %p3097_p8 = pnand %p4044_p7, %p3076_p4 }
  0x5b   : > { %4081 = sst [smem:[#allocation37_spill]] %s4080_s9  ;;  %s381_s8 = scalar_lea.vmem [#allocation10], %s1843_s15 }
  0x5c   : > { %s4082_s26 = scalar_select %p3097_p8, 1, 0 }
  0x5d   : > { %s2290_s9 = scalar_select %p3076_p4, [#allocation5], [#allocation18] }
  0x5e   : > { %s2291_s4 = scalar_select %p3076_p4, %s3057_s6, 0 }
  0x5f   : > { %s95_s2 = ssub.s32 %s91_s28, %s94_s20  ;;  %s391_s12 = sshll.u32 %s381_s8, 4  ;;  %s3106_s12 = int_to_ptr.vmem [resolvable:$true] %s391_s12 }
  0x60   : > { %p96_p11 = scmp.eq.s32.totalorder %s95_s2, 0  ;;  %s4164_s9 = smov (!%p4044_p7, %s2290_s9), [#allocation20] }
  0x61   : > { %s4166_s4 = smov (!%p4044_p7, %s2291_s4), 0  ;;  %s2855_s14 = smov [#allocation15]  }
  0x62   : > { %s3111_s21 = scalar_select %p96_p11, %s2816_s16, %s98_s11  }
  0x63   : > { %s328_s5 = sshll.u32 %s2855_s14, 4  ;;  %s384_s0 = sld [smem:[%s4164_s9 + %s4166_s4]]  ;;  %s329_s5 = int_to_ptr.vmem [resolvable:$true] %s328_s5 }
  0x64   : > { %s4083_s7 = sld [smem:[#allocation43_spill]] }
  0x6a   : > { %s2570_s13 = scalar_lea.hbm %s4083_s7, 2048 }
  0x6b   : > { %p2571_p13 = scmp.ne.s32.totalorder %s4083_s7, %s2570_s13  ;;  %p2577_p1 = scmp.lt.u32.totalorder %s2570_s13, %s4083_s7 }
  0x6d   : > { %p2573_p9 = pnand %p2571_p13, %p2544_p2 }
  0x6f   : > { %p2574_p12 = pneg %p2573_p9 }
  0x71   : > { %p2579_p3 = pnand %p2577_p1, %p2574_p12 }
  0x73   : > { %2582 = shalt.err (!%p2579_p3)
}
  0x74   : > { %s2583_s4 = scalar_lea.vmem %s329_s5, 2048  ;;  %p2591_p7 = scmp.lt.s32.totalorder %s329_s5, %s329_s5 }
  0x75   : > { %p2584_p4 = scmp.ne.s32.totalorder %s329_s5, %s2583_s4  ;;  %p2592_p10 = scmp.lt.s32.totalorder %s2583_s4, %s2583_s4 }
  0x77   : > { %p2586_p5 = pnand %p2584_p4, %p2544_p2  ;;  %p2593_p6 = por %p2592_p10, %p2591_p7 }
  0x79   : > { %p2587_p11 = pneg %p2586_p5 }
  0x7b   : > { %p2594_p8 = pnand %p2593_p6, %p2587_p11 }
  0x7d   : > { %2597 = shalt.err (!%p2594_p8)
}
  0x7e   : > { %s4084_s1 = smov 8   ;;  %s4085_s9 = smov 128  }
  0x7f   : > { %2309 = dma.hbm_to_vmem [thread:$0]  (!%p3024_p0), %s4083_s7, 2048, %s329_s5, [#allocation14], %s4085_s9, %s4085_s9, %s4084_s1  }
  0x80   : > { %s3140_s8 = ssub.s32 %s2844_s23, %s4162_s27  ;;  %s62_s14 = ssub.s32 %s3064_s10, %s3090_s22 }
  0x81   : > { %s1872_s30 = sshll.u32 %s384_s0, 11  ;;  %s3145_s29 = sor.u32 %s62_s14, %s3140_s8 }
  0x82   : > { %s4086_s3 = sld [smem:[#allocation39_spill]]  ;;  %p64_p2 = scmp.eq.s32.totalorder %s3145_s29, 0 }
  0x83   : > { %s4087_s28 = sand.u32 1, %s2848_s24   ;;  %p4088_p10 = scmp.ne.s32.totalorder %s4082_s26, 0 }
  0x84   : > { %s3155_s5 = scalar_lea.sflag [#allocation11], %s4087_s28 }
  0x85   : > { %p2600_p6 = pneg %p4088_p10 }
  0x88   : > { %s3150_s2 = scalar_lea.hbm %s4086_s3, %s1872_s30  ;;  %s2603_s10 = scalar_lea.hbm %s4086_s3, 4096 }
  0x89   : > { %s2598_s4 = scalar_lea.hbm %s3150_s2, 2048  ;;  %p2604_p13 = scmp.lt.u32.totalorder %s3150_s2, %s4086_s3 }
  0x8a   : > { %p2599_p0 = scmp.ne.s32.totalorder %s3150_s2, %s2598_s4  ;;  %p2605_p9 = scmp.lt.u32.totalorder %s2603_s10, %s2598_s4 }
  0x8b   : > { %p2607_p1 = scmp.lt.u32.totalorder %s2598_s4, %s3150_s2 }
  0x8c   : > { %p2601_p7 = pnand %p2600_p6, %p2599_p0  ;;  %p2606_p12 = por %p2605_p9, %p2604_p13 }
  0x8e   : > { %p2602_p8 = pneg %p2601_p7  ;;  %p2608_p3 = por %p2607_p1, %p2606_p12 }
  0x90   : > { %p2609_p4 = pnand %p2608_p3, %p2602_p8 }
  0x92   : > { %2612 = shalt.err (!%p2609_p4)
}
  0x93   : > { %s2613_s14 = scalar_lea.vmem %s3106_s12, 2048  ;;  %s2856_s30 = smov [#allocation10]  }
  0x94   : > { %p2614_p5 = scmp.ne.s32.totalorder %s3106_s12, %s2613_s14  ;;  %s2618_s20 = sshll.u32 %s2856_s30, 4  ;;  %s2619_s20 = int_to_ptr.vmem [resolvable:$false] %s2618_s20 }
  0x95   : > { %s2620_s15 = scalar_lea.vmem %s2619_s20, 4096  ;;  %p2621_p7 = scmp.lt.s32.totalorder %s3106_s12, %s2619_s20 }
  0x96   : > { %p2616_p11 = pnand %p2614_p5, %p2600_p6  ;;  %p2622_p13 = scmp.lt.s32.totalorder %s2620_s15, %s2613_s14 }
  0x98   : > { %p2617_p0 = pneg %p2616_p11  ;;  %p2623_p9 = por %p2622_p13, %p2621_p7 }
  0x9a   : > { %p2624_p12 = pnand %p2623_p9, %p2617_p0 }
  0x9c   : > { %2627 = shalt.err (!%p2624_p12)
}
  0x9d   : > { %2320 = dma.hbm_to_vmem [thread:$0]  (!%p4088_p10), %s3150_s2, 2048, %s3106_s12, %s3155_s5, %s4085_s9, %s4085_s9, %s4084_s1  }
  0x9e   : > { %s66_s26 = sadd.s32 1, %s2828_s19  ;;  %p73_p6 = scmp.ne.s32.totalorder %s2828_s19, %s2824_s18 }
  0x9f   : > { %s3192_s28 = scalar_select %p64_p2, %s2828_s19, %s66_s26  }
  0xa0   : > { %p4089_p8 = scmp.eq.s32.totalorder %s2848_s24, 0  ;;  %p79_p3 = scmp.ne.s32.totalorder %s2824_s18, %s2820_s17 }
  0xa1   : > { %s4090_s4 = sld [smem:[#allocation29_spill]]  ;;  %s351_s0 = sand.u32 1, %s2828_s19  }
  0xa2   : > { %p75_p1 = por %p4089_p8, %p73_p6  ;;  %s4091_s22 = sld [smem:[#allocation28_spill]] }
  0xa3   : > { %s1871_s10 = sshll.u32 %s2844_s23, 5  ;;  %p4092_p4 = scmp.eq.s32.totalorder %s3010_s25, 0 }
  0xa4   : > { %s4094_s12 = sld [smem:[#allocation27_spill]]  ;;  %s1838_s29 = sshll.u32 %s351_s0, 7 }
  0xa5   : > { %p3202_p5 = por %p4092_p4, %p79_p3  ;;  %p4095_p2 = scmp.lt.s32.totalorder %s2848_s24, 4 }
  0xa6   : > { %s2287_s17 = scalar_select %p75_p1, [#allocation5], [#allocation17] }
  0xa7   : > { %s4093_s13 = scalar_select %p3202_p5, 1, 0 }
  0xa8   : > { %p3208_p10 = pnand %p4095_p2, %p75_p1  ;;  %s4168_s6 = smov (!%p75_p1, %s3057_s6), 0 }
  0xa9   : > { %p4097_p11 = pmov %p4095_p2  ;;  %p4098_p0 = pmov %p4095_p2 }
  0xaa   : > { %s355_s11 = scalar_lea.vmem [#allocation7], %s1838_s29  ;;  %s124_s15 = sadd.s32 1, %s4090_s4 }
  0xab   : > { %s4170_s17 = smov (!%p4097_p11, %s2287_s17), [#allocation19]  ;;  %s4172_s6 = smov (!%p4098_p0, %s4168_s6), 0 }
  0xac   : > { %s367_s14 = sshll.u32 %s355_s11, 4  ;;  %s358_s30 = sld [smem:[%s4170_s17 + %s4172_s6]]  ;;  %s3217_s14 = int_to_ptr.vmem [resolvable:$true] %s367_s14 }
  0xad   : > { %p4050_p13 = scmp.ne.s32.totalorder %s4090_s4, %s4091_s22  ;;  %p4049_p9 = scmp.ne.s32.totalorder %s4091_s22, %s4094_s12 }
  0xae   : > { %p4099_p12 = pmov %p4089_p8  ;;  %s4101_s27 = sld [smem:[#allocation38_spill]] }
  0xaf   : > { %p4102_p8 = pmov %p4092_p4  ;;  %s3249_s17 = scalar_lea.sflag [#allocation8], %s351_s0 }
  0xb0   : > { %p3231_p6 = por %p4050_p13, %p4099_p12  ;;  %p2630_p4 = pneg %p3208_p10 }
  0xb1   : > { %p3245_p1 = por %p4049_p9, %p4102_p8 }
  0xb2   : > { %s364_s26 = sadd.s32 %s1871_s10, %s358_s30 }
  0xb3   : > { %s1842_s3 = sshll.u32 %s364_s26, 7 }
  0xb4   : > { %s3238_s6 = scalar_lea.hbm %s4101_s27, %s1842_s3  ;;  %s2633_s29 = scalar_lea.hbm %s4101_s27, 8192 }
  0xb5   : > { %s4103_s10 = scalar_select %p3245_p1, 1, 0 }
  0xb6   : > { %s2628_s30 = scalar_lea.hbm %s3238_s6, 2048  ;;  %p2634_p0 = scmp.lt.u32.totalorder %s3238_s6, %s4101_s27 }
  0xb7   : > { %p2629_p3 = scmp.ne.s32.totalorder %s3238_s6, %s2628_s30  ;;  %p2635_p12 = scmp.lt.u32.totalorder %s2633_s29, %s2628_s30 }
  0xb8   : > { %p2637_p9 = scmp.lt.u32.totalorder %s2628_s30, %s3238_s6 }
  0xb9   : > { %p2631_p2 = pnand %p2630_p4, %p2629_p3  ;;  %p2636_p8 = por %p2635_p12, %p2634_p0 }
  0xbb   : > { %p2632_p11 = pneg %p2631_p2  ;;  %p2638_p13 = por %p2637_p9, %p2636_p8 }
  0xbd   : > { %p2639_p7 = pnand %p2638_p13, %p2632_p11 }
  0xbf   : > { %2642 = shalt.err (!%p2639_p7)
}
  0xc0   : > { %s2643_s0 = scalar_lea.vmem %s3217_s14, 2048  ;;  %s2857_s3 = smov [#allocation7]  }
  0xc1   : > { %p2644_p3 = scmp.ne.s32.totalorder %s3217_s14, %s2643_s0  ;;  %s2648_s26 = sshll.u32 %s2857_s3, 4  ;;  %s2649_s26 = int_to_ptr.vmem [resolvable:$false] %s2648_s26 }
  0xc2   : > { %s2650_s20 = scalar_lea.vmem %s2649_s26, 4096  ;;  %p2651_p5 = scmp.lt.s32.totalorder %s3217_s14, %s2649_s26 }
  0xc3   : > { %p2646_p2 = pnand %p2644_p3, %p2630_p4  ;;  %p2652_p0 = scmp.lt.s32.totalorder %s2650_s20, %s2643_s0 }
  0xc5   : > { %p2647_p1 = pneg %p2646_p2  ;;  %p2653_p12 = por %p2652_p0, %p2651_p5 }
  0xc7   : > { %p2654_p9 = pnand %p2653_p12, %p2647_p1 }
  0xc9   : > { %2657 = shalt.err (!%p2654_p9)
}
  0xca   : > { %s2858_s30 = smov 256   ;;  %p4104_p5 = scmp.eq.s32.totalorder %s3140_s8, 0 }
  0xcb   : > { %2315 = dma.hbm_to_vmem [thread:$0]  (!%p3208_p10), %s3238_s6, 2048, %s3217_s14, %s3249_s17, %s2858_s30, %s4085_s9, %s4084_s1  }
  0xcc   : > { %s3284_s2 = scalar_select %p4104_p5, %s4090_s4, %s124_s15  }
  0xcd   : > { %p4105_p7 = scmp.ne.s32.totalorder %s4090_s4, %s4091_s22  ;;  %p4106_p13 = scmp.eq.s32.totalorder %s3010_s25, 3 }
  0xce   : > { %s4108_s11 = sadd.s32 4294967294, %s2848_s24   ;;  %s403_s0 = sand.u32 1, %s4090_s4  }
  0xcf   : > { %p3291_p1 = por %p4106_p13, %p4105_p7  ;;  %p293_p4 = scmp.eq.s32.totalorder %s4108_s11, 3 }
  0xd0   : > { %s1873_s3 = sshll.u32 %s2844_s23, 11  ;;  %p4109_p11 = scmp.ne.s32.totalorder %s4091_s22, %s4094_s12 }
  0xd1   : > { %s1847_s14 = sshll.u32 %s403_s0, 7  ;;  %s4111_s15 = sld [smem:[#allocation40_spill]] }
  0xd2   : > { %p3302_p8 = por %p293_p4, %p4109_p11  ;;  %s405_s20 = scalar_lea.vmem [#allocation12], %s1847_s14 }
  0xd3   : > { %s412_s27 = sshll.u32 %s405_s20, 4  ;;  %p4113_p10 = scmp.lt.s32.totalorder %s2848_s24, 4  ;;  %s3319_s27 = int_to_ptr.vmem [resolvable:$true] %s412_s27 }
  0xd4   : > { %s4110_s26 = scalar_select %p3302_p8, 1, 0 }
  0xd5   : > { %p3315_p3 = pnand %p4113_p10, %p3231_p6 }
  0xd7   : > { %s4112_s30 = smov %s4111_s15  ;;  %s3309_s17 = scalar_lea.hbm %s4111_s15, %s1873_s3 }
  0xd8   : > { %s2658_s22 = scalar_lea.hbm %s3309_s17, 2048  ;;  %p2660_p0 = pneg %p3315_p3 }
  0xd9   : > { %p2659_p2 = scmp.ne.s32.totalorder %s3309_s17, %s2658_s22  ;;  %s2663_s7 = scalar_lea.hbm %s4112_s30, 4096 }
  0xda   : > { %p2664_p6 = scmp.lt.u32.totalorder %s3309_s17, %s4112_s30  ;;  %p2665_p5 = scmp.lt.u32.totalorder %s2663_s7, %s2658_s22 }
  0xdb   : > { %p2661_p12 = pnand %p2660_p0, %p2659_p2  ;;  %p2667_p13 = scmp.lt.u32.totalorder %s2658_s22, %s3309_s17 }
  0xdc   : > { %p2666_p7 = por %p2665_p5, %p2664_p6 }
  0xdd   : > { %p2662_p9 = pneg %p2661_p12 }
  0xde   : > { %p2668_p4 = por %p2667_p13, %p2666_p7 }
  0xe0   : > { %p2669_p11 = pnand %p2668_p4, %p2662_p9 }
  0xe2   : > { %2672 = shalt.err (!%p2669_p11)
}
  0xe3   : > { %s2673_s14 = scalar_lea.vmem %s3319_s27, 2048  ;;  %s2859_s6 = smov [#allocation12]  }
  0xe4   : > { %p2674_p10 = scmp.ne.s32.totalorder %s3319_s27, %s2673_s14  ;;  %s2678_s8 = sshll.u32 %s2859_s6, 4  ;;  %s2679_s8 = int_to_ptr.vmem [resolvable:$false] %s2678_s8 }
  0xe5   : > { %s2680_s15 = scalar_lea.vmem %s2679_s8, 4096  ;;  %p2681_p8 = scmp.lt.s32.totalorder %s3319_s27, %s2679_s8 }
  0xe6   : > { %p2676_p2 = pnand %p2674_p10, %p2660_p0  ;;  %p2682_p6 = scmp.lt.s32.totalorder %s2680_s15, %s2673_s14 }
  0xe8   : > { %p2677_p12 = pneg %p2676_p2  ;;  %p2683_p5 = por %p2682_p6, %p2681_p8 }
  0xea   : > { %p2684_p7 = pnand %p2683_p5, %p2677_p12 }
  0xec   : > { %2687 = shalt.err (!%p2684_p7)
}
  0xed   : > { %2323 = dma.hbm_to_vmem [thread:$0]  (!%p3315_p3), %s3309_s17, 2048, %s3319_s27, %s3155_s5, %s4085_s9, %s4085_s9, %s4084_s1  }
  0xee   : > { %s4115_s20 = sld [smem:[#allocation34_spill]] }
  0xf4   : > { %p4116_p0 = scmp.ne.s32.totalorder %s4115_s20, 0 }
  0xf5   : > { %s426_s22 = sand.u32 (!%p4116_p0), 1, %s2824_s18   ;;  %p4117_p8 = scmp.ne.s32.totalorder (!%p4116_p0), %s4093_s13, 0 }
  0xf6   : > { %424 = sbr.rel (%p4116_p0) target bundleno = 1447 (0x5a7), region = 56  ;;  %s1851_s12 = sshll.u32 (!%p4116_p0), %s426_s22, 7 }
  0xf7   : > { %s427_s11 = scalar_lea.sflag (!%p4116_p0), [#allocation8], %s426_s22  ;;  %s3353_s7 = scalar_lea.vmem (!%p4116_p0), [#allocation7], %s1851_s12 }
  0xfd   : > { %2775 = dma.done.wait (%p4117_p8), %s427_s11, 2048  }
  0xfe   : > { %2777 = vsyncadd (%p4117_p8), %s427_s11, 4294965248  ;;  %s4118_s4 = sld [smem:[#allocation30_spill]]  ;;  %s435_s3 = sand.u32 1, %s3010_s25  }
  0xff   : > { %s4119_s0 = sld [smem:[#allocation37_spill]]  ;;  %s436_s9 = scalar_lea.sflag [#allocation11], %s435_s3 }
 0x104   : > { %s437_s27 = sand.u32 1, %s4118_s4  }
 0x105   : > { %s1852_s1 = sshll.u32 %s437_s27, 7  ;;  %p4120_p3 = scmp.ne.s32.totalorder %s4119_s0, 0 }
 0x106   : > { %s3361_s5 = scalar_lea.vmem [#allocation10], %s1852_s1 }
 0x107   : > { %2779 = dma.done.wait (%p4120_p3), %s436_s9, 2048  }
 0x108   : > { %2781 = vsyncadd (%p4120_p3), %s436_s9, 4294965248  ;;  %s4121_s17 = sld [smem:[#allocation28_spill]]  ;;  %p4122_p9 = scmp.ne.s32.totalorder %s4103_s10, 0 }
 0x10e   : > { %s446_s14 = sand.u32 1, %s4121_s17  }
 0x10f   : > { %s1853_s13 = sshll.u32 %s446_s14, 7 }
 0x110   : > { %s3370_s6 = scalar_lea.vmem [#allocation12], %s1853_s13 }
 0x111   : > { %2783 = dma.done.wait (%p4122_p9), %s436_s9, 2048  }
 0x112   : > { %2785 = vsyncadd (%p4122_p9), %s436_s9, 4294965248  ;;  %p4123_p13 = scmp.eq.s32.totalorder %s3010_s25, 0 }
 0x114   : > { %2787 = dma.done.wait (%p4123_p13), [#allocation14], 4096   ;;  %p4124_p4 = pmov %p4123_p13 }
 0x115   : > { %s4125_s8 = sld [smem:[#allocation32_spill]]  ;;  %s3383_s20 = scalar_lea.vmem [#allocation16], %s1853_s13 }
 0x116   : > { %2789 = vsyncadd (%p4124_p4), [#allocation14], 4294963200  ;;  %s4126_s22 = sld [smem:[#allocation31_spill]] }
 0x11b   : > { %s3381_s15 = sld [smem:[#allocation6 + %s4125_s8]] }
 0x11c   : > { %p1857_p11 = scmp.ne.s32.totalorder %s4126_s22, 0 }
 0x11d   : > { %v548_v0 = vld [vmem:[#allocation13] sm:$0xff] (!%p1857_p11)  ;;  %v549_v1 = vld [vmem:[#allocation13 + $0x8] sm:$0xff] (!%p1857_p11)  ;;  %v550_v2 = vld [vmem:[#allocation13 + $0x10] sm:$0xff] (!%p1857_p11)  ;;  %v2860_v3 = vmov (!%p1857_p11), 0.0   ;;  %s4127_s12 = sld [smem:[#allocation42_spill]] (!%p1857_p11) }
 0x11e   : > { %515 = sbr.rel (%p1857_p11) target bundleno = 550 (0x226), region = 80  ;;  %516 = vst [vmem:[#allocation2] sm:$0xff] (!%p1857_p11), %v2860_v3  ;;  %517 = vst [vmem:[#allocation2 + $0x8] sm:$0xff] (!%p1857_p11), %v2860_v3  ;;  %v2139_v4 = vpack.c.bf16 (!%p1857_p11), %v549_v1, %v548_v0  ;;  %v551_v5 = vld [vmem:[#allocation13 + $0x18] sm:$0xff] (!%p1857_p11)  ;;  %v552_v7 = vld [vmem:[#allocation13 + $0x20] sm:$0xff] (!%p1857_p11) }
 0x11f   : > { %518 = vst [vmem:[#allocation2 + $0x10] sm:$0xff] (!%p1857_p11), %v2860_v3  ;;  %519 = vst [vmem:[#allocation2 + $0x18] sm:$0xff] (!%p1857_p11), %v2860_v3  ;;  %v2143_v6 = vpack.c.bf16 (!%p1857_p11), %v551_v5, %v550_v2  ;;  %v553_v8 = vld [vmem:[#allocation13 + $0x28] sm:$0xff] (!%p1857_p11)  ;;  %v532_v10 = vld [vmem:[%s3370_s6] sm:$0xff] (!%p1857_p11) }
 0x120   : > { %520 = vst [vmem:[#allocation2 + $0x20] sm:$0xff] (!%p1857_p11), %v2860_v3  ;;  %521 = vst [vmem:[#allocation2 + $0x28] sm:$0xff] (!%p1857_p11), %v2860_v3  ;;  %2140 = vmatprep.subr.bf16.mxu0 (!%p1857_p11), %v2139_v4  ;;  %2235 = vmatprep.subr.bf16.mxu1 (!%p1857_p11), %v2139_v4  ;;  %v2147_v9 = vpack.c.bf16 (!%p1857_p11), %v553_v8, %v552_v7  ;;  %v540_v11 = vld [vmem:[%s3370_s6 + $0x40] sm:$0xff] (!%p1857_p11)  ;;  %v554_v12 = vld [vmem:[#allocation13 + $0x30] sm:$0xff] (!%p1857_p11) }
 0x121   : > { %522 = vst [vmem:[#allocation2 + $0x30] sm:$0xff] (!%p1857_p11), %v2860_v3  ;;  %523 = vst [vmem:[#allocation2 + $0x38] sm:$0xff] (!%p1857_p11), %v2860_v3  ;;  %2142 = vmatpush3.bf16.msra.mxu0 (!%p1857_p11), %v2139_v4  ;;  %2243 = vmatpush3.bf16.msra.mxu1 (!%p1857_p11), %v2139_v4  ;;  %v555_v13 = vld [vmem:[#allocation13 + $0x38] sm:$0xff] (!%p1857_p11)  ;;  %v556_v15 = vld [vmem:[#allocation13 + $0x40] sm:$0xff] (!%p1857_p11) }
 0x122   : > { %524 = vst [vmem:[#allocation2 + $0x40] sm:$0xff] (!%p1857_p11), %v2860_v3  ;;  %525 = vst [vmem:[#allocation2 + $0x48] sm:$0xff] (!%p1857_p11), %v2860_v3  ;;  %2144 = vmatprep.subr.bf16.mxu0 (!%p1857_p11), %v2143_v6  ;;  %2236 = vmatprep.subr.bf16.mxu1 (!%p1857_p11), %v2143_v6  ;;  %v2151_v14 = vpack.c.bf16 (!%p1857_p11), %v555_v13, %v554_v12  ;;  %v557_v16 = vld [vmem:[#allocation13 + $0x48] sm:$0xff] (!%p1857_p11)  ;;  %v558_v18 = vld [vmem:[#allocation13 + $0x50] sm:$0xff] (!%p1857_p11) }
 0x123   : > { %526 = vst [vmem:[#allocation2 + $0x50] sm:$0xff] (!%p1857_p11), %v2860_v3  ;;  %527 = vst [vmem:[#allocation2 + $0x58] sm:$0xff] (!%p1857_p11), %v2860_v3  ;;  %2003 = vmatprep.mubr.f32.mxu0 (!%p1857_p11), %v532_v10  ;;  %2015 = vmatprep.mubr.f32.mxu1 (!%p1857_p11), %v540_v11  ;;  %v2155_v17 = vpack.c.bf16 (!%p1857_p11), %v557_v16, %v556_v15  ;;  %v559_v19 = vld [vmem:[#allocation13 + $0x58] sm:$0xff] (!%p1857_p11)  ;;  %v560_v21 = vld [vmem:[#allocation13 + $0x60] sm:$0xff] (!%p1857_p11) }
 0x124   : > { %528 = vst [vmem:[#allocation2 + $0x60] sm:$0xff] (!%p1857_p11), %v2860_v3  ;;  %529 = vst [vmem:[#allocation2 + $0x68] sm:$0xff] (!%p1857_p11), %v2860_v3  ;;  %v2159_v20 = vpack.c.bf16 (!%p1857_p11), %v559_v19, %v558_v18  ;;  %v561_v22 = vld [vmem:[#allocation13 + $0x68] sm:$0xff] (!%p1857_p11)  ;;  %v562_v24 = vld [vmem:[#allocation13 + $0x70] sm:$0xff] (!%p1857_p11) }
 0x125   : > { %530 = vst [vmem:[#allocation2 + $0x70] sm:$0xff] %v2860_v3  ;;  %531 = vst [vmem:[#allocation2 + $0x78] sm:$0xff] %v2860_v3  ;;  %2146 = vmatpush3.bf16.msra.mxu0 %v2143_v6  ;;  %2244 = vmatpush3.bf16.msra.mxu1 %v2143_v6  ;;  %v2163_v23 = vpack.c.bf16 %v561_v22, %v560_v21  ;;  %v563_v25 = vld [vmem:[#allocation13 + $0x78] sm:$0xff]  ;;  %v533_v27 = vld [vmem:[%s3370_s6 + $0x8] sm:$0xff] }
 0x126   : > { %2148 = vmatprep.subr.bf16.mxu0 %v2147_v9  ;;  %2237 = vmatprep.subr.bf16.mxu1 %v2147_v9  ;;  %v2167_v26 = vpack.c.bf16 %v563_v25, %v562_v24  ;;  %v541_v28 = vld [vmem:[%s3370_s6 + $0x48] sm:$0xff]  ;;  %v534_v29 = vld [vmem:[%s3370_s6 + $0x10] sm:$0xff]  ;;  %v535_v31 = vld [vmem:[%s3370_s6 + $0x18] sm:$0xff] }
 0x127   : > { %v542_v30 = vld [vmem:[%s3370_s6 + $0x50] sm:$0xff]  ;;  %v543_v32 = vld [vmem:[%s3370_s6 + $0x58] sm:$0xff]  ;;  %v536_v33 = vld [vmem:[%s3370_s6 + $0x20] sm:$0xff] }
 0x128   : > { %v544_v34 = vld [vmem:[%s3370_s6 + $0x60] sm:$0xff]  ;;  %v537_v35 = vld [vmem:[%s3370_s6 + $0x28] sm:$0xff]  ;;  %v538_v37 = vld [vmem:[%s3370_s6 + $0x30] sm:$0xff] }
 0x129   : > { %2150 = vmatpush3.bf16.msra.mxu0 %v2147_v9  ;;  %2245 = vmatpush3.bf16.msra.mxu1 %v2147_v9  ;;  %v545_v36 = vld [vmem:[%s3370_s6 + $0x68] sm:$0xff]  ;;  %v546_v38 = vld [vmem:[%s3370_s6 + $0x70] sm:$0xff]  ;;  %v539_v39 = vld [vmem:[%s3370_s6 + $0x38] sm:$0xff] }
 0x12a   : > { %2152 = vmatprep.subr.bf16.mxu0 %v2151_v14  ;;  %2238 = vmatprep.subr.bf16.mxu1 %v2151_v14  ;;  %v547_v40 = vld [vmem:[%s3370_s6 + $0x78] sm:$0xff]  ;;  %v1858_v41 = vld [vmem:[%s4127_s12] ss:$0 sm:$0xff] }
 0x12d   : > { %2154 = vmatpush3.bf16.msra.mxu0 %v2151_v14  ;;  %2246 = vmatpush3.bf16.msra.mxu1 %v2151_v14 }
 0x12e   : > { %2156 = vmatprep.subr.bf16.mxu0 %v2155_v17  ;;  %2239 = vmatprep.subr.bf16.mxu1 %v2155_v17 }
 0x131   : > { %2158 = vmatpush3.bf16.msra.mxu0 %v2155_v17  ;;  %2247 = vmatpush3.bf16.msra.mxu1 %v2155_v17 }
 0x132   : > { %2160 = vmatprep.subr.bf16.mxu0 %v2159_v20  ;;  %2240 = vmatprep.subr.bf16.mxu1 %v2159_v20 }
 0x135   : > { %2162 = vmatpush3.bf16.msra.mxu0 %v2159_v20  ;;  %2248 = vmatpush3.bf16.msra.mxu1 %v2159_v20 }
 0x136   : > { %2164 = vmatprep.subr.bf16.mxu0 %v2163_v23  ;;  %2241 = vmatprep.subr.bf16.mxu1 %v2163_v23 }
 0x139   : > { %2166 = vmatpush3.bf16.msra.mxu0 %v2163_v23  ;;  %2249 = vmatpush3.bf16.msra.mxu1 %v2163_v23 }
 0x13a   : > { %2168 = vmatprep.subr.bf16.mxu0 %v2167_v26  ;;  %2242 = vmatprep.subr.bf16.mxu1 %v2167_v26 }
 0x13d   : > { %2170 = vmatpush3.bf16.msra.mxu0 %v2167_v26  ;;  %2250 = vmatpush3.bf16.msra.mxu1 %v2167_v26 }
 0x140   : > { %2004 = vmatmul.mubr.f32.vlgmr.msra.gmra.mrb[0].mxu0 %v533_v27  ;;  %2016 = vmatmul.mubr.f32.vlgmr.msra.gmra.mrb[0].mxu1 %v541_v28 }
 0x141   : > { %2006 = vmatprep.mubr.f32.mxu0 %v534_v29  ;;  %2018 = vmatprep.mubr.f32.mxu1 %v542_v30 }
 0x144   : > { %2007 = vmatmul.mubr.f32.gmra.mrb[2].mxu0 %v535_v31  ;;  %2019 = vmatmul.mubr.f32.gmra.mrb[2].mxu1 %v543_v32 }
 0x145   : > { %2009 = vmatprep.mubr.f32.mxu0 %v536_v33  ;;  %2021 = vmatprep.mubr.f32.mxu1 %v544_v34 }
 0x148   : > { %2010 = vmatmul.mubr.f32.gmra.mrb[4].mxu0 %v537_v35  ;;  %2022 = vmatmul.mubr.f32.gmra.mrb[4].mxu1 %v545_v36 }
 0x149   : > { %2012 = vmatprep.mubr.f32.mxu0 %v538_v37  ;;  %2024 = vmatprep.mubr.f32.mxu1 %v546_v38 }
 0x14c   : > { %2013 = vmatmul.mubr.f32.gmra.mrb[6].mxu0 %v539_v39  ;;  %2025 = vmatmul.mubr.f32.gmra.mrb[6].mxu1 %v547_v40 }
 0x213   : > { %v2005_v42 = vpop.f32.mrb[0].mxu0  ;;  %v2017_v43 = vpop.f32.mrb[0].mxu1 }
 0x214   : > { %v643_v44 = vadd.f32 %v2005_v42, %v1858_v41  ;;  %v683_v45 = vadd.f32 %v2017_v43, %v1858_v41  ;;  %v637_v46 = vpop.f32.mrb[1].mxu0  ;;  %v677_v47 = vpop.f32.mrb[1].mxu1 }
 0x215   : > { %v638_v48 = vadd.f32 %v1858_v41, %v637_v46  ;;  %v678_v49 = vadd.f32 %v1858_v41, %v677_v47 }
 0x216   : > { %v717_v50 = vmax.f32 %v643_v44, 0.0  ;;  %v725_v51 = vmax.f32 %v683_v45, 0.0 }
 0x217   : > { %v716_v52 = vmax.f32 %v638_v48, 0.0  ;;  %v724_v53 = vmax.f32 %v678_v49, 0.0  ;;  %v2008_v54 = vpop.f32.mrb[2].mxu0  ;;  %v2020_v55 = vpop.f32.mrb[2].mxu1 }
 0x218   : > { %733 = vst [vmem:[#allocation3 + $0x8] sm:$0xff] %v717_v50  ;;  %741 = vst [vmem:[#allocation3 + $0x48] sm:$0xff] %v725_v51  ;;  %v653_v56 = vadd.f32 %v2008_v54, %v1858_v41  ;;  %v693_v57 = vadd.f32 %v2020_v55, %v1858_v41  ;;  %v647_v58 = vpop.f32.mrb[3].mxu0  ;;  %v687_v59 = vpop.f32.mrb[3].mxu1 }
 0x219   : > { %732 = vst [vmem:[#allocation3] sm:$0xff] %v716_v52  ;;  %740 = vst [vmem:[#allocation3 + $0x40] sm:$0xff] %v724_v53  ;;  %v648_v60 = vadd.f32 %v1858_v41, %v647_v58  ;;  %v688_v61 = vadd.f32 %v1858_v41, %v687_v59 }
 0x21a   : > { %v719_v62 = vmax.f32 %v653_v56, 0.0  ;;  %v727_v63 = vmax.f32 %v693_v57, 0.0 }
 0x21b   : > { %v718_v0 = vmax.f32 %v648_v60, 0.0  ;;  %v726_v1 = vmax.f32 %v688_v61, 0.0  ;;  %v2011_v2 = vpop.f32.mrb[4].mxu0  ;;  %v2023_v3 = vpop.f32.mrb[4].mxu1 }
 0x21c   : > { %735 = vst [vmem:[#allocation3 + $0x18] sm:$0xff] %v719_v62  ;;  %743 = vst [vmem:[#allocation3 + $0x58] sm:$0xff] %v727_v63  ;;  %v663_v4 = vadd.f32 %v2011_v2, %v1858_v41  ;;  %v703_v5 = vadd.f32 %v2023_v3, %v1858_v41  ;;  %v657_v6 = vpop.f32.mrb[5].mxu0  ;;  %v697_v7 = vpop.f32.mrb[5].mxu1 }
 0x21d   : > { %734 = vst [vmem:[#allocation3 + $0x10] sm:$0xff] %v718_v0  ;;  %742 = vst [vmem:[#allocation3 + $0x50] sm:$0xff] %v726_v1  ;;  %v658_v8 = vadd.f32 %v1858_v41, %v657_v6  ;;  %v698_v9 = vadd.f32 %v1858_v41, %v697_v7 }
 0x21e   : > { %v721_v10 = vmax.f32 %v663_v4, 0.0  ;;  %v729_v11 = vmax.f32 %v703_v5, 0.0 }
 0x21f   : > { %v720_v12 = vmax.f32 %v658_v8, 0.0  ;;  %v728_v13 = vmax.f32 %v698_v9, 0.0  ;;  %v2014_v14 = vpop.f32.mrb[6].mxu0  ;;  %v2026_v15 = vpop.f32.mrb[6].mxu1 }
 0x220   : > { %737 = vst [vmem:[#allocation3 + $0x28] sm:$0xff] %v721_v10  ;;  %745 = vst [vmem:[#allocation3 + $0x68] sm:$0xff] %v729_v11  ;;  %v673_v16 = vadd.f32 %v2014_v14, %v1858_v41  ;;  %v713_v17 = vadd.f32 %v2026_v15, %v1858_v41  ;;  %v667_v18 = vpop.f32.mrb[7].mxu0  ;;  %v707_v19 = vpop.f32.mrb[7].mxu1 }
 0x221   : > { %736 = vst [vmem:[#allocation3 + $0x20] sm:$0xff] %v720_v12  ;;  %744 = vst [vmem:[#allocation3 + $0x60] sm:$0xff] %v728_v13  ;;  %v668_v20 = vadd.f32 %v1858_v41, %v667_v18  ;;  %v708_v21 = vadd.f32 %v1858_v41, %v707_v19 }
 0x222   : > { %v723_v22 = vmax.f32 %v673_v16, 0.0  ;;  %v731_v23 = vmax.f32 %v713_v17, 0.0 }
 0x223   : > { %v722_v24 = vmax.f32 %v668_v20, 0.0  ;;  %v730_v25 = vmax.f32 %v708_v21, 0.0 }
 0x224   : > { %739 = vst [vmem:[#allocation3 + $0x38] sm:$0xff] %v723_v22  ;;  %747 = vst [vmem:[#allocation3 + $0x78] sm:$0xff] %v731_v23 }
 0x225   : > { %738 = vst [vmem:[#allocation3 + $0x30] sm:$0xff] %v722_v24  ;;  %746 = vst [vmem:[#allocation3 + $0x70] sm:$0xff] %v730_v25 }
 0x226 PF: > { %s4128_s11 = sld [smem:[#allocation31_spill]] }
 0x22c   : > { %p1859_p10 = scmp.ge.s32.totalorder %s4128_s11, %s3381_s15 }
 0x22d   : > { %v784_v26 = vld [vmem:[%s3361_s5] sm:$0xff] (!%p1859_p10)  ;;  %v785_v27 = vld [vmem:[%s3361_s5 + $0x8] sm:$0xff] (!%p1859_p10)  ;;  %v786_v28 = vld [vmem:[%s3361_s5 + $0x10] sm:$0xff] (!%p1859_p10) }
 0x22e   : > { %751 = sbr.rel (%p1859_p10) target bundleno = 820 (0x334), region = 84  ;;  %v2171_v29 = vpack.c.bf16 (!%p1859_p10), %v785_v27, %v784_v26  ;;  %v787_v30 = vld [vmem:[%s3361_s5 + $0x18] sm:$0xff] (!%p1859_p10)  ;;  %v788_v32 = vld [vmem:[%s3361_s5 + $0x20] sm:$0xff] (!%p1859_p10)  ;;  %v789_v33 = vld [vmem:[%s3361_s5 + $0x28] sm:$0xff] (!%p1859_p10) }
 0x22f   : > { %v2175_v31 = vpack.c.bf16 (!%p1859_p10), %v787_v30, %v786_v28  ;;  %v2179_v34 = vpack.c.bf16 (!%p1859_p10), %v789_v33, %v788_v32  ;;  %v768_v35 = vld [vmem:[%s3353_s7] sm:$0xff] (!%p1859_p10)  ;;  %v790_v37 = vld [vmem:[%s3361_s5 + $0x30] sm:$0xff] (!%p1859_p10)  ;;  %v791_v38 = vld [vmem:[%s3361_s5 + $0x38] sm:$0xff] (!%p1859_p10) }
 0x230   : > { %2172 = vmatprep.subr.bf16.mxu0 (!%p1859_p10), %v2171_v29  ;;  %2251 = vmatprep.subr.bf16.mxu1 (!%p1859_p10), %v2171_v29  ;;  %v776_v36 = vld [vmem:[%s3353_s7 + $0x40] sm:$0xff] (!%p1859_p10)  ;;  %v2183_v39 = vpack.c.bf16 (!%p1859_p10), %v791_v38, %v790_v37  ;;  %v793_v41 = vld [vmem:[%s3361_s5 + $0x48] sm:$0xff] (!%p1859_p10)  ;;  %v794_v43 = vld [vmem:[%s3361_s5 + $0x50] sm:$0xff] (!%p1859_p10) }
 0x231   : > { %2174 = vmatpush3.bf16.msra.mxu0 (!%p1859_p10), %v2171_v29  ;;  %2259 = vmatpush3.bf16.msra.mxu1 (!%p1859_p10), %v2171_v29  ;;  %v792_v40 = vld [vmem:[%s3361_s5 + $0x40] sm:$0xff] (!%p1859_p10)  ;;  %v795_v44 = vld [vmem:[%s3361_s5 + $0x58] sm:$0xff] (!%p1859_p10)  ;;  %v797_v47 = vld [vmem:[%s3361_s5 + $0x68] sm:$0xff] (!%p1859_p10) }
 0x232   : > { %2176 = vmatprep.subr.bf16.mxu0 (!%p1859_p10), %v2175_v31  ;;  %2252 = vmatprep.subr.bf16.mxu1 (!%p1859_p10), %v2175_v31  ;;  %v2187_v42 = vpack.c.bf16 (!%p1859_p10), %v793_v41, %v792_v40  ;;  %v2191_v45 = vpack.c.bf16 (!%p1859_p10), %v795_v44, %v794_v43  ;;  %v796_v46 = vld [vmem:[%s3361_s5 + $0x60] sm:$0xff] (!%p1859_p10)  ;;  %v798_v49 = vld [vmem:[%s3361_s5 + $0x70] sm:$0xff] (!%p1859_p10)  ;;  %v799_v50 = vld [vmem:[%s3361_s5 + $0x78] sm:$0xff] (!%p1859_p10) }
 0x233   : > { %2059 = vmatprep.mubr.f32.mxu0 (!%p1859_p10), %v768_v35  ;;  %2071 = vmatprep.mubr.f32.mxu1 (!%p1859_p10), %v776_v36  ;;  %v2195_v48 = vpack.c.bf16 (!%p1859_p10), %v797_v47, %v796_v46  ;;  %v2199_v51 = vpack.c.bf16 (!%p1859_p10), %v799_v50, %v798_v49  ;;  %v769_v52 = vld [vmem:[%s3353_s7 + $0x8] sm:$0xff] (!%p1859_p10)  ;;  %v770_v54 = vld [vmem:[%s3353_s7 + $0x10] sm:$0xff] (!%p1859_p10)  ;;  %v771_v56 = vld [vmem:[%s3353_s7 + $0x18] sm:$0xff] (!%p1859_p10) }
 0x234   : > { %v777_v53 = vld [vmem:[%s3353_s7 + $0x48] sm:$0xff] (!%p1859_p10)  ;;  %v778_v55 = vld [vmem:[%s3353_s7 + $0x50] sm:$0xff] (!%p1859_p10)  ;;  %v779_v57 = vld [vmem:[%s3353_s7 + $0x58] sm:$0xff] (!%p1859_p10) }
 0x235   : > { %2178 = vmatpush3.bf16.msra.mxu0 %v2175_v31  ;;  %2260 = vmatpush3.bf16.msra.mxu1 %v2175_v31  ;;  %v772_v58 = vld [vmem:[%s3353_s7 + $0x20] sm:$0xff]  ;;  %v773_v60 = vld [vmem:[%s3353_s7 + $0x28] sm:$0xff]  ;;  %v774_v62 = vld [vmem:[%s3353_s7 + $0x30] sm:$0xff] }
 0x236   : > { %2180 = vmatprep.subr.bf16.mxu0 %v2179_v34  ;;  %2253 = vmatprep.subr.bf16.mxu1 %v2179_v34  ;;  %v780_v59 = vld [vmem:[%s3353_s7 + $0x60] sm:$0xff]  ;;  %v781_v61 = vld [vmem:[%s3353_s7 + $0x68] sm:$0xff]  ;;  %v782_v63 = vld [vmem:[%s3353_s7 + $0x70] sm:$0xff] }
 0x237   : > { %v775_v0 = vld [vmem:[%s3353_s7 + $0x38] sm:$0xff]  ;;  %v753_v2 = vld [vmem:[#allocation2 + $0x8] sm:$0xff]  ;;  %v752_v4 = vld [vmem:[#allocation2] sm:$0xff] }
 0x238   : > { %v783_v1 = vld [vmem:[%s3353_s7 + $0x78] sm:$0xff]  ;;  %v761_v3 = vld [vmem:[#allocation2 + $0x48] sm:$0xff]  ;;  %v760_v5 = vld [vmem:[#allocation2 + $0x40] sm:$0xff] }
 0x239   : > { %2182 = vmatpush3.bf16.msra.mxu0 %v2179_v34  ;;  %2261 = vmatpush3.bf16.msra.mxu1 %v2179_v34  ;;  %v755_v14 = vld [vmem:[#allocation2 + $0x18] sm:$0xff]  ;;  %v754_v16 = vld [vmem:[#allocation2 + $0x10] sm:$0xff]  ;;  %v757_v26 = vld [vmem:[#allocation2 + $0x28] sm:$0xff] }
 0x23a   : > { %2184 = vmatprep.subr.bf16.mxu0 %v2183_v39  ;;  %2254 = vmatprep.subr.bf16.mxu1 %v2183_v39  ;;  %v763_v15 = vld [vmem:[#allocation2 + $0x58] sm:$0xff]  ;;  %v762_v17 = vld [vmem:[#allocation2 + $0x50] sm:$0xff]  ;;  %v765_v27 = vld [vmem:[#allocation2 + $0x68] sm:$0xff] }
 0x23b   : > { %v756_v28 = vld [vmem:[#allocation2 + $0x20] sm:$0xff]  ;;  %v759_v38 = vld [vmem:[#allocation2 + $0x38] sm:$0xff]  ;;  %v758_v40 = vld [vmem:[#allocation2 + $0x30] sm:$0xff] }
 0x23c   : > { %v764_v29 = vld [vmem:[#allocation2 + $0x60] sm:$0xff]  ;;  %v766_v41 = vld [vmem:[#allocation2 + $0x70] sm:$0xff] }
 0x23d   : > { %2186 = vmatpush3.bf16.msra.mxu0 %v2183_v39  ;;  %2262 = vmatpush3.bf16.msra.mxu1 %v2183_v39  ;;  %v767_v39 = vld [vmem:[#allocation2 + $0x78] sm:$0xff] }
 0x23e   : > { %2188 = vmatprep.subr.bf16.mxu0 %v2187_v42  ;;  %2255 = vmatprep.subr.bf16.mxu1 %v2187_v42 }
 0x241   : > { %2190 = vmatpush3.bf16.msra.mxu0 %v2187_v42  ;;  %2263 = vmatpush3.bf16.msra.mxu1 %v2187_v42 }
 0x242   : > { %2192 = vmatprep.subr.bf16.mxu0 %v2191_v45  ;;  %2256 = vmatprep.subr.bf16.mxu1 %v2191_v45 }
 0x245   : > { %2194 = vmatpush3.bf16.msra.mxu0 %v2191_v45  ;;  %2264 = vmatpush3.bf16.msra.mxu1 %v2191_v45 }
 0x246   : > { %2196 = vmatprep.subr.bf16.mxu0 %v2195_v48  ;;  %2257 = vmatprep.subr.bf16.mxu1 %v2195_v48 }
 0x249   : > { %2198 = vmatpush3.bf16.msra.mxu0 %v2195_v48  ;;  %2265 = vmatpush3.bf16.msra.mxu1 %v2195_v48 }
 0x24a   : > { %2200 = vmatprep.subr.bf16.mxu0 %v2199_v51  ;;  %2258 = vmatprep.subr.bf16.mxu1 %v2199_v51 }
 0x24d   : > { %2202 = vmatpush3.bf16.msra.mxu0 %v2199_v51  ;;  %2266 = vmatpush3.bf16.msra.mxu1 %v2199_v51 }
 0x250   : > { %2060 = vmatmul.mubr.f32.vlgmr.msra.gmra.mrb[0].mxu0 %v769_v52  ;;  %2072 = vmatmul.mubr.f32.vlgmr.msra.gmra.mrb[0].mxu1 %v777_v53 }
 0x251   : > { %2062 = vmatprep.mubr.f32.mxu0 %v770_v54  ;;  %2074 = vmatprep.mubr.f32.mxu1 %v778_v55 }
 0x254   : > { %2063 = vmatmul.mubr.f32.gmra.mrb[2].mxu0 %v771_v56  ;;  %2075 = vmatmul.mubr.f32.gmra.mrb[2].mxu1 %v779_v57 }
 0x255   : > { %2065 = vmatprep.mubr.f32.mxu0 %v772_v58  ;;  %2077 = vmatprep.mubr.f32.mxu1 %v780_v59 }
 0x258   : > { %2066 = vmatmul.mubr.f32.gmra.mrb[4].mxu0 %v773_v60  ;;  %2078 = vmatmul.mubr.f32.gmra.mrb[4].mxu1 %v781_v61 }
 0x259   : > { %2068 = vmatprep.mubr.f32.mxu0 %v774_v62  ;;  %2080 = vmatprep.mubr.f32.mxu1 %v782_v63 }
 0x25c   : > { %2069 = vmatmul.mubr.f32.gmra.mrb[6].mxu0 %v775_v0  ;;  %2081 = vmatmul.mubr.f32.gmra.mrb[6].mxu1 %v783_v1 }
 0x323   : > { %v2061_v6 = vpop.f32.mrb[0].mxu0  ;;  %v2073_v7 = vpop.f32.mrb[0].mxu1 }
 0x324   : > { %v946_v8 = vadd.f32 %v2061_v6, %v753_v2  ;;  %v954_v9 = vadd.f32 %v2073_v7, %v761_v3  ;;  %v866_v10 = vpop.f32.mrb[1].mxu0  ;;  %v906_v11 = vpop.f32.mrb[1].mxu1 }
 0x325   : > { %v945_v12 = vadd.f32 %v866_v10, %v752_v4  ;;  %v953_v13 = vadd.f32 %v906_v11, %v760_v5 }
 0x326   : > { %962 = vst [vmem:[#allocation2 + $0x8] sm:$0xff] %v946_v8  ;;  %970 = vst [vmem:[#allocation2 + $0x48] sm:$0xff] %v954_v9 }
 0x327   : > { %961 = vst [vmem:[#allocation2] sm:$0xff] %v945_v12  ;;  %969 = vst [vmem:[#allocation2 + $0x40] sm:$0xff] %v953_v13  ;;  %v2064_v18 = vpop.f32.mrb[2].mxu0  ;;  %v2076_v19 = vpop.f32.mrb[2].mxu1 }
 0x328   : > { %v948_v20 = vadd.f32 %v2064_v18, %v755_v14  ;;  %v956_v21 = vadd.f32 %v2076_v19, %v763_v15  ;;  %v876_v22 = vpop.f32.mrb[3].mxu0  ;;  %v916_v23 = vpop.f32.mrb[3].mxu1 }
 0x329   : > { %v947_v24 = vadd.f32 %v876_v22, %v754_v16  ;;  %v955_v25 = vadd.f32 %v916_v23, %v762_v17 }
 0x32a   : > { %964 = vst [vmem:[#allocation2 + $0x18] sm:$0xff] %v948_v20  ;;  %972 = vst [vmem:[#allocation2 + $0x58] sm:$0xff] %v956_v21 }
 0x32b   : > { %963 = vst [vmem:[#allocation2 + $0x10] sm:$0xff] %v947_v24  ;;  %971 = vst [vmem:[#allocation2 + $0x50] sm:$0xff] %v955_v25  ;;  %v2067_v30 = vpop.f32.mrb[4].mxu0  ;;  %v2079_v31 = vpop.f32.mrb[4].mxu1 }
 0x32c   : > { %v950_v32 = vadd.f32 %v2067_v30, %v757_v26  ;;  %v958_v33 = vadd.f32 %v2079_v31, %v765_v27  ;;  %v886_v34 = vpop.f32.mrb[5].mxu0  ;;  %v926_v35 = vpop.f32.mrb[5].mxu1 }
 0x32d   : > { %v949_v36 = vadd.f32 %v886_v34, %v756_v28  ;;  %v957_v37 = vadd.f32 %v926_v35, %v764_v29 }
 0x32e   : > { %966 = vst [vmem:[#allocation2 + $0x28] sm:$0xff] %v950_v32  ;;  %974 = vst [vmem:[#allocation2 + $0x68] sm:$0xff] %v958_v33 }
 0x32f   : > { %965 = vst [vmem:[#allocation2 + $0x20] sm:$0xff] %v949_v36  ;;  %973 = vst [vmem:[#allocation2 + $0x60] sm:$0xff] %v957_v37  ;;  %v2070_v42 = vpop.f32.mrb[6].mxu0  ;;  %v2082_v43 = vpop.f32.mrb[6].mxu1 }
 0x330   : > { %v952_v44 = vadd.f32 %v2070_v42, %v759_v38  ;;  %v960_v45 = vadd.f32 %v2082_v43, %v767_v39  ;;  %v896_v46 = vpop.f32.mrb[7].mxu0  ;;  %v936_v47 = vpop.f32.mrb[7].mxu1 }
 0x331   : > { %v951_v48 = vadd.f32 %v896_v46, %v758_v40  ;;  %v959_v49 = vadd.f32 %v936_v47, %v766_v41 }
 0x332   : > { %968 = vst [vmem:[#allocation2 + $0x38] sm:$0xff] %v952_v44  ;;  %976 = vst [vmem:[#allocation2 + $0x78] sm:$0xff] %v960_v45 }
 0x333   : > { %967 = vst [vmem:[#allocation2 + $0x30] sm:$0xff] %v951_v48  ;;  %975 = vst [vmem:[#allocation2 + $0x70] sm:$0xff] %v959_v49 }
 0x334 PF: > { %s4129_s7 = sld [smem:[#allocation31_spill]] }
 0x33a   : > { %p1860_p2 = scmp.ne.s32.totalorder %s4129_s7, 1 }
 0x33b   : > { %v997_v50 = vld [vmem:[#allocation15] sm:$0xff] (!%p1860_p2)  ;;  %v998_v51 = vld [vmem:[#allocation15 + $0x8] sm:$0xff] (!%p1860_p2)  ;;  %v999_v52 = vld [vmem:[#allocation15 + $0x10] sm:$0xff] (!%p1860_p2)  ;;  %s4130_s3 = sld [smem:[#allocation44_spill]] (!%p1860_p2)  ;;  %s4132_s9 = sld [smem:[#allocation45_spill]] (!%p1860_p2) }
 0x33c   : > { %980 = sbr.rel (%p1860_p2) target bundleno = 1421 (0x58d), region = 88  ;;  %v2203_v53 = vpack.c.bf16 (!%p1860_p2), %v998_v51, %v997_v50  ;;  %v1000_v54 = vld [vmem:[#allocation15 + $0x18] sm:$0xff] (!%p1860_p2)  ;;  %v1001_v56 = vld [vmem:[#allocation15 + $0x20] sm:$0xff] (!%p1860_p2)  ;;  %v1002_v57 = vld [vmem:[#allocation15 + $0x28] sm:$0xff] (!%p1860_p2)  ;;  %s4133_s13 = sld [smem:[#allocation46_spill]] (!%p1860_p2) }
 0x33d   : > { %v2207_v55 = vpack.c.bf16 (!%p1860_p2), %v1000_v54, %v999_v52  ;;  %v2211_v58 = vpack.c.bf16 (!%p1860_p2), %v1002_v57, %v1001_v56  ;;  %v981_v59 = vld [vmem:[#allocation2] sm:$0xff] (!%p1860_p2)  ;;  %v1003_v60 = vld [vmem:[#allocation15 + $0x30] sm:$0xff] (!%p1860_p2)  ;;  %v1004_v61 = vld [vmem:[#allocation15 + $0x38] sm:$0xff] (!%p1860_p2) }
 0x33e   : > { %2204 = vmatprep.subr.bf16.mxu0 (!%p1860_p2), %v2203_v53  ;;  %2267 = vmatprep.subr.bf16.mxu1 (!%p1860_p2), %v2203_v53  ;;  %v989_v62 = vld [vmem:[#allocation2 + $0x40] sm:$0xff] (!%p1860_p2)  ;;  %v2215_v63 = vpack.c.bf16 (!%p1860_p2), %v1004_v61, %v1003_v60  ;;  %v1006_v1 = vld [vmem:[#allocation15 + $0x48] sm:$0xff] (!%p1860_p2)  ;;  %v3443_v3 = vld [vmem:[#allocation3 + $0x10] sm:$0xff] (!%p1860_p2) }
 0x33f   : > { %2206 = vmatpush3.bf16.msra.mxu0 (!%p1860_p2), %v2203_v53  ;;  %2275 = vmatpush3.bf16.msra.mxu1 (!%p1860_p2), %v2203_v53  ;;  %v1005_v0 = vld [vmem:[#allocation15 + $0x40] sm:$0xff] (!%p1860_p2)  ;;  %v3445_v4 = vld [vmem:[#allocation3 + $0x8] sm:$0xff] (!%p1860_p2)  ;;  %v1007_v6 = vld [vmem:[#allocation15 + $0x50] sm:$0xff] (!%p1860_p2) }
 0x340   : > { %2208 = vmatprep.subr.bf16.mxu0 (!%p1860_p2), %v2207_v55  ;;  %2268 = vmatprep.subr.bf16.mxu1 (!%p1860_p2), %v2207_v55  ;;  %v3440_v2 = vld [vmem:[#allocation3] sm:$0xff] (!%p1860_p2)  ;;  %v2219_v5 = vpack.c.bf16 (!%p1860_p2), %v1006_v1, %v1005_v0  ;;  %v1008_v7 = vld [vmem:[#allocation15 + $0x58] sm:$0xff] (!%p1860_p2)  ;;  %v1010_v12 = vld [vmem:[#allocation15 + $0x68] sm:$0xff] (!%p1860_p2) }
 0x341   : > { %2115 = vmatprep.mubr.f32.mxu0 (!%p1860_p2), %v981_v59  ;;  %2127 = vmatprep.mubr.f32.mxu1 (!%p1860_p2), %v989_v62  ;;  %v3449_v8 = vld [vmem:[#allocation3 + $0x18] sm:$0xff] (!%p1860_p2)  ;;  %v3451_v9 = vld [vmem:[#allocation3 + $0x20] sm:$0xff] (!%p1860_p2)  ;;  %v2223_v10 = vpack.c.bf16 (!%p1860_p2), %v1008_v7, %v1007_v6  ;;  %v3454_v13 = vld [vmem:[#allocation3 + $0x28] sm:$0xff] (!%p1860_p2) }
 0x342   : > { %1197 = vadd.xlane.f32.xlu0 (!%p1860_p2), %v3440_v2  ;;  %1201 = vadd.xlane.f32.xlu1 (!%p1860_p2), %v3443_v3  ;;  %v1009_v11 = vld [vmem:[#allocation15 + $0x60] sm:$0xff] (!%p1860_p2)  ;;  %v3457_v14 = vld [vmem:[#allocation3 + $0x30] sm:$0xff] (!%p1860_p2)  ;;  %v1012_v17 = vld [vmem:[#allocation15 + $0x78] sm:$0xff] (!%p1860_p2)  ;;  %s4134_s6 = smov (!%p1860_p2), %s4133_s13 }
 0x343   : > { %2210 = vmatpush3.bf16.msra.mxu0 %v2207_v55  ;;  %2276 = vmatpush3.bf16.msra.mxu1 %v2207_v55  ;;  %v2227_v15 = vpack.c.bf16 %v1010_v12, %v1009_v11  ;;  %v1011_v16 = vld [vmem:[#allocation15 + $0x70] sm:$0xff]  ;;  %v3460_v18 = vld [vmem:[#allocation3 + $0x38] sm:$0xff]  ;;  %v3463_v19 = vld [vmem:[#allocation3 + $0x40] sm:$0xff] }
 0x344   : > { %2212 = vmatprep.subr.bf16.mxu0 %v2211_v58  ;;  %2269 = vmatprep.subr.bf16.mxu1 %v2211_v58  ;;  %v2231_v20 = vpack.c.bf16 %v1012_v17, %v1011_v16  ;;  %v3466_v21 = vld [vmem:[#allocation3 + $0x48] sm:$0xff]  ;;  %v3469_v22 = vld [vmem:[#allocation3 + $0x50] sm:$0xff]  ;;  %v3472_v23 = vld [vmem:[#allocation3 + $0x58] sm:$0xff] }
 0x345   : > { %v982_v24 = vld [vmem:[#allocation2 + $0x8] sm:$0xff]  ;;  %v983_v26 = vld [vmem:[#allocation2 + $0x10] sm:$0xff]  ;;  %v3476_v28 = vld [vmem:[#allocation3 + $0x60] sm:$0xff] }
 0x346   : > { %1199 = vadd.xlane.f32.xlu0 %v3445_v4  ;;  %1203 = vadd.xlane.f32.xlu1 %v3449_v8  ;;  %v990_v25 = vld [vmem:[#allocation2 + $0x48] sm:$0xff]  ;;  %v991_v27 = vld [vmem:[#allocation2 + $0x50] sm:$0xff]  ;;  %v984_v30 = vld [vmem:[#allocation2 + $0x18] sm:$0xff] }
 0x347   : > { %2214 = vmatpush3.bf16.msra.mxu0 %v2211_v58  ;;  %2277 = vmatpush3.bf16.msra.mxu1 %v2211_v58  ;;  %v3478_v29 = vld [vmem:[#allocation3 + $0x68] sm:$0xff]  ;;  %v992_v31 = vld [vmem:[#allocation2 + $0x58] sm:$0xff]  ;;  %v985_v32 = vld [vmem:[#allocation2 + $0x20] sm:$0xff] }
 0x348   : > { %2216 = vmatprep.subr.bf16.mxu0 %v2215_v63  ;;  %2270 = vmatprep.subr.bf16.mxu1 %v2215_v63  ;;  %v993_v33 = vld [vmem:[#allocation2 + $0x60] sm:$0xff]  ;;  %v3482_v34 = vld [vmem:[#allocation3 + $0x70] sm:$0xff]  ;;  %v3484_v35 = vld [vmem:[#allocation3 + $0x78] sm:$0xff] }
 0x349   : > { %v986_v36 = vld [vmem:[#allocation2 + $0x28] sm:$0xff]  ;;  %v987_v38 = vld [vmem:[#allocation2 + $0x30] sm:$0xff]  ;;  %v988_v40 = vld [vmem:[#allocation2 + $0x38] sm:$0xff] }
 0x34a   : > { %1205 = vadd.xlane.f32.xlu0 %v3451_v9  ;;  %1207 = vadd.xlane.f32.xlu1 %v3454_v13  ;;  %v994_v37 = vld [vmem:[#allocation2 + $0x68] sm:$0xff]  ;;  %v995_v39 = vld [vmem:[#allocation2 + $0x70] sm:$0xff]  ;;  %v996_v41 = vld [vmem:[#allocation2 + $0x78] sm:$0xff] }
 0x34b   : > { %2218 = vmatpush3.bf16.msra.mxu0 %v2215_v63  ;;  %2278 = vmatpush3.bf16.msra.mxu1 %v2215_v63  ;;  %v3491_v42 = vld [vmem:[%s4130_s3] ss:$0 sm:$0xff] }
 0x34c   : > { %2220 = vmatprep.subr.bf16.mxu0 %v2219_v5  ;;  %2271 = vmatprep.subr.bf16.mxu1 %v2219_v5 }
 0x34e   : > { %1209 = vadd.xlane.f32.xlu0 %v3457_v14  ;;  %1211 = vadd.xlane.f32.xlu1 %v3460_v18 }
 0x34f   : > { %2222 = vmatpush3.bf16.msra.mxu0 %v2219_v5  ;;  %2279 = vmatpush3.bf16.msra.mxu1 %v2219_v5 }
 0x350   : > { %2224 = vmatprep.subr.bf16.mxu0 %v2223_v10  ;;  %2272 = vmatprep.subr.bf16.mxu1 %v2223_v10 }
 0x352   : > { %1213 = vadd.xlane.f32.xlu0 %v3463_v19  ;;  %1215 = vadd.xlane.f32.xlu1 %v3466_v21 }
 0x353   : > { %2226 = vmatpush3.bf16.msra.mxu0 %v2223_v10  ;;  %2280 = vmatpush3.bf16.msra.mxu1 %v2223_v10 }
 0x354   : > { %2228 = vmatprep.subr.bf16.mxu0 %v2227_v15  ;;  %2273 = vmatprep.subr.bf16.mxu1 %v2227_v15 }
 0x356   : > { %1217 = vadd.xlane.f32.xlu0 %v3469_v22  ;;  %1219 = vadd.xlane.f32.xlu1 %v3472_v23 }
 0x357   : > { %2230 = vmatpush3.bf16.msra.mxu0 %v2227_v15  ;;  %2281 = vmatpush3.bf16.msra.mxu1 %v2227_v15 }
 0x358   : > { %2232 = vmatprep.subr.bf16.mxu0 %v2231_v20  ;;  %2274 = vmatprep.subr.bf16.mxu1 %v2231_v20 }
 0x35a   : > { %1221 = vadd.xlane.f32.xlu0 %v3476_v28  ;;  %1223 = vadd.xlane.f32.xlu1 %v3478_v29 }
 0x35b   : > { %2234 = vmatpush3.bf16.msra.mxu0 %v2231_v20  ;;  %2282 = vmatpush3.bf16.msra.mxu1 %v2231_v20 }
 0x35e   : > { %2116 = vmatmul.mubr.f32.vlgmr.msra.gmra.mrb[0].mxu0 %v982_v24  ;;  %2128 = vmatmul.mubr.f32.vlgmr.msra.gmra.mrb[0].mxu1 %v990_v25 }
 0x35f   : > { %2118 = vmatprep.mubr.f32.mxu0 %v983_v26  ;;  %2130 = vmatprep.mubr.f32.mxu1 %v991_v27 }
 0x360   : > { %1225 = vadd.xlane.f32.xlu0 %v3482_v34  ;;  %1227 = vadd.xlane.f32.xlu1 %v3484_v35 }
 0x362   : > { %2119 = vmatmul.mubr.f32.gmra.mrb[2].mxu0 %v984_v30  ;;  %2131 = vmatmul.mubr.f32.gmra.mrb[2].mxu1 %v992_v31 }
 0x363   : > { %2121 = vmatprep.mubr.f32.mxu0 %v985_v32  ;;  %2133 = vmatprep.mubr.f32.mxu1 %v993_v33 }
 0x366   : > { %2122 = vmatmul.mubr.f32.gmra.mrb[4].mxu0 %v986_v36  ;;  %2134 = vmatmul.mubr.f32.gmra.mrb[4].mxu1 %v994_v37 }
 0x367   : > { %2124 = vmatprep.mubr.f32.mxu0 %v987_v38  ;;  %2136 = vmatprep.mubr.f32.mxu1 %v995_v39 }
 0x36a   : > { %2125 = vmatmul.mubr.f32.gmra.mrb[6].mxu0 %v988_v40  ;;  %2137 = vmatmul.mubr.f32.gmra.mrb[6].mxu1 %v996_v41 }
 0x3cf   : > { %v1202_v61 = vpop.xlane.xlu1 %1201  ;;  %v1198_v11 = vpop.xlane.xlu0 %1197 }
 0x3d3   : > { %v1204_v27 = vpop.xlane.xlu1 %1203  ;;  %v1200_v32 = vpop.xlane.xlu0 %1199 }
 0x3d7   : > { %v1208_v37 = vpop.xlane.xlu1 %1207  ;;  %v1206_v40 = vpop.xlane.xlu0 %1205 }
 0x431   : > { %v2117_v43 = vpop.f32.mrb[0].mxu0  ;;  %v2129_v44 = vpop.f32.mrb[0].mxu1 }
 0x432   : > { %v3494_v45 = vadd.f32 %v2117_v43, %v3491_v42  ;;  %v1086_v46 = vpop.f32.mrb[1].mxu0  ;;  %v3497_v47 = vadd.f32 %v2129_v44, %v3491_v42  ;;  %v1126_v48 = vpop.f32.mrb[1].mxu1 }
 0x433   : > { %v3500_v49 = vadd.f32 %v3491_v42, %v1086_v46  ;;  %v3503_v50 = vadd.f32 %v3491_v42, %v1126_v48  ;;  %v1231_v48 = vmul.f32 0.0078125, %v1200_v32  ;;  %v1234_v32 = vmul.f32 0.0078125, %v1206_v40 }
 0x434   : > { %v1166_v51 = vmax.f32 %v3494_v45, 0.0  ;;  %v1174_v55 = vmax.f32 %v3497_v47, 0.0 }
 0x435   : > { %v1165_v52 = vmax.f32 %v3500_v49, 0.0  ;;  %v2120_v53 = vpop.f32.mrb[2].mxu0  ;;  %v2132_v54 = vpop.f32.mrb[2].mxu1  ;;  %v1173_v59 = vmax.f32 %v3503_v50, 0.0 }
 0x436   : > { %1418 = vadd.xlane.f32.xlu1 %v1166_v51  ;;  %v3511_v56 = vadd.f32 %v2120_v53, %v3491_v42  ;;  %v1096_v57 = vpop.f32.mrb[3].mxu0  ;;  %v1136_v58 = vpop.f32.mrb[3].mxu1  ;;  %v3523_v1 = vadd.f32 %v2132_v54, %v3491_v42  ;;  %v1230_v54 = vmul.f32 0.0078125, %v1198_v11 }
 0x437   : > { %1416 = vadd.xlane.f32.xlu0 %v1165_v52  ;;  %v3517_v60 = vadd.f32 %v3491_v42, %v1096_v57  ;;  %v3529_v10 = vadd.f32 %v3491_v42, %v1136_v58  ;;  %v1212_v58 = vpop.xlane.xlu1 %1211 }
 0x438   : > { %v1168_v0 = vmax.f32 %v3511_v56, 0.0  ;;  %v1176_v16 = vmax.f32 %v3523_v1, 0.0 }
 0x439   : > { %v2123_v62 = vpop.f32.mrb[4].mxu0  ;;  %v2135_v63 = vpop.f32.mrb[4].mxu1  ;;  %v1167_v7 = vmax.f32 %v3517_v60, 0.0  ;;  %v1175_v25 = vmax.f32 %v3529_v10, 0.0 }
 0x43a   : > { %1434 = vadd.xlane.f32.xlu1 %v1174_v55  ;;  %v1106_v5 = vpop.f32.mrb[5].mxu0  ;;  %v1146_v6 = vpop.f32.mrb[5].mxu1  ;;  %v3535_v17 = vadd.f32 %v2123_v62, %v3491_v42  ;;  %v3547_v31 = vadd.f32 %v2135_v63, %v3491_v42 }
 0x43b   : > { %1432 = vadd.xlane.f32.xlu0 %v1173_v59  ;;  %v3541_v26 = vadd.f32 %v3491_v42, %v1106_v5  ;;  %v3553_v36 = vadd.f32 %v3491_v42, %v1146_v6  ;;  %v1210_v62 = vpop.xlane.xlu0 %1209  ;;  %v3583_v5 = vsub.f32 %v3445_v4, %v1231_v48  ;;  %v1233_v6 = vmul.f32 0.0078125, %v1204_v27 }
 0x43c   : > { %v1170_v30 = vmax.f32 %v3535_v17, 0.0  ;;  %v1178_v38 = vmax.f32 %v3547_v31, 0.0 }
 0x43d   : > { %v2126_v12 = vpop.f32.mrb[6].mxu0  ;;  %v2138_v15 = vpop.f32.mrb[6].mxu1  ;;  %v1169_v33 = vmax.f32 %v3541_v26, 0.0  ;;  %v1177_v41 = vmax.f32 %v3553_v36, 0.0  ;;  %v1263_v4 = vmul.f32 %v3583_v5, %v3583_v5 }
 0x43e   : > { %1422 = vadd.xlane.f32.xlu1 %v1168_v0  ;;  %v1116_v20 = vpop.f32.mrb[7].mxu0  ;;  %v1156_v24 = vpop.f32.mrb[7].mxu1  ;;  %v3559_v39 = vadd.f32 %v2126_v12, %v3491_v42  ;;  %v3571_v46 = vadd.f32 %v2138_v15, %v3491_v42  ;;  %v3586_v12 = vsub.f32 %v3440_v2, %v1230_v54  ;;  %v1232_v15 = vmul.f32 0.0078125, %v1202_v61 }
 0x43f   : > { %1420 = vadd.xlane.f32.xlu0 %v1167_v7  ;;  %v3565_v43 = vadd.f32 %v3491_v42, %v1116_v20  ;;  %v3577_v57 = vadd.f32 %v3491_v42, %v1156_v24  ;;  %v1216_v42 = vpop.xlane.xlu1 %1215  ;;  %v3594_v20 = vsub.f32 %v3449_v8, %v1233_v6  ;;  %v1235_v24 = vmul.f32 0.0078125, %v1208_v37  ;;  %v1214_v27 = vpop.xlane.xlu0 %1213 }
 0x440   : > { %v1172_v44 = vmax.f32 %v3559_v39, 0.0  ;;  %v1180_v63 = vmax.f32 %v3571_v46, 0.0  ;;  %v3599_v2 = vsub.f32 %v3443_v3, %v1232_v15  ;;  %v1262_v61 = vmul.f32 %v3586_v12, %v3586_v12 }
 0x441   : > { %v1171_v53 = vmax.f32 %v3565_v43, 0.0  ;;  %v4054_v11 = vmax.f32 %v3577_v57, 0.0  ;;  %v3606_v48 = vsub.f32 %v3454_v13, %v1235_v24  ;;  %v1265_v8 = vmul.f32 %v3594_v20, %v3594_v20 }
 0x442   : > { %1438 = vadd.xlane.f32.xlu1 %v1176_v16  ;;  %v1237_v54 = vmul.f32 0.0078125, %v1212_v58  ;;  %v3611_v37 = vsub.f32 %v3451_v9, %v1234_v32  ;;  %v1264_v3 = vmul.f32 %v3599_v2, %v3599_v2  ;;  %v1236_v6 = vmul.f32 0.0078125, %v1210_v62 }
 0x443   : > { %1436 = vadd.xlane.f32.xlu0 %v1175_v25  ;;  %v1220_v15 = vpop.xlane.xlu1 %1219  ;;  %v1267_v13 = vmul.f32 %v3606_v48, %v3606_v48  ;;  %v1238_v24 = vmul.f32 0.0078125, %v1214_v27  ;;  %v4131_v43 = vmax.f32 %v3577_v57, 0.0 }
 0x444   : > { %v3616_v40 = vsub.f32 %v3460_v18, %v1237_v54  ;;  %v3621_v58 = vsub.f32 %v3457_v14, %v1236_v6  ;;  %v1266_v9 = vmul.f32 %v3611_v37, %v3611_v37  ;;  %v1241_v32 = vmul.f32 0.0078125, %v1220_v15 }
 0x446   : > { %1426 = vadd.xlane.f32.xlu1 %v1170_v30  ;;  %v1269_v18 = vmul.f32 %v3616_v40, %v3616_v40  ;;  %v1268_v14 = vmul.f32 %v3621_v58, %v3621_v58  ;;  %v3636_v27 = vsub.f32 %v3472_v23, %v1241_v32 }
 0x447   : > { %1424 = vadd.xlane.f32.xlu0 %v1169_v33 }
 0x448   : > { %v1273_v23 = vmul.f32 %v3636_v27, %v3636_v27 }
 0x44a   : > { %1442 = vadd.xlane.f32.xlu1 %v1178_v38 }
 0x44b   : > { %1440 = vadd.xlane.f32.xlu0 %v1177_v41 }
 0x44e   : > { %1430 = vadd.xlane.f32.xlu1 %v1172_v44 }
 0x44f   : > { %1428 = vadd.xlane.f32.xlu0 %v1171_v53 }
 0x452   : > { %1446 = vadd.xlane.f32.xlu1 %v1180_v63 }
 0x453   : > { %1444 = vadd.xlane.f32.xlu0 %v4054_v11  ;;  %v1218_v11 = vpop.xlane.xlu0 %1217 }
 0x454   : > { %v1240_v54 = vmul.f32 0.0078125, %v1218_v11 }
 0x456   : > { %1280 = vadd.xlane.f32.xlu1 %v1263_v4  ;;  %v1239_v4 = vmul.f32 0.0078125, %v1216_v42  ;;  %v3631_v42 = vsub.f32 %v3463_v19, %v1238_v24  ;;  %v3641_v6 = vsub.f32 %v3469_v22, %v1240_v54 }
 0x457   : > { %1278 = vadd.xlane.f32.xlu0 %v1262_v61  ;;  %v1224_v61 = vpop.xlane.xlu1 %1223 }
 0x458   : > { %v3626_v62 = vsub.f32 %v3466_v21, %v1239_v4  ;;  %v1270_v19 = vmul.f32 %v3631_v42, %v3631_v42  ;;  %v1272_v22 = vmul.f32 %v3641_v6, %v3641_v6 }
 0x45a   : > { %1284 = vadd.xlane.f32.xlu1 %v1265_v8  ;;  %v1222_v8 = vpop.xlane.xlu0 %1221  ;;  %v1271_v21 = vmul.f32 %v3626_v62, %v3626_v62 }
 0x45b   : > { %1282 = vadd.xlane.f32.xlu0 %v1264_v3  ;;  %v1243_v3 = vmul.f32 0.0078125, %v1224_v61  ;;  %v1242_v15 = vmul.f32 0.0078125, %v1222_v8 }
 0x45d   : > { %v3646_v11 = vsub.f32 %v3478_v29, %v1243_v3  ;;  %v3651_v24 = vsub.f32 %v3476_v28, %v1242_v15 }
 0x45e   : > { %1288 = vadd.xlane.f32.xlu1 %v1267_v13  ;;  %v1228_v13 = vpop.xlane.xlu1 %1227  ;;  %v1226_v4 = vpop.xlane.xlu0 %1225 }
 0x45f   : > { %1286 = vadd.xlane.f32.xlu0 %v1266_v9  ;;  %v1245_v9 = vmul.f32 0.0078125, %v1228_v13  ;;  %v1244_v61 = vmul.f32 0.0078125, %v1226_v4  ;;  %v1275_v29 = vmul.f32 %v3646_v11, %v3646_v11  ;;  %v1274_v8 = vmul.f32 %v3651_v24, %v3651_v24 }
 0x461   : > { %v3661_v32 = vsub.f32 %v3482_v34, %v1244_v61 }
 0x462   : > { %1292 = vadd.xlane.f32.xlu1 %v1269_v18  ;;  %v3656_v18 = vsub.f32 %v3484_v35, %v1245_v9 }
 0x463   : > { %1290 = vadd.xlane.f32.xlu0 %v1268_v14  ;;  %v1276_v14 = vmul.f32 %v3661_v32, %v3661_v32 }
 0x464   : > { %v1277_v28 = vmul.f32 %v3656_v18, %v3656_v18 }
 0x466   : > { %1296 = vadd.xlane.f32.xlu1 %v1271_v21 }
 0x467   : > { %1294 = vadd.xlane.f32.xlu0 %v1270_v19 }
 0x46a   : > { %1300 = vadd.xlane.f32.xlu1 %v1273_v23 }
 0x46b   : > { %1298 = vadd.xlane.f32.xlu0 %v1272_v22 }
 0x46e   : > { %1304 = vadd.xlane.f32.xlu1 %v1275_v29 }
 0x46f   : > { %1302 = vadd.xlane.f32.xlu0 %v1274_v8 }
 0x472   : > { %1308 = vadd.xlane.f32.xlu1 %v1277_v28 }
 0x473   : > { %1306 = vadd.xlane.f32.xlu0 %v1276_v14 }
 0x4c3   : > { %v1419_v35 = vpop.xlane.xlu1 %1418 }
 0x4c4   : > { %v1449_v54 = vmul.f32 0.0078125, %v1419_v35  ;;  %v1417_v21 = vpop.xlane.xlu0 %1416 }
 0x4c5   : > { %v1448_v3 = vmul.f32 0.0078125, %v1417_v21 }
 0x4c6   : > { %v3671_v34 = vsub.f32 %v1166_v51, %v1449_v54 }
 0x4c7   : > { %v3675_v19 = vsub.f32 %v1165_v52, %v1448_v3  ;;  %v1435_v15 = vpop.xlane.xlu1 %1434 }
 0x4c8   : > { %v1457_v13 = vmul.f32 0.0078125, %v1435_v15  ;;  %v1433_v4 = vpop.xlane.xlu0 %1432  ;;  %v1481_v23 = vmul.f32 %v3671_v34, %v3671_v34 }
 0x4c9   : > { %v1456_v9 = vmul.f32 0.0078125, %v1433_v4  ;;  %v1480_v22 = vmul.f32 %v3675_v19, %v3675_v19 }
 0x4ca   : > { %v3683_v61 = vsub.f32 %v1174_v55, %v1457_v13  ;;  %1498 = vadd.xlane.f32.xlu1 %v1481_v23 }
 0x4cb   : > { %v3687_v45 = vsub.f32 %v1173_v59, %v1456_v9  ;;  %v1423_v49 = vpop.xlane.xlu1 %1422  ;;  %1496 = vadd.xlane.f32.xlu0 %v1480_v22 }
 0x4cc   : > { %v1451_v51 = vmul.f32 0.0078125, %v1423_v49  ;;  %v1421_v52 = vpop.xlane.xlu0 %1420  ;;  %v1489_v29 = vmul.f32 %v3683_v61, %v3683_v61 }
 0x4cd   : > { %v1450_v8 = vmul.f32 0.0078125, %v1421_v52  ;;  %v1488_v28 = vmul.f32 %v3687_v45, %v3687_v45 }
 0x4ce   : > { %v3695_v47 = vsub.f32 %v1168_v0, %v1451_v51  ;;  %1514 = vadd.xlane.f32.xlu1 %v1489_v29 }
 0x4cf   : > { %v3699_v50 = vsub.f32 %v1167_v7, %v1450_v8  ;;  %v1439_v55 = vpop.xlane.xlu1 %1438  ;;  %1512 = vadd.xlane.f32.xlu0 %v1488_v28 }
 0x4d0   : > { %v1459_v59 = vmul.f32 0.0078125, %v1439_v55  ;;  %v1437_v14 = vpop.xlane.xlu0 %1436  ;;  %v1483_v35 = vmul.f32 %v3695_v47, %v3695_v47 }
 0x4d1   : > { %v1458_v54 = vmul.f32 0.0078125, %v1437_v14  ;;  %v1482_v21 = vmul.f32 %v3699_v50, %v3699_v50 }
 0x4d2   : > { %v3707_v56 = vsub.f32 %v1176_v16, %v1459_v59  ;;  %1502 = vadd.xlane.f32.xlu1 %v1483_v35 }
 0x4d3   : > { %v3711_v60 = vsub.f32 %v1175_v25, %v1458_v54  ;;  %v1427_v0 = vpop.xlane.xlu1 %1426  ;;  %1500 = vadd.xlane.f32.xlu0 %v1482_v21 }
 0x4d4   : > { %v1453_v7 = vmul.f32 0.0078125, %v1427_v0  ;;  %v1425_v3 = vpop.xlane.xlu0 %1424  ;;  %v1491_v15 = vmul.f32 %v3707_v56, %v3707_v56 }
 0x4d5   : > { %v1452_v13 = vmul.f32 0.0078125, %v1425_v3  ;;  %v1490_v4 = vmul.f32 %v3711_v60, %v3711_v60 }
 0x4d6   : > { %v3719_v1 = vsub.f32 %v1170_v30, %v1453_v7  ;;  %1518 = vadd.xlane.f32.xlu1 %v1491_v15 }
 0x4d7   : > { %v3723_v10 = vsub.f32 %v1169_v33, %v1452_v13  ;;  %v1443_v16 = vpop.xlane.xlu1 %1442  ;;  %1516 = vadd.xlane.f32.xlu0 %v1490_v4 }
 0x4d8   : > { %v1461_v25 = vmul.f32 0.0078125, %v1443_v16  ;;  %v1441_v23 = vpop.xlane.xlu0 %1440  ;;  %v1485_v9 = vmul.f32 %v3719_v1, %v3719_v1 }
 0x4d9   : > { %v1460_v22 = vmul.f32 0.0078125, %v1441_v23  ;;  %v1484_v49 = vmul.f32 %v3723_v10, %v3723_v10 }
 0x4da   : > { %v3731_v17 = vsub.f32 %v1178_v38, %v1461_v25  ;;  %1506 = vadd.xlane.f32.xlu1 %v1485_v9 }
 0x4db   : > { %v3735_v26 = vsub.f32 %v1177_v41, %v1460_v22  ;;  %v1431_v30 = vpop.xlane.xlu1 %1430  ;;  %1504 = vadd.xlane.f32.xlu0 %v1484_v49 }
 0x4dc   : > { %v1455_v33 = vmul.f32 0.0078125, %v1431_v30  ;;  %v1429_v51 = vpop.xlane.xlu0 %1428  ;;  %v1493_v52 = vmul.f32 %v3731_v17, %v3731_v17 }
 0x4dd   : > { %v1454_v29 = vmul.f32 0.0078125, %v1429_v51  ;;  %v1492_v8 = vmul.f32 %v3735_v26, %v3735_v26 }
 0x4de   : > { %v3743_v31 = vsub.f32 %v1172_v44, %v1455_v33  ;;  %1522 = vadd.xlane.f32.xlu1 %v1493_v52 }
 0x4df   : > { %v3747_v36 = vsub.f32 %v1171_v53, %v1454_v29  ;;  %v1447_v38 = vpop.xlane.xlu1 %1446  ;;  %1520 = vadd.xlane.f32.xlu0 %v1492_v8 }
 0x4e0   : > { %v1463_v41 = vmul.f32 0.0078125, %v1447_v38  ;;  %v1445_v28 = vpop.xlane.xlu0 %1444  ;;  %v1487_v55 = vmul.f32 %v3743_v31, %v3743_v31 }
 0x4e1   : > { %v1462_v59 = vmul.f32 0.0078125, %v1445_v28  ;;  %v1486_v14 = vmul.f32 %v3747_v36, %v3747_v36 }
 0x4e2   : > { %v3755_v39 = vsub.f32 %v1180_v63, %v1463_v41  ;;  %1510 = vadd.xlane.f32.xlu1 %v1487_v55 }
 0x4e3   : > { %v3759_v44 = vsub.f32 %v4131_v43, %v1462_v59  ;;  %1508 = vadd.xlane.f32.xlu0 %v1486_v14  ;;  %v1281_v54 = vpop.xlane.xlu1 %1280 }
 0x4e4   : > { %v1495_v53 = vmul.f32 %v3755_v39, %v3755_v39  ;;  %v1279_v21 = vpop.xlane.xlu0 %1278  ;;  %v1311_v4 = vmul.f32 0.0078125, %v1281_v54 }
 0x4e5   : > { %v1494_v35 = vmul.f32 %v3759_v44, %v3759_v44  ;;  %v1310_v16 = vmul.f32 0.0078125, %v1279_v21 }
 0x4e6   : > { %1526 = vadd.xlane.f32.xlu1 %v1495_v53  ;;  %v1327_v25 = vadd.f32 1e-09, %v1311_v4 }
 0x4e7   : > { %1524 = vadd.xlane.f32.xlu0 %v1494_v35  ;;  %v1285_v0 = vpop.xlane.xlu1 %1284  ;;  %v1326_v30 = vadd.f32 1e-09, %v1310_v16 }
 0x4e8   : > { %v1283_v46 = vpop.xlane.xlu0 %1282  ;;  %v1313_v23 = vmul.f32 0.0078125, %v1285_v0  ;;  %2456 = vrsqrt.f32 %v1327_v25 }
 0x4e9   : > { %v1312_v22 = vmul.f32 0.0078125, %v1283_v46  ;;  %2458 = vrsqrt.f32 %v1326_v30  ;;  %v3768_v46 = vld [vmem:[%s4132_s9] ss:$0 sm:$0xff] }
 0x4ea   : > { %v1329_v33 = vadd.f32 1e-09, %v1313_v23 }
 0x4eb   : > { %v1289_v63 = vpop.xlane.xlu1 %1288  ;;  %v1328_v51 = vadd.f32 1e-09, %v1312_v22 }
 0x4ec   : > { %v1287_v7 = vpop.xlane.xlu0 %1286  ;;  %2460 = vrsqrt.f32 %v1329_v33  ;;  %v1315_v41 = vmul.f32 0.0078125, %v1289_v63 }
 0x4ed   : > { %2462 = vrsqrt.f32 %v1328_v51  ;;  %v1314_v28 = vmul.f32 0.0078125, %v1287_v7 }
 0x4ee   : > { %v1331_v43 = vadd.f32 1e-09, %v1315_v41 }
 0x4ef   : > { %v1293_v3 = vpop.xlane.xlu1 %1292  ;;  %v1330_v54 = vadd.f32 1e-09, %v1314_v28 }
 0x4f0   : > { %v1291_v15 = vpop.xlane.xlu0 %1290  ;;  %v1317_v59 = vmul.f32 0.0078125, %v1293_v3 }
 0x4f2   : > { %v2457_v0 = vpop.eup %2456 }
 0x4f3   : > { %v1297_v57 = vpop.xlane.xlu1 %1296  ;;  %v2459_v4 = vpop.eup %2458  ;;  %v1365_v16 = vmul.f32 %v2457_v0, %v3768_v46 }
 0x4f4   : > { %v1295_v13 = vpop.xlane.xlu0 %1294  ;;  %v1319_v52 = vmul.f32 0.0078125, %v1297_v57  ;;  %v1333_v57 = vadd.f32 1e-09, %v1317_v59 }
 0x4f5   : > { %v1318_v8 = vmul.f32 0.0078125, %v1295_v13  ;;  %v1316_v13 = vmul.f32 0.0078125, %v1291_v15 }
 0x4f6   : > { %v1335_v55 = vadd.f32 1e-09, %v1319_v52 }
 0x4f7   : > { %v1301_v9 = vpop.xlane.xlu1 %1300  ;;  %v1334_v14 = vadd.f32 1e-09, %v1318_v8  ;;  %v1332_v33 = vadd.f32 1e-09, %v1316_v13 }
 0x4f8   : > { %v1299_v49 = vpop.xlane.xlu0 %1298  ;;  %v1321_v53 = vmul.f32 0.0078125, %v1301_v9  ;;  %2464 = vrsqrt.f32 %v1335_v55  ;;  %v2461_v9 = vpop.eup %2460  ;;  %v1364_v55 = vmul.f32 %v2459_v4, %v3768_v46 }
 0x4f9   : > { %2466 = vrsqrt.f32 %v1334_v14  ;;  %v1320_v7 = vmul.f32 0.0078125, %v1299_v49  ;;  %v2463_v30 = vpop.eup %2462  ;;  %v1381_v49 = vmul.f32 %v1365_v16, %v3583_v5 }
 0x4fa   : > { %2468 = vrsqrt.f32 %v1331_v43  ;;  %v1337_v63 = vadd.f32 1e-09, %v1321_v53  ;;  %v3776_v43 = vld [vmem:[%s4133_s13] ss:$0 sm:$0xff]  ;;  %v1366_v53 = vmul.f32 %v2463_v30, %v3768_v46 }
 0x4fb   : > { %v1305_v29 = vpop.xlane.xlu1 %1304  ;;  %2470 = vrsqrt.f32 %v1330_v54  ;;  %v1336_v15 = vadd.f32 1e-09, %v1320_v7  ;;  %v3781_v16 = vadd.f32 %v3776_v43, %v1381_v49 }
 0x4fc   : > { %v1303_v38 = vpop.xlane.xlu0 %1302  ;;  %2472 = vrsqrt.f32 %v1333_v57  ;;  %v1323_v51 = vmul.f32 0.0078125, %v1305_v29  ;;  %v1367_v29 = vmul.f32 %v2461_v9, %v3768_v46 }
 0x4fd   : > { %2474 = vrsqrt.f32 %v1337_v63  ;;  %v1322_v8 = vmul.f32 0.0078125, %v1303_v38 }
 0x4fe   : > { %v1339_v54 = vadd.f32 1e-09, %v1323_v51  ;;  %v1383_v30 = vmul.f32 %v1367_v29, %v3594_v20 }
 0x4ff   : > { %v1309_v35 = vpop.xlane.xlu1 %1308  ;;  %v1338_v13 = vadd.f32 1e-09, %v1322_v8 }
 0x500   : > { %v1307_v21 = vpop.xlane.xlu0 %1306  ;;  %v1325_v0 = vmul.f32 0.0078125, %v1309_v35  ;;  %v1382_v35 = vmul.f32 %v1366_v53, %v3599_v2  ;;  %v3798_v53 = vadd.f32 %v3776_v43, %v1383_v30 }
 0x501   : > { %v1324_v63 = vmul.f32 0.0078125, %v1307_v21 }
 0x502   : > { %v2465_v57 = vpop.eup %2464 }
 0x503   : > { %v2467_v4 = vpop.eup %2466  ;;  %v1373_v21 = vmul.f32 %v2465_v57, %v3768_v46 }
 0x504   : > { %v1372_v8 = vmul.f32 %v2467_v4, %v3768_v46 }
 0x505   : > { %v1389_v57 = vmul.f32 %v1373_v21, %v3626_v62 }
 0x557   : > { %v1499_v3 = vpop.xlane.xlu1 %1498 }
 0x558   : > { %v1529_v25 = vmul.f32 0.0078125, %v1499_v3  ;;  %v1497_v23 = vpop.xlane.xlu0 %1496 }
 0x559   : > { %v1528_v22 = vmul.f32 0.0078125, %v1497_v23 }
 0x55a   : > { %v1545_v52 = vadd.f32 1e-09, %v1529_v25  ;;  %v1380_v25 = vmul.f32 %v1364_v55, %v3586_v12  ;;  %v1340_v12 = vadd.f32 1e-09, %v1324_v63  ;;  %v3795_v55 = vld [vmem:[%s4132_s9 + $0x1] ss:$0 sm:$0xff] }
 0x55b   : > { %v1544_v41 = vadd.f32 1e-09, %v1528_v22  ;;  %v1515_v28 = vpop.xlane.xlu1 %1514  ;;  %v2469_v22 = vpop.eup %2468 }
 0x55c   : > { %2476 = vrsqrt.f32 %v1545_v52  ;;  %v1537_v59 = vmul.f32 0.0078125, %v1515_v28  ;;  %v1513_v14 = vpop.xlane.xlu0 %1512  ;;  %v2471_v51 = vpop.eup %2470  ;;  %v1341_v52 = vadd.f32 1e-09, %v1325_v0  ;;  %v1400_v20 = vadd.f32 %v3776_v43, %v1380_v25 }
 0x55d   : > { %2478 = vrsqrt.f32 %v1544_v41  ;;  %v1536_v38 = vmul.f32 0.0078125, %v1513_v14  ;;  %v3788_v49 = vpop.eup %2472  ;;  %v1369_v2 = vmul.f32 %v2469_v22, %v3768_v46  ;;  %v3815_v22 = vld [vmem:[%s4134_s6 + $0x1] ss:$0 sm:$0xff] }
 0x55e   : > { %2480 = vrsqrt.f32 %v1332_v33  ;;  %v1553_v5 = vadd.f32 1e-09, %v1537_v59  ;;  %v2475_v29 = vpop.eup %2474 }
 0x55f   : > { %2482 = vrsqrt.f32 %v1336_v15  ;;  %v1552_v7 = vadd.f32 1e-09, %v1536_v38  ;;  %v1503_v3 = vpop.xlane.xlu1 %1502  ;;  %v1368_v38 = vmul.f32 %v2471_v51, %v3768_v46 }
 0x560   : > { %2484 = vrsqrt.f32 %v1553_v5  ;;  %v1531_v23 = vmul.f32 0.0078125, %v1503_v3  ;;  %v1501_v9 = vpop.xlane.xlu0 %1500  ;;  %v3802_v5 = vadd.f32 %v3776_v43, %v1382_v35 }
 0x561   : > { %2486 = vrsqrt.f32 %v1552_v7  ;;  %v1530_v33 = vmul.f32 0.0078125, %v1501_v9  ;;  %v1388_v7 = vmul.f32 %v1372_v8, %v3631_v42  ;;  %v3810_v9 = vmul.f32 %v1369_v2, %v3606_v48 }
 0x562   : > { %2488 = vrsqrt.f32 %v1339_v54  ;;  %v1547_v15 = vadd.f32 1e-09, %v1531_v23 }
 0x563   : > { %2490 = vrsqrt.f32 %v1338_v13  ;;  %v1546_v41 = vadd.f32 1e-09, %v1530_v33  ;;  %v1519_v28 = vpop.xlane.xlu1 %1518  ;;  %v3819_v33 = vmul.f32 %v1368_v38, %v3611_v37 }
 0x564   : > { %2492 = vrsqrt.f32 %v1547_v15  ;;  %v1539_v59 = vmul.f32 0.0078125, %v1519_v28  ;;  %v1517_v14 = vpop.xlane.xlu0 %1516  ;;  %v1375_v15 = vmul.f32 %v2475_v29, %v3768_v46  ;;  %v1408_v28 = vadd.f32 %v3776_v43, %v1388_v7 }
 0x565   : > { %2494 = vrsqrt.f32 %v1546_v41  ;;  %v1538_v54 = vmul.f32 0.0078125, %v1517_v14 }
 0x566   : > { %v2477_v0 = vpop.eup %2476  ;;  %2496 = vrsqrt.f32 %v1341_v52  ;;  %v1555_v13 = vadd.f32 1e-09, %v1539_v59  ;;  %v1409_v52 = vadd.f32 %v3776_v43, %v1389_v57 }
 0x567   : > { %v2479_v63 = vpop.eup %2478  ;;  %2498 = vrsqrt.f32 %v1340_v12  ;;  %v1583_v3 = vmul.f32 %v2477_v0, %v3795_v55  ;;  %v1554_v4 = vadd.f32 1e-09, %v1538_v54  ;;  %v1507_v25 = vpop.xlane.xlu1 %1506 }
 0x568   : > { %v3807_v23 = vpop.eup %2480  ;;  %v1582_v62 = vmul.f32 %v2479_v63, %v3795_v55  ;;  %2500 = vrsqrt.f32 %v1555_v13  ;;  %v1533_v30 = vmul.f32 0.0078125, %v1507_v25  ;;  %v1505_v42 = vpop.xlane.xlu0 %1504 }
 0x569   : > { %v2483_v35 = vpop.eup %2482  ;;  %v1599_v51 = vmul.f32 %v1583_v3, %v3671_v34  ;;  %2502 = vrsqrt.f32 %v1554_v4  ;;  %v1532_v21 = vmul.f32 0.0078125, %v1505_v42  ;;  %v1391_v42 = vmul.f32 %v1375_v15, %v3636_v27 }
 0x56a   : > { %v2485_v48 = vpop.eup %2484  ;;  %v1598_v8 = vmul.f32 %v1582_v62, %v3675_v19  ;;  %v1549_v12 = vadd.f32 1e-09, %v1533_v30  ;;  %v1374_v3 = vmul.f32 %v2483_v35, %v3768_v46 }
 0x56b   : > { %v2487_v41 = vpop.eup %2486  ;;  %v1619_v2 = vadd.f32 %v3815_v22, %v1599_v51  ;;  %v1591_v37 = vmul.f32 %v2485_v48, %v3795_v55  ;;  %v1548_v59 = vadd.f32 1e-09, %v1532_v21  ;;  %v1523_v14 = vpop.xlane.xlu1 %1522 }
 0x56c   : > { %v2489_v34 = vpop.eup %2488  ;;  %v1618_v38 = vadd.f32 %v3815_v22, %v1598_v8  ;;  %v1590_v54 = vmul.f32 %v2487_v41, %v3795_v55  ;;  %2504 = vrsqrt.f32 %v1549_v12  ;;  %v1541_v29 = vmul.f32 0.0078125, %v1523_v14  ;;  %v1521_v0 = vpop.xlane.xlu0 %1520 }
 0x56d   : > { %v2491_v19 = vpop.eup %2490  ;;  %v1635_v57 = vadd.f32 %v1619_v2, %v3781_v16  ;;  %v1607_v13 = vmul.f32 %v1591_v37, %v3683_v61  ;;  %2506 = vrsqrt.f32 %v1548_v59  ;;  %v1540_v63 = vmul.f32 0.0078125, %v1521_v0 }
 0x56e   : > { %v2493_v7 = vpop.eup %2492  ;;  %v1634_v4 = vadd.f32 %v1618_v38, %v1400_v20  ;;  %v1606_v25 = vmul.f32 %v1590_v54, %v3687_v45  ;;  %v1557_v62 = vadd.f32 1e-09, %v1541_v29  ;;  %v1390_v37 = vmul.f32 %v1374_v3, %v3641_v6 }
 0x56f   : > { %v2495_v30 = vpop.eup %2494  ;;  %1651 = vst [vmem:[%s3383_s20 + $0x8] sm:$0xff] %v1635_v57  ;;  %v1627_v51 = vadd.f32 %v3815_v22, %v1607_v13  ;;  %v1585_v16 = vmul.f32 %v2493_v7, %v3795_v55  ;;  %v1556_v21 = vadd.f32 1e-09, %v1540_v63  ;;  %v1511_v61 = vpop.xlane.xlu1 %1510  ;;  %v1411_v29 = vadd.f32 %v3776_v43, %v1391_v42 }
 0x570   : > { %v3838_v48 = vpop.eup %2496  ;;  %1650 = vst [vmem:[%s3383_s20] sm:$0xff] %v1634_v4  ;;  %v1626_v8 = vadd.f32 %v3815_v22, %v1606_v25  ;;  %v1584_v20 = vmul.f32 %v2495_v30, %v3795_v55  ;;  %2508 = vrsqrt.f32 %v1557_v62  ;;  %v1535_v45 = vmul.f32 0.0078125, %v1511_v61  ;;  %v1509_v35 = vpop.xlane.xlu0 %1508 }
 0x571   : > { %v3843_v12 = vpop.eup %2498  ;;  %v1643_v27 = vadd.f32 %v1627_v51, %v1409_v52  ;;  %v1601_v15 = vmul.f32 %v1585_v16, %v3695_v47  ;;  %2510 = vrsqrt.f32 %v1556_v21  ;;  %v1534_v41 = vmul.f32 0.0078125, %v1509_v35 }
 0x572   : > { %v2501_v2 = vpop.eup %2500  ;;  %v1642_v59 = vadd.f32 %v1626_v8, %v1408_v28  ;;  %v1600_v14 = vmul.f32 %v1584_v20, %v3699_v50  ;;  %v1551_v38 = vadd.f32 1e-09, %v1535_v45  ;;  %v1377_v25 = vmul.f32 %v2489_v34, %v3768_v46 }
 0x573   : > { %v2503_v54 = vpop.eup %2502  ;;  %1659 = vst [vmem:[%s3383_s20 + $0x48] sm:$0xff] %v1643_v27  ;;  %v1621_v0 = vadd.f32 %v3815_v22, %v1601_v15  ;;  %v1593_v52 = vmul.f32 %v2501_v2, %v3795_v55  ;;  %v1550_v57 = vadd.f32 1e-09, %v1534_v41  ;;  %v1527_v13 = vpop.xlane.xlu1 %1526  ;;  %v1410_v16 = vadd.f32 %v3776_v43, %v1390_v37 }
 0x574   : > { %1658 = vst [vmem:[%s3383_s20 + $0x40] sm:$0xff] %v1642_v59  ;;  %v1620_v47 = vadd.f32 %v3815_v22, %v1600_v14  ;;  %v1592_v6 = vmul.f32 %v2503_v54, %v3795_v55  ;;  %2512 = vrsqrt.f32 %v1551_v38  ;;  %v1543_v28 = vmul.f32 0.0078125, %v1527_v13  ;;  %v1525_v50 = vpop.xlane.xlu0 %1524 }
 0x575   : > { %v1637_v63 = vadd.f32 %v1621_v0, %v3798_v53  ;;  %v1609_v7 = vmul.f32 %v1593_v52, %v3707_v56  ;;  %2514 = vrsqrt.f32 %v1550_v57  ;;  %v1542_v3 = vmul.f32 0.0078125, %v1525_v50 }
 0x576   : > { %v2505_v4 = vpop.eup %2504  ;;  %v1636_v62 = vadd.f32 %v1620_v47, %v3802_v5  ;;  %v1608_v30 = vmul.f32 %v1592_v6, %v3711_v60  ;;  %v1559_v42 = vadd.f32 1e-09, %v1543_v28  ;;  %v1376_v56 = vmul.f32 %v2491_v19, %v3768_v46 }
 0x577   : > { %v2507_v51 = vpop.eup %2506  ;;  %1653 = vst [vmem:[%s3383_s20 + $0x18] sm:$0xff] %v1637_v63  ;;  %v1629_v21 = vadd.f32 %v3815_v22, %v1609_v7  ;;  %v1587_v53 = vmul.f32 %v2505_v4, %v3795_v55  ;;  %v1558_v61 = vadd.f32 1e-09, %v1542_v3  ;;  %v1371_v45 = vmul.f32 %v3788_v49, %v3768_v46 }
 0x578   : > { %1652 = vst [vmem:[%s3383_s20 + $0x10] sm:$0xff] %v1636_v62  ;;  %v1628_v34 = vadd.f32 %v3815_v22, %v1608_v30  ;;  %v1586_v5 = vmul.f32 %v2507_v51, %v3795_v55  ;;  %2516 = vrsqrt.f32 %v1559_v42  ;;  %v1370_v35 = vmul.f32 %v3807_v23, %v3768_v46 }
 0x579   : > { %v1645_v60 = vadd.f32 %v1629_v21, %v1411_v29  ;;  %v1603_v8 = vmul.f32 %v1587_v53, %v3719_v1  ;;  %2518 = vrsqrt.f32 %v1558_v61  ;;  %v1405_v41 = vadd.f32 %v3776_v43, %v3810_v9 }
 0x57a   : > { %v2509_v20 = vpop.eup %2508  ;;  %v1644_v19 = vadd.f32 %v1628_v34, %v1410_v16  ;;  %v1602_v27 = vmul.f32 %v1586_v5, %v3723_v10  ;;  %v1393_v2 = vmul.f32 %v1377_v25, %v3646_v11  ;;  %v1404_v49 = vadd.f32 %v3776_v43, %v3819_v33 }
 0x57b   : > { %v2511_v15 = vpop.eup %2510  ;;  %1661 = vst [vmem:[%s3383_s20 + $0x58] sm:$0xff] %v1645_v60  ;;  %v1623_v1 = vadd.f32 %v3815_v22, %v1603_v8  ;;  %v1595_v37 = vmul.f32 %v2509_v20, %v3795_v55  ;;  %v1392_v23 = vmul.f32 %v1376_v56, %v3651_v24  ;;  %v1387_v38 = vmul.f32 %v1371_v45, %v3616_v40 }
 0x57c   : > { %1660 = vst [vmem:[%s3383_s20 + $0x50] sm:$0xff] %v1644_v19  ;;  %v1622_v10 = vadd.f32 %v3815_v22, %v1602_v27  ;;  %v1594_v59 = vmul.f32 %v2511_v15, %v3795_v55  ;;  %v1386_v54 = vmul.f32 %v1370_v35, %v3621_v58  ;;  %v1413_v24 = vadd.f32 %v3776_v43, %v1393_v2 }
 0x57d   : > { %v1639_v9 = vadd.f32 %v1623_v1, %v1405_v41  ;;  %v1611_v11 = vmul.f32 %v1595_v37, %v3731_v17  ;;  %v1379_v52 = vmul.f32 %v3838_v48, %v3768_v46  ;;  %v1412_v13 = vadd.f32 %v3776_v43, %v1392_v23 }
 0x57e   : > { %v2513_v14 = vpop.eup %2512  ;;  %v1638_v29 = vadd.f32 %v1622_v10, %v1404_v49  ;;  %v1610_v0 = vmul.f32 %v1594_v59, %v3735_v26  ;;  %v1378_v40 = vmul.f32 %v3843_v12, %v3768_v46  ;;  %v1407_v7 = vadd.f32 %v3776_v43, %v1387_v38 }
 0x57f   : > { %v2515_v33 = vpop.eup %2514  ;;  %1655 = vst [vmem:[%s3383_s20 + $0x28] sm:$0xff] %v1639_v9  ;;  %v1631_v57 = vadd.f32 %v3815_v22, %v1611_v11  ;;  %v1589_v17 = vmul.f32 %v2513_v14, %v3795_v55  ;;  %v1395_v3 = vmul.f32 %v1379_v52, %v3656_v18  ;;  %v1406_v4 = vadd.f32 %v3776_v43, %v1386_v54 }
 0x580   : > { %1654 = vst [vmem:[%s3383_s20 + $0x20] sm:$0xff] %v1638_v29  ;;  %v1630_v58 = vadd.f32 %v3815_v22, %v1610_v0  ;;  %v1588_v26 = vmul.f32 %v2515_v33, %v3795_v55 }
 0x581   : > { %v1647_v47 = vadd.f32 %v1631_v57, %v1413_v24  ;;  %v1605_v48 = vmul.f32 %v1589_v17, %v3743_v31  ;;  %v1394_v31 = vmul.f32 %v1378_v40, %v3661_v32  ;;  %v1415_v51 = vadd.f32 %v3776_v43, %v1395_v3 }
 0x582   : > { %v2517_v6 = vpop.eup %2516  ;;  %v1646_v28 = vadd.f32 %v1630_v58, %v1412_v13  ;;  %v1604_v50 = vmul.f32 %v1588_v26, %v3747_v36 }
 0x583   : > { %v2519_v63 = vpop.eup %2518  ;;  %1663 = vst [vmem:[%s3383_s20 + $0x68] sm:$0xff] %v1647_v47  ;;  %v1625_v46 = vadd.f32 %v3815_v22, %v1605_v48  ;;  %v1597_v12 = vmul.f32 %v2517_v6, %v3795_v55  ;;  %v1414_v32 = vadd.f32 %v3776_v43, %v1394_v31 }
 0x584   : > { %1662 = vst [vmem:[%s3383_s20 + $0x60] sm:$0xff] %v1646_v28  ;;  %v1624_v36 = vadd.f32 %v3815_v22, %v1604_v50  ;;  %v1596_v25 = vmul.f32 %v2519_v63, %v3795_v55 }
 0x585   : > { %v1641_v62 = vadd.f32 %v1625_v46, %v1407_v7  ;;  %v1613_v18 = vmul.f32 %v1597_v12, %v3755_v39 }
 0x586   : > { %v1640_v30 = vadd.f32 %v1624_v36, %v1406_v4  ;;  %v1612_v42 = vmul.f32 %v1596_v25, %v3759_v44 }
 0x587   : > { %1657 = vst [vmem:[%s3383_s20 + $0x38] sm:$0xff] %v1641_v62  ;;  %v1633_v16 = vadd.f32 %v3815_v22, %v1613_v18 }
 0x588   : > { %1656 = vst [vmem:[%s3383_s20 + $0x30] sm:$0xff] %v1640_v30  ;;  %v1632_v21 = vadd.f32 %v3815_v22, %v1612_v42 }
 0x589   : > { %v1649_v53 = vadd.f32 %v1633_v16, %v1415_v51 }
 0x58a   : > { %v1648_v61 = vadd.f32 %v1632_v21, %v1414_v32 }
 0x58b   : > { %1665 = vst [vmem:[%s3383_s20 + $0x78] sm:$0xff] %v1649_v53 }
 0x58c   : > { %1664 = vst [vmem:[%s3383_s20 + $0x70] sm:$0xff] %v1648_v61 }
 0x58d PF: > { %s4135_s10 = sld [smem:[#allocation32_spill]]  ;;  %s4137_s0 = sld [smem:[#allocation47_spill]] }
 0x58e   : > { %s1680_s1 = sshll.u32 %s3383_s20, 4  ;;  %s3935_s5 = scalar_lea.sflag [#allocation9], %s446_s14  ;;  %s3931_s1 = int_to_ptr.vmem [resolvable:$true] %s1680_s1 }
 0x58f   : > { %s2688_s17 = scalar_lea.vmem %s3931_s1, 2048  ;;  %s2861_s13 = smov [#allocation16]  }
 0x590   : > { %p2689_p12 = scmp.ne.s32.totalorder %s3931_s1, %s2688_s17  ;;  %s2692_s8 = sshll.u32 %s2861_s13, 4  ;;  %s2693_s8 = int_to_ptr.vmem [resolvable:$false] %s2692_s8 }
 0x591   : > { %s2694_s15 = scalar_lea.vmem %s2693_s8, 4096  ;;  %p2695_p7 = scmp.lt.s32.totalorder %s3931_s1, %s2693_s8 }
 0x592   : > { %p2690_p6 = pnand %p2689_p12, %p3291_p1  ;;  %p2696_p0 = scmp.lt.s32.totalorder %s2694_s15, %s2688_s17 }
 0x593   : > { %s1874_s11 = sshll.u32 %s4135_s10, 11  ;;  %s4138_s3 = smov %s4137_s0 }
 0x594   : > { %s3928_s27 = scalar_lea.hbm %s4137_s0, %s1874_s11  ;;  %p2691_p5 = pneg %p2690_p6 }
 0x595   : > { %p2697_p8 = por %p2696_p0, %p2695_p7 }
 0x597   : > { %p2698_p3 = pnand %p2697_p8, %p2691_p5 }
 0x599   : > { %2701 = shalt.err (!%p2698_p3)
}
 0x59a   : > { %s2702_s14 = scalar_lea.hbm %s3928_s27, 2048  ;;  %s2706_s25 = scalar_lea.hbm %s4138_s3, 4096 }
 0x59b   : > { %p2703_p9 = scmp.ne.s32.totalorder %s3928_s27, %s2702_s14  ;;  %p2707_p11 = scmp.lt.u32.totalorder %s3928_s27, %s4138_s3 }
 0x59c   : > { %p2708_p10 = scmp.lt.u32.totalorder %s2706_s25, %s2702_s14  ;;  %p2710_p12 = scmp.lt.u32.totalorder %s2702_s14, %s3928_s27 }
 0x59d   : > { %p2704_p13 = pnand %p2703_p9, %p3291_p1 }
 0x59e   : > { %p2709_p2 = por %p2708_p10, %p2707_p11 }
 0x59f   : > { %p2705_p4 = pneg %p2704_p13 }
 0x5a0   : > { %p2711_p6 = por %p2710_p12, %p2709_p2 }
 0x5a2   : > { %p2712_p5 = pnand %p2711_p6, %p2705_p4 }
 0x5a4   : > { %2715 = shalt.err (!%p2712_p5)
}
 0x5a5   : > { %s2862_s11 = smov 128   ;;  %s2863_s7 = smov 8  }
 0x5a6   : > { %2301 = dma.vmem_to_hbm [thread:$0]  (%p3291_p1), %s3931_s1, 2048, %s3928_s27, %s3935_s5, %s2862_s11, %s2862_s11, %s2863_s7  }
 0x5a7 PF: > { %s4139_s4 = sld [smem:[#allocation27_spill]]  ;;  %p2333_p7 = scmp.ge.s32.totalorder %s2848_s24, 2 }
 0x5a8   : > { %p4140_p0 = scmp.ne.s32.totalorder %s4110_s26, 0 }
 0x5aa   : > { %p2325_p8 = pnand %p2333_p7, %p4140_p0 }
 0x5ad   : > { %s1695_s0 = sand.u32 1, %s4139_s4  }
 0x5ae   : > { %s1696_s17 = scalar_lea.sflag [#allocation9], %s1695_s0 }
 0x5af   : > { %2791 = dma.done.wait (!%p2325_p8), %s1696_s17, 2048  }
 0x5b0   : > { %2793 = vsyncadd (!%p2325_p8), %s1696_s17, 4294965248  ;;  %s39_s24 = sadd.s32 1, %s2848_s24   ;;  %s4142_s0 = sld [smem:[#allocation28_spill]] }
 0x5b1   : > { %p3964_p3 = scmp.ge.s32.totalorder %s39_s24, 6   ;;  %s4143_s1 = sld [smem:[#allocation29_spill]] }
 0x5b2   : > { %s4144_s14 = sld [smem:[#allocation30_spill]]  ;;  %s4145_s20 = sld [smem:[#allocation33_spill]] }
 0x5b3   : > { %s4146_s22 = sld [smem:[#allocation35_spill]]  ;;  %s4147_s29 = sld [smem:[#allocation36_spill]] }
 0x5b4   : > { %s4149_s13 = smov %s3284_s2  ;;  %s4150_s15 = smov %s2816_s16 }
 0x5b5   : > { %s4151_s16 = smov %s3111_s21  ;;  %s4152_s17 = smov %s2824_s18 }
 0x5b6   : > { %s4153_s18 = smov %s2828_s19  ;;  %s4154_s19 = smov %s3192_s28 }
 0x5b7   : > { %s4155_s21 = smov %s2844_s23  ;;  %38 = sbr.rel (!%p3964_p3) target bundleno = 40 (0x28), region = 145 }
 0x5b9   : > { %s4156_s23 = smov %s4147_s29 }
 0x5be   :  { %1701 = vsyncpa [#allocation8], 1 }
 0x5bf   :  { %1703 = vsyncpa [#allocation8 + $0x1], 1 }
 0x5c0   :  { %1704 = vsyncpa [#allocation11], 1 }
 0x5c1   :  { %1706 = vsyncpa [#allocation11 + $0x1], 1 }
 0x5c2   :  { %1707 = vsyncpa [#allocation14], 1 }
 0x5c3   :  { %1708 = vsyncpa [#allocation9], 1 }
 0x5c4   :  { %1710 = vsyncpa [#allocation9 + $0x1], 1 }

// kernel: tpu_custom_call.1
= control target key start
LH: loop header
LB: loop body
LE: loop exit
PB: predicated region body
PF: predicated region fallthrough
CT: control target
= control target key end

     0   :  { %s4011_s0 = inlined_call_operand.hbm [shape: s32[4], index: 0, kind: input, shape index: {}]   ;;  %s4012_s2 = inlined_call_operand.hbm [shape: f32[256,256], index: 2, kind: input, shape index: {}]   ;;  %s4013_s3 = inlined_call_operand.hbm [shape: f32[256,128], index: 3, kind: input, shape index: {}]   ;;  %s4014_s4 = inlined_call_operand.hbm [shape: f32[256,128], index: 4, kind: input, shape index: {}]   ;;  %s4015_s5 = inlined_call_operand.hbm [shape: f32[128,128], index: 5, kind: input, shape index: {}]   ;;  %s4016_s6 = inlined_call_operand.vmem [shape: f32[1,128], index: 6, kind: input, shape index: {}]   ;;  %s4017_s7 = inlined_call_operand.hbm [shape: f32[128,128], index: 7, kind: input, shape index: {}]   ;;  %s4018_s8 = inlined_call_operand.vmem [shape: f32[1,128], index: 8, kind: input, shape index: {}]   ;;  %s4019_s9 = inlined_call_operand.vmem [shape: f32[2,128], index: 9, kind: input, shape index: {}]   ;;  %s4020_s10 = inlined_call_operand.vmem [shape: f32[2,128], index: 10, kind: input, shape index: {}]   ;;  %s4021_s11 = inlined_call_operand.hbm [shape: f32[256,128], index: 11, kind: output, shape index: {}]   ;;  %s4022_s1 = inlined_call_operand.vmem [shape: s32[2], index: 1, kind: input, shape index: {}]  }
   0x1   :  { %4055 = sst [smem:[#allocation38_spill]] %s4012_s2  ;;  %s2520_s19 = scalar_lea.hbm %s4011_s0, 16 }
   0x2   :  { %4056 = sst [smem:[#allocation39_spill]] %s4013_s3  ;;  %p2521_p0 = scmp.ne.s32.totalorder %s4011_s0, %s2520_s19 }
   0x3   :  { %4057 = sst [smem:[#allocation40_spill]] %s4014_s4  ;;  %p2524_p1 = scmp.lt.u32.totalorder %s2520_s19, %s4011_s0 }
   0x4   :  { %4058 = sst [smem:[#allocation41_spill]] %s4015_s5 }
   0x5   :  { %4059 = sst [smem:[#allocation42_spill]] %s4016_s6  ;;  %p2526_p2 = pnand %p2524_p1, %p2521_p0 }
   0x6   :  { %4060 = sst [smem:[#allocation43_spill]] %s4017_s7 }
   0x7   :  { %4061 = sst [smem:[#allocation44_spill]] %s4018_s8 }
   0x8   :  { %4062 = sst [smem:[#allocation45_spill]] %s4019_s9 }
   0x9   :  { %4063 = sst [smem:[#allocation46_spill]] %s4020_s10 }
   0xa   :  { %4064 = sst [smem:[#allocation47_spill]] %s4021_s11 }
   0xb   :  { %2529 = shalt.err (!%p2526_p2)  }
   0xc   :  { %s2850_s24 = smov [#allocation5]   ;;  %s18_s29 = sshll.u32 %s4022_s1, 4  ;;  %s19_s29 = int_to_ptr.vmem [resolvable:$true] %s18_s29 }
   0xd   :  { %17 = dma.hbm_to_smem %s4011_s0, 16, %s2850_s24, [#allocation4] }
   0xe   :  { %s2530_s30 = scalar_lea.vmem %s19_s29, 16  ;;  %p2535_p4 = scmp.lt.s32.totalorder %s19_s29, %s19_s29 }
   0xf   :  { %p2531_p3 = scmp.ne.s32.totalorder %s19_s29, %s2530_s30  ;;  %p2536_p5 = scmp.lt.s32.totalorder %s2530_s30, %s2530_s30 }
  0x11   :  { %p2537_p6 = por %p2536_p5, %p2535_p4 }
  0x13   :  { %p2538_p7 = pnand %p2537_p6, %p2531_p3 }
  0x15   :  { %2541 = shalt.err (!%p2538_p7)  }
  0x16   :  { %s2851_s12 = smov [#allocation6]  }
  0x17   :  { %21 = dma.vmem_to_smem %s19_s29, 16, %s2851_s12, [#allocation4] }
  0x18   :  { %2772 = dma.done.wait [#allocation4], 32 }
  0x19   :  { %2773 = vsyncadd [#allocation4], 4294967264 }
  0x1a   :  { %23 = sfence }
  0x1b   :  { %24 = vsyncpa [#allocation8], 0 }
  0x1c   :  { %26 = vsyncpa [#allocation8 + $0x1], 0 }
  0x1d   :  { %27 = vsyncpa [#allocation11], 0 }
  0x1e   :  { %29 = vsyncpa [#allocation11 + $0x1], 0 }
  0x1f   :  { %30 = vsyncpa [#allocation14], 0 }
  0x20   :  { %31 = vsyncpa [#allocation9], 0 }
  0x21   :  { %33 = vsyncpa [#allocation9 + $0x1], 0  ;;  %s2939_s0 = smov 0   ;;  %s2941_s1 = smov 0  }
  0x22   :  { %s2943_s13 = smov 0   ;;  %s2945_s14 = smov 0  }
  0x23   :  { %s2947_s15 = smov 0   ;;  %s2949_s16 = smov 0  }
  0x24   :  { %s2951_s17 = smov 0   ;;  %s2953_s18 = smov 0  }
  0x25   :  { %s2955_s19 = smov 0   ;;  %s2957_s20 = smov 0  }
  0x26   :  { %s2959_s21 = smov 0   ;;  %s2961_s22 = smov 0  }
  0x27   :  { %s2963_s23 = smov 0   ;;  %s2965_s24 = smov 0  }
  0x28 LB: > { %4065 = sst [smem:[#allocation27_spill]] %s2796_s0  ;;  %s3010_s25 = sadd.s32 4294967295, %s2848_s24   ;;  %s2848_s24 = sphi %s2965_s24, %s39_s24   ;;  %s2844_s23 = sphi %s2963_s23, %s4156_s23   ;;  %s2840_s22 = sphi %s2961_s22, %s4146_s22   ;;  %s2836_s21 = sphi %s2959_s21, %s4155_s21   ;;  %s2832_s20 = sphi %s2957_s20, %s4145_s20   ;;  %s2828_s19 = sphi %s2955_s19, %s4154_s19   ;;  %s2824_s18 = sphi %s2953_s18, %s4153_s18   ;;  %s2820_s17 = sphi %s2951_s17, %s4152_s17   ;;  %s2816_s16 = sphi %s2949_s16, %s4151_s16   ;;  %s2812_s15 = sphi %s2947_s15, %s4150_s15   ;;  %s2808_s14 = sphi %s2945_s14, %s4144_s14   ;;  %s2804_s13 = sphi %s2943_s13, %s4149_s13   ;;  %s2800_s1 = sphi %s2941_s1, %s4143_s1   ;;  %s2796_s0 = sphi %s2939_s0, %s4142_s0  }
  0x29   : > { %4066 = sst [smem:[#allocation28_spill]] %s2800_s1  ;;  %p1834_p8 = scmp.ge.s32.totalorder %s2848_s24, 1 }
  0x2a   : > { %4067 = sst [smem:[#allocation29_spill]] %s2804_s13  ;;  %p4026_p9 = scmp.eq.s32.totalorder %s3010_s25, 0 }
  0x2b   : > { %4068 = sst [smem:[#allocation30_spill]] %s2812_s15  ;;  %p300_p11 = scmp.lt.s32.totalorder %s2848_s24, 5 }
  0x2c   : > { %4069 = sst [smem:[#allocation31_spill]] %s2832_s20  ;;  %s2852_s27 = smov [#allocation13]  }
  0x2d   : > { %4070 = sst [smem:[#allocation32_spill]] %s2836_s21  ;;  %p3016_p12 = pnand %p1834_p8, %p300_p11 }
  0x2e   : > { %4071 = sst [smem:[#allocation33_spill]] %s2840_s22  ;;  %s312_s28 = sshll.u32 %s2852_s27, 4  ;;  %s313_s28 = int_to_ptr.vmem [resolvable:$true] %s312_s28 }
  0x2f   : > { %s4072_s26 = scalar_select %p3016_p12, 1, 0 }
  0x30   : > { %p2303_p13 = pneg %p3016_p12  ;;  %s4075_s5 = sld [smem:[#allocation41_spill]] }
  0x31   : > { %4073 = sst [smem:[#allocation34_spill]] %s4072_s26 }
  0x32   : > { %p3024_p0 = pnand %p2303_p13, %p4026_p9 }
  0x34   : > { %p2544_p2 = pneg %p3024_p0 }
  0x36   : > { %s2542_s11 = scalar_lea.hbm %s4075_s5, 2048 }
  0x37   : > { %p2543_p1 = scmp.ne.s32.totalorder %s4075_s5, %s2542_s11  ;;  %p2549_p5 = scmp.lt.u32.totalorder %s2542_s11, %s4075_s5 }
  0x39   : > { %p2545_p3 = pnand %p2544_p2, %p2543_p1 }
  0x3b   : > { %p2546_p4 = pneg %p2545_p3 }
  0x3d   : > { %p2551_p6 = pnand %p2549_p5, %p2546_p4 }
  0x3f   : > { %2554 = shalt.err (!%p2551_p6)
}
  0x40   : > { %s2555_s30 = scalar_lea.vmem %s313_s28, 2048  ;;  %p2563_p13 = scmp.lt.s32.totalorder %s313_s28, %s313_s28 }
  0x41   : > { %p2556_p7 = scmp.ne.s32.totalorder %s313_s28, %s2555_s30  ;;  %p2564_p10 = scmp.lt.s32.totalorder %s2555_s30, %s2555_s30 }
  0x43   : > { %p2558_p8 = pnand %p2556_p7, %p2544_p2  ;;  %p2565_p9 = por %p2564_p10, %p2563_p13 }
  0x45   : > { %p2559_p11 = pneg %p2558_p8 }
  0x47   : > { %p2566_p12 = pnand %p2565_p9, %p2559_p11 }
  0x49   : > { %2569 = shalt.err (!%p2566_p12)
}
  0x4a   : > { %s4028_s9 = smov 128   ;;  %s4030_s8 = smov 8  }
  0x4b   : > { %2306 = dma.hbm_to_vmem [thread:$0]  (!%p3024_p0), %s4075_s5, 2048, %s313_s28, [#allocation14], %s4028_s9, %s4028_s9, %s4030_s8  }
  0x4c   : > { %s48_s12 = sadd.s32 1, %s2840_s22  ;;  %s51_s27 = sadd.s32 1, %s2844_s23 }
  0x4d   : > { %p49_p9 = scmp.ge.s32.totalorder %s48_s12, 2  ;;  %s1830_s30 = sshll.u32 %s2844_s23, 1 }
  0x4e   : > { %s3057_s6 = sadd.s32 %s2840_s22, %s1830_s30  ;;  %p4045_p10 = scmp.eq.s32.totalorder %s2848_s24, 0 }
  0x4f   : > { %s4158_s12 = smov (%p49_p9, %s48_s12), 0  ;;  %s4160_s27 = smov (!%p49_p9, %s51_s27), %s2844_s23 }
  0x50   : > { %4076 = sst [smem:[#allocation35_spill]] %s4158_s12  ;;  %p53_p12 = scmp.ge.s32.totalorder %s4160_s27, 2 }
  0x51   : > { %s3064_s10 = sld [smem:[#allocation5 + %s3057_s6]]  ;;  %s98_s11 = sadd.s32 1, %s2816_s16 }
  0x52   : > { %s91_s28 = sld [smem:[#allocation5 + %s3057_s6]]  ;;  %p105_p1 = scmp.ne.s32.totalorder %s2816_s16, %s2812_s15 }
  0x53   : > { %p111_p3 = scmp.ne.s32.totalorder %s2812_s15, %s2808_s14  ;;  %s4162_s27 = smov (%p53_p12, %s4160_s27), 0 }
  0x54   : > { %4077 = sst [smem:[#allocation36_spill]] %s4162_s27  ;;  %p3076_p4 = por %p105_p1, %p4045_p10 }
  0x55   : > { %p4079_p5 = scmp.eq.s32.totalorder %s3010_s25, 0  ;;  %s1831_s8 = sshll.u32 %s4162_s27, 1 }
  0x56   : > { %p4044_p7 = scmp.lt.s32.totalorder %s2848_s24, 4  ;;  %s59_s14 = sadd.s32 %s1831_s8, %s4158_s12 }
  0x57   : > { %p3082_p6 = por %p111_p3, %p4079_p5  ;;  %s3090_s22 = sld [smem:[#allocation5 + %s59_s14]] }
  0x58   : > { %s94_s20 = sld [smem:[#allocation5 + %s59_s14]]  ;;  %s379_s21 = sand.u32 1, %s2816_s16  }
  0x59   : > { %s4080_s9 = scalar_select %p3082_p6, 1, 0 }
  0x5a   : > { %s1843_s15 = sshll.u32 %s379_s21, 7  ;;  %p3097_p8 = pnand %p4044_p7, %p3076_p4 }
  0x5b   : > { %4081 = sst [smem:[#allocation37_spill]] %s4080_s9  ;;  %s381_s8 = scalar_lea.vmem [#allocation10], %s1843_s15 }
  0x5c   : > { %s4082_s26 = scalar_select %p3097_p8, 1, 0 }
  0x5d   : > { %s2290_s9 = scalar_select %p3076_p4, [#allocation5], [#allocation18] }
  0x5e   : > { %s2291_s4 = scalar_select %p3076_p4, %s3057_s6, 0 }
  0x5f   : > { %s95_s2 = ssub.s32 %s91_s28, %s94_s20  ;;  %s391_s12 = sshll.u32 %s381_s8, 4  ;;  %s3106_s12 = int_to_ptr.vmem [resolvable:$true] %s391_s12 }
  0x60   : > { %p96_p11 = scmp.eq.s32.totalorder %s95_s2, 0  ;;  %s4164_s9 = smov (!%p4044_p7, %s2290_s9), [#allocation20] }
  0x61   : > { %s4166_s4 = smov (!%p4044_p7, %s2291_s4), 0  ;;  %s2855_s14 = smov [#allocation15]  }
  0x62   : > { %s3111_s21 = scalar_select %p96_p11, %s2816_s16, %s98_s11  }
  0x63   : > { %s328_s5 = sshll.u32 %s2855_s14, 4  ;;  %s384_s0 = sld [smem:[%s4164_s9 + %s4166_s4]]  ;;  %s329_s5 = int_to_ptr.vmem [resolvable:$true] %s328_s5 }
  0x64   : > { %s4083_s7 = sld [smem:[#allocation43_spill]] }
  0x6a   : > { %s2570_s13 = scalar_lea.hbm %s4083_s7, 2048 }
  0x6b   : > { %p2571_p13 = scmp.ne.s32.totalorder %s4083_s7, %s2570_s13  ;;  %p2577_p1 = scmp.lt.u32.totalorder %s2570_s13, %s4083_s7 }
  0x6d   : > { %p2573_p9 = pnand %p2571_p13, %p2544_p2 }
  0x6f   : > { %p2574_p12 = pneg %p2573_p9 }
  0x71   : > { %p2579_p3 = pnand %p2577_p1, %p2574_p12 }
  0x73   : > { %2582 = shalt.err (!%p2579_p3)
}
  0x74   : > { %s2583_s4 = scalar_lea.vmem %s329_s5, 2048  ;;  %p2591_p7 = scmp.lt.s32.totalorder %s329_s5, %s329_s5 }
  0x75   : > { %p2584_p4 = scmp.ne.s32.totalorder %s329_s5, %s2583_s4  ;;  %p2592_p10 = scmp.lt.s32.totalorder %s2583_s4, %s2583_s4 }
  0x77   : > { %p2586_p5 = pnand %p2584_p4, %p2544_p2  ;;  %p2593_p6 = por %p2592_p10, %p2591_p7 }
  0x79   : > { %p2587_p11 = pneg %p2586_p5 }
  0x7b   : > { %p2594_p8 = pnand %p2593_p6, %p2587_p11 }
  0x7d   : > { %2597 = shalt.err (!%p2594_p8)
}
  0x7e   : > { %s4084_s1 = smov 8   ;;  %s4085_s9 = smov 128  }
  0x7f   : > { %2309 = dma.hbm_to_vmem [thread:$0]  (!%p3024_p0), %s4083_s7, 2048, %s329_s5, [#allocation14], %s4085_s9, %s4085_s9, %s4084_s1  }
  0x80   : > { %s3140_s8 = ssub.s32 %s2844_s23, %s4162_s27  ;;  %s62_s14 = ssub.s32 %s3064_s10, %s3090_s22 }
  0x81   : > { %s1872_s30 = sshll.u32 %s384_s0, 11  ;;  %s3145_s29 = sor.u32 %s62_s14, %s3140_s8 }
  0x82   : > { %s4086_s3 = sld [smem:[#allocation39_spill]]  ;;  %p64_p2 = scmp.eq.s32.totalorder %s3145_s29, 0 }
  0x83   : > { %s4087_s28 = sand.u32 1, %s2848_s24   ;;  %p4088_p10 = scmp.ne.s32.totalorder %s4082_s26, 0 }
  0x84   : > { %s3155_s5 = scalar_lea.sflag [#allocation11], %s4087_s28 }
  0x85   : > { %p2600_p6 = pneg %p4088_p10 }
  0x88   : > { %s3150_s2 = scalar_lea.hbm %s4086_s3, %s1872_s30  ;;  %s2603_s10 = scalar_lea.hbm %s4086_s3, 4096 }
  0x89   : > { %s2598_s4 = scalar_lea.hbm %s3150_s2, 2048  ;;  %p2604_p13 = scmp.lt.u32.totalorder %s3150_s2, %s4086_s3 }
  0x8a   : > { %p2599_p0 = scmp.ne.s32.totalorder %s3150_s2, %s2598_s4  ;;  %p2605_p9 = scmp.lt.u32.totalorder %s2603_s10, %s2598_s4 }
  0x8b   : > { %p2607_p1 = scmp.lt.u32.totalorder %s2598_s4, %s3150_s2 }
  0x8c   : > { %p2601_p7 = pnand %p2600_p6, %p2599_p0  ;;  %p2606_p12 = por %p2605_p9, %p2604_p13 }
  0x8e   : > { %p2602_p8 = pneg %p2601_p7  ;;  %p2608_p3 = por %p2607_p1, %p2606_p12 }
  0x90   : > { %p2609_p4 = pnand %p2608_p3, %p2602_p8 }
  0x92   : > { %2612 = shalt.err (!%p2609_p4)
}
  0x93   : > { %s2613_s14 = scalar_lea.vmem %s3106_s12, 2048  ;;  %s2856_s30 = smov [#allocation10]  }
  0x94   : > { %p2614_p5 = scmp.ne.s32.totalorder %s3106_s12, %s2613_s14  ;;  %s2618_s20 = sshll.u32 %s2856_s30, 4  ;;  %s2619_s20 = int_to_ptr.vmem [resolvable:$false] %s2618_s20 }
  0x95   : > { %s2620_s15 = scalar_lea.vmem %s2619_s20, 4096  ;;  %p2621_p7 = scmp.lt.s32.totalorder %s3106_s12, %s2619_s20 }
  0x96   : > { %p2616_p11 = pnand %p2614_p5, %p2600_p6  ;;  %p2622_p13 = scmp.lt.s32.totalorder %s2620_s15, %s2613_s14 }
  0x98   : > { %p2617_p0 = pneg %p2616_p11  ;;  %p2623_p9 = por %p2622_p13, %p2621_p7 }
  0x9a   : > { %p2624_p12 = pnand %p2623_p9, %p2617_p0 }
  0x9c   : > { %2627 = shalt.err (!%p2624_p12)
}
  0x9d   : > { %2320 = dma.hbm_to_vmem [thread:$0]  (!%p4088_p10), %s3150_s2, 2048, %s3106_s12, %s3155_s5, %s4085_s9, %s4085_s9, %s4084_s1  }
  0x9e   : > { %s66_s26 = sadd.s32 1, %s2828_s19  ;;  %p73_p6 = scmp.ne.s32.totalorder %s2828_s19, %s2824_s18 }
  0x9f   : > { %s3192_s28 = scalar_select %p64_p2, %s2828_s19, %s66_s26  }
  0xa0   : > { %p4089_p8 = scmp.eq.s32.totalorder %s2848_s24, 0  ;;  %p79_p3 = scmp.ne.s32.totalorder %s2824_s18, %s2820_s17 }
  0xa1   : > { %s4090_s4 = sld [smem:[#allocation29_spill]]  ;;  %s351_s0 = sand.u32 1, %s2828_s19  }
  0xa2   : > { %p75_p1 = por %p4089_p8, %p73_p6  ;;  %s4091_s22 = sld [smem:[#allocation28_spill]] }
  0xa3   : > { %s1871_s10 = sshll.u32 %s2844_s23, 5  ;;  %p4092_p4 = scmp.eq.s32.totalorder %s3010_s25, 0 }
  0xa4   : > { %s4094_s12 = sld [smem:[#allocation27_spill]]  ;;  %s1838_s29 = sshll.u32 %s351_s0, 7 }
  0xa5   : > { %p3202_p5 = por %p4092_p4, %p79_p3  ;;  %p4095_p2 = scmp.lt.s32.totalorder %s2848_s24, 4 }
  0xa6   : > { %s2287_s17 = scalar_select %p75_p1, [#allocation5], [#allocation17] }
  0xa7   : > { %s4093_s13 = scalar_select %p3202_p5, 1, 0 }
  0xa8   : > { %p3208_p10 = pnand %p4095_p2, %p75_p1  ;;  %s4168_s6 = smov (!%p75_p1, %s3057_s6), 0 }
  0xa9   : > { %p4097_p11 = pmov %p4095_p2  ;;  %p4098_p0 = pmov %p4095_p2 }
  0xaa   : > { %s355_s11 = scalar_lea.vmem [#allocation7], %s1838_s29  ;;  %s124_s15 = sadd.s32 1, %s4090_s4 }
  0xab   : > { %s4170_s17 = smov (!%p4097_p11, %s2287_s17), [#allocation19]  ;;  %s4172_s6 = smov (!%p4098_p0, %s4168_s6), 0 }
  0xac   : > { %s367_s14 = sshll.u32 %s355_s11, 4  ;;  %s358_s30 = sld [smem:[%s4170_s17 + %s4172_s6]]  ;;  %s3217_s14 = int_to_ptr.vmem [resolvable:$true] %s367_s14 }
  0xad   : > { %p4050_p13 = scmp.ne.s32.totalorder %s4090_s4, %s4091_s22  ;;  %p4049_p9 = scmp.ne.s32.totalorder %s4091_s22, %s4094_s12 }
  0xae   : > { %p4099_p12 = pmov %p4089_p8  ;;  %s4101_s27 = sld [smem:[#allocation38_spill]] }
  0xaf   : > { %p4102_p8 = pmov %p4092_p4  ;;  %s3249_s17 = scalar_lea.sflag [#allocation8], %s351_s0 }
  0xb0   : > { %p3231_p6 = por %p4050_p13, %p4099_p12  ;;  %p2630_p4 = pneg %p3208_p10 }
  0xb1   : > { %p3245_p1 = por %p4049_p9, %p4102_p8 }
  0xb2   : > { %s364_s26 = sadd.s32 %s1871_s10, %s358_s30 }
  0xb3   : > { %s1842_s3 = sshll.u32 %s364_s26, 7 }
  0xb4   : > { %s3238_s6 = scalar_lea.hbm %s4101_s27, %s1842_s3  ;;  %s2633_s29 = scalar_lea.hbm %s4101_s27, 8192 }
  0xb5   : > { %s4103_s10 = scalar_select %p3245_p1, 1, 0 }
  0xb6   : > { %s2628_s30 = scalar_lea.hbm %s3238_s6, 2048  ;;  %p2634_p0 = scmp.lt.u32.totalorder %s3238_s6, %s4101_s27 }
  0xb7   : > { %p2629_p3 = scmp.ne.s32.totalorder %s3238_s6, %s2628_s30  ;;  %p2635_p12 = scmp.lt.u32.totalorder %s2633_s29, %s2628_s30 }
  0xb8   : > { %p2637_p9 = scmp.lt.u32.totalorder %s2628_s30, %s3238_s6 }
  0xb9   : > { %p2631_p2 = pnand %p2630_p4, %p2629_p3  ;;  %p2636_p8 = por %p2635_p12, %p2634_p0 }
  0xbb   : > { %p2632_p11 = pneg %p2631_p2  ;;  %p2638_p13 = por %p2637_p9, %p2636_p8 }
  0xbd   : > { %p2639_p7 = pnand %p2638_p13, %p2632_p11 }
  0xbf   : > { %2642 = shalt.err (!%p2639_p7)
}
  0xc0   : > { %s2643_s0 = scalar_lea.vmem %s3217_s14, 2048  ;;  %s2857_s3 = smov [#allocation7]  }
  0xc1   : > { %p2644_p3 = scmp.ne.s32.totalorder %s3217_s14, %s2643_s0  ;;  %s2648_s26 = sshll.u32 %s2857_s3, 4  ;;  %s2649_s26 = int_to_ptr.vmem [resolvable:$false] %s2648_s26 }
  0xc2   : > { %s2650_s20 = scalar_lea.vmem %s2649_s26, 4096  ;;  %p2651_p5 = scmp.lt.s32.totalorder %s3217_s14, %s2649_s26 }
  0xc3   : > { %p2646_p2 = pnand %p2644_p3, %p2630_p4  ;;  %p2652_p0 = scmp.lt.s32.totalorder %s2650_s20, %s2643_s0 }
  0xc5   : > { %p2647_p1 = pneg %p2646_p2  ;;  %p2653_p12 = por %p2652_p0, %p2651_p5 }
  0xc7   : > { %p2654_p9 = pnand %p2653_p12, %p2647_p1 }
  0xc9   : > { %2657 = shalt.err (!%p2654_p9)
}
  0xca   : > { %s2858_s30 = smov 256   ;;  %p4104_p5 = scmp.eq.s32.totalorder %s3140_s8, 0 }
  0xcb   : > { %2315 = dma.hbm_to_vmem [thread:$0]  (!%p3208_p10), %s3238_s6, 2048, %s3217_s14, %s3249_s17, %s2858_s30, %s4085_s9, %s4084_s1  }
  0xcc   : > { %s3284_s2 = scalar_select %p4104_p5, %s4090_s4, %s124_s15  }
  0xcd   : > { %p4105_p7 = scmp.ne.s32.totalorder %s4090_s4, %s4091_s22  ;;  %p4106_p13 = scmp.eq.s32.totalorder %s3010_s25, 3 }
  0xce   : > { %s4108_s11 = sadd.s32 4294967294, %s2848_s24   ;;  %s403_s0 = sand.u32 1, %s4090_s4  }
  0xcf   : > { %p3291_p1 = por %p4106_p13, %p4105_p7  ;;  %p293_p4 = scmp.eq.s32.totalorder %s4108_s11, 3 }
  0xd0   : > { %s1873_s3 = sshll.u32 %s2844_s23, 11  ;;  %p4109_p11 = scmp.ne.s32.totalorder %s4091_s22, %s4094_s12 }
  0xd1   : > { %s1847_s14 = sshll.u32 %s403_s0, 7  ;;  %s4111_s15 = sld [smem:[#allocation40_spill]] }
  0xd2   : > { %p3302_p8 = por %p293_p4, %p4109_p11  ;;  %s405_s20 = scalar_lea.vmem [#allocation12], %s1847_s14 }
  0xd3   : > { %s412_s27 = sshll.u32 %s405_s20, 4  ;;  %p4113_p10 = scmp.lt.s32.totalorder %s2848_s24, 4  ;;  %s3319_s27 = int_to_ptr.vmem [resolvable:$true] %s412_s27 }
  0xd4   : > { %s4110_s26 = scalar_select %p3302_p8, 1, 0 }
  0xd5   : > { %p3315_p3 = pnand %p4113_p10, %p3231_p6 }
  0xd7   : > { %s4112_s30 = smov %s4111_s15  ;;  %s3309_s17 = scalar_lea.hbm %s4111_s15, %s1873_s3 }
  0xd8   : > { %s2658_s22 = scalar_lea.hbm %s3309_s17, 2048  ;;  %p2660_p0 = pneg %p3315_p3 }
  0xd9   : > { %p2659_p2 = scmp.ne.s32.totalorder %s3309_s17, %s2658_s22  ;;  %s2663_s7 = scalar_lea.hbm %s4112_s30, 4096 }
  0xda   : > { %p2664_p6 = scmp.lt.u32.totalorder %s3309_s17, %s4112_s30  ;;  %p2665_p5 = scmp.lt.u32.totalorder %s2663_s7, %s2658_s22 }
  0xdb   : > { %p2661_p12 = pnand %p2660_p0, %p2659_p2  ;;  %p2667_p13 = scmp.lt.u32.totalorder %s2658_s22, %s3309_s17 }
  0xdc   : > { %p2666_p7 = por %p2665_p5, %p2664_p6 }
  0xdd   : > { %p2662_p9 = pneg %p2661_p12 }
  0xde   : > { %p2668_p4 = por %p2667_p13, %p2666_p7 }
  0xe0   : > { %p2669_p11 = pnand %p2668_p4, %p2662_p9 }
  0xe2   : > { %2672 = shalt.err (!%p2669_p11)
}
  0xe3   : > { %s2673_s14 = scalar_lea.vmem %s3319_s27, 2048  ;;  %s2859_s6 = smov [#allocation12]  }
  0xe4   : > { %p2674_p10 = scmp.ne.s32.totalorder %s3319_s27, %s2673_s14  ;;  %s2678_s8 = sshll.u32 %s2859_s6, 4  ;;  %s2679_s8 = int_to_ptr.vmem [resolvable:$false] %s2678_s8 }
  0xe5   : > { %s2680_s15 = scalar_lea.vmem %s2679_s8, 4096  ;;  %p2681_p8 = scmp.lt.s32.totalorder %s3319_s27, %s2679_s8 }
  0xe6   : > { %p2676_p2 = pnand %p2674_p10, %p2660_p0  ;;  %p2682_p6 = scmp.lt.s32.totalorder %s2680_s15, %s2673_s14 }
  0xe8   : > { %p2677_p12 = pneg %p2676_p2  ;;  %p2683_p5 = por %p2682_p6, %p2681_p8 }
  0xea   : > { %p2684_p7 = pnand %p2683_p5, %p2677_p12 }
  0xec   : > { %2687 = shalt.err (!%p2684_p7)
}
  0xed   : > { %2323 = dma.hbm_to_vmem [thread:$0]  (!%p3315_p3), %s3309_s17, 2048, %s3319_s27, %s3155_s5, %s4085_s9, %s4085_s9, %s4084_s1  }
  0xee   : > { %s4115_s20 = sld [smem:[#allocation34_spill]] }
  0xf4   : > { %p4116_p0 = scmp.ne.s32.totalorder %s4115_s20, 0 }
  0xf5   : > { %s426_s22 = sand.u32 (!%p4116_p0), 1, %s2824_s18   ;;  %p4117_p8 = scmp.ne.s32.totalorder (!%p4116_p0), %s4093_s13, 0 }
  0xf6   : > { %424 = sbr.rel (%p4116_p0) target bundleno = 1447 (0x5a7), region = 56  ;;  %s1851_s12 = sshll.u32 (!%p4116_p0), %s426_s22, 7 }
  0xf7   : > { %s427_s11 = scalar_lea.sflag (!%p4116_p0), [#allocation8], %s426_s22  ;;  %s3353_s7 = scalar_lea.vmem (!%p4116_p0), [#allocation7], %s1851_s12 }
  0xfd   : > { %2775 = dma.done.wait (%p4117_p8), %s427_s11, 2048  }
  0xfe   : > { %2777 = vsyncadd (%p4117_p8), %s427_s11, 4294965248  ;;  %s4118_s4 = sld [smem:[#allocation30_spill]]  ;;  %s435_s3 = sand.u32 1, %s3010_s25  }
  0xff   : > { %s4119_s0 = sld [smem:[#allocation37_spill]]  ;;  %s436_s9 = scalar_lea.sflag [#allocation11], %s435_s3 }
 0x104   : > { %s437_s27 = sand.u32 1, %s4118_s4  }
 0x105   : > { %s1852_s1 = sshll.u32 %s437_s27, 7  ;;  %p4120_p3 = scmp.ne.s32.totalorder %s4119_s0, 0 }
 0x106   : > { %s3361_s5 = scalar_lea.vmem [#allocation10], %s1852_s1 }
 0x107   : > { %2779 = dma.done.wait (%p4120_p3), %s436_s9, 2048  }
 0x108   : > { %2781 = vsyncadd (%p4120_p3), %s436_s9, 4294965248  ;;  %s4121_s17 = sld [smem:[#allocation28_spill]]  ;;  %p4122_p9 = scmp.ne.s32.totalorder %s4103_s10, 0 }
 0x10e   : > { %s446_s14 = sand.u32 1, %s4121_s17  }
 0x10f   : > { %s1853_s13 = sshll.u32 %s446_s14, 7 }
 0x110   : > { %s3370_s6 = scalar_lea.vmem [#allocation12], %s1853_s13 }
 0x111   : > { %2783 = dma.done.wait (%p4122_p9), %s436_s9, 2048  }
 0x112   : > { %2785 = vsyncadd (%p4122_p9), %s436_s9, 4294965248  ;;  %p4123_p13 = scmp.eq.s32.totalorder %s3010_s25, 0 }
 0x114   : > { %2787 = dma.done.wait (%p4123_p13), [#allocation14], 4096   ;;  %p4124_p4 = pmov %p4123_p13 }
 0x115   : > { %s4125_s8 = sld [smem:[#allocation32_spill]]  ;;  %s3383_s20 = scalar_lea.vmem [#allocation16], %s1853_s13 }
 0x116   : > { %2789 = vsyncadd (%p4124_p4), [#allocation14], 4294963200  ;;  %s4126_s22 = sld [smem:[#allocation31_spill]] }
 0x11b   : > { %s3381_s15 = sld [smem:[#allocation6 + %s4125_s8]] }
 0x11c   : > { %p1857_p11 = scmp.ne.s32.totalorder %s4126_s22, 0 }
 0x11d   : > { %v548_v0 = vld [vmem:[#allocation13] sm:$0xff] (!%p1857_p11)  ;;  %v549_v1 = vld [vmem:[#allocation13 + $0x8] sm:$0xff] (!%p1857_p11)  ;;  %v550_v2 = vld [vmem:[#allocation13 + $0x10] sm:$0xff] (!%p1857_p11)  ;;  %v2860_v3 = vmov (!%p1857_p11), 0.0   ;;  %s4127_s12 = sld [smem:[#allocation42_spill]] (!%p1857_p11) }
 0x11e   : > { %515 = sbr.rel (%p1857_p11) target bundleno = 550 (0x226), region = 80  ;;  %516 = vst [vmem:[#allocation2] sm:$0xff] (!%p1857_p11), %v2860_v3  ;;  %517 = vst [vmem:[#allocation2 + $0x8] sm:$0xff] (!%p1857_p11), %v2860_v3  ;;  %v2139_v4 = vpack.c.bf16 (!%p1857_p11), %v549_v1, %v548_v0  ;;  %v551_v5 = vld [vmem:[#allocation13 + $0x18] sm:$0xff] (!%p1857_p11)  ;;  %v552_v7 = vld [vmem:[#allocation13 + $0x20] sm:$0xff] (!%p1857_p11) }
 0x11f   : > { %518 = vst [vmem:[#allocation2 + $0x10] sm:$0xff] (!%p1857_p11), %v2860_v3  ;;  %519 = vst [vmem:[#allocation2 + $0x18] sm:$0xff] (!%p1857_p11), %v2860_v3  ;;  %v2143_v6 = vpack.c.bf16 (!%p1857_p11), %v551_v5, %v550_v2  ;;  %v553_v8 = vld [vmem:[#allocation13 + $0x28] sm:$0xff] (!%p1857_p11)  ;;  %v532_v10 = vld [vmem:[%s3370_s6] sm:$0xff] (!%p1857_p11) }
 0x120   : > { %520 = vst [vmem:[#allocation2 + $0x20] sm:$0xff] (!%p1857_p11), %v2860_v3  ;;  %521 = vst [vmem:[#allocation2 + $0x28] sm:$0xff] (!%p1857_p11), %v2860_v3  ;;  %2140 = vmatprep.subr.bf16.mxu0 (!%p1857_p11), %v2139_v4  ;;  %2235 = vmatprep.subr.bf16.mxu1 (!%p1857_p11), %v2139_v4  ;;  %v2147_v9 = vpack.c.bf16 (!%p1857_p11), %v553_v8, %v552_v7  ;;  %v540_v11 = vld [vmem:[%s3370_s6 + $0x40] sm:$0xff] (!%p1857_p11)  ;;  %v554_v12 = vld [vmem:[#allocation13 + $0x30] sm:$0xff] (!%p1857_p11) }
 0x121   : > { %522 = vst [vmem:[#allocation2 + $0x30] sm:$0xff] (!%p1857_p11), %v2860_v3  ;;  %523 = vst [vmem:[#allocation2 + $0x38] sm:$0xff] (!%p1857_p11), %v2860_v3  ;;  %2142 = vmatpush3.bf16.msra.mxu0 (!%p1857_p11), %v2139_v4  ;;  %2243 = vmatpush3.bf16.msra.mxu1 (!%p1857_p11), %v2139_v4  ;;  %v555_v13 = vld [vmem:[#allocation13 + $0x38] sm:$0xff] (!%p1857_p11)  ;;  %v556_v15 = vld [vmem:[#allocation13 + $0x40] sm:$0xff] (!%p1857_p11) }
 0x122   : > { %524 = vst [vmem:[#allocation2 + $0x40] sm:$0xff] (!%p1857_p11), %v2860_v3  ;;  %525 = vst [vmem:[#allocation2 + $0x48] sm:$0xff] (!%p1857_p11), %v2860_v3  ;;  %2144 = vmatprep.subr.bf16.mxu0 (!%p1857_p11), %v2143_v6  ;;  %2236 = vmatprep.subr.bf16.mxu1 (!%p1857_p11), %v2143_v6  ;;  %v2151_v14 = vpack.c.bf16 (!%p1857_p11), %v555_v13, %v554_v12  ;;  %v557_v16 = vld [vmem:[#allocation13 + $0x48] sm:$0xff] (!%p1857_p11)  ;;  %v558_v18 = vld [vmem:[#allocation13 + $0x50] sm:$0xff] (!%p1857_p11) }
 0x123   : > { %526 = vst [vmem:[#allocation2 + $0x50] sm:$0xff] (!%p1857_p11), %v2860_v3  ;;  %527 = vst [vmem:[#allocation2 + $0x58] sm:$0xff] (!%p1857_p11), %v2860_v3  ;;  %2003 = vmatprep.mubr.f32.mxu0 (!%p1857_p11), %v532_v10  ;;  %2015 = vmatprep.mubr.f32.mxu1 (!%p1857_p11), %v540_v11  ;;  %v2155_v17 = vpack.c.bf16 (!%p1857_p11), %v557_v16, %v556_v15  ;;  %v559_v19 = vld [vmem:[#allocation13 + $0x58] sm:$0xff] (!%p1857_p11)  ;;  %v560_v21 = vld [vmem:[#allocation13 + $0x60] sm:$0xff] (!%p1857_p11) }
 0x124   : > { %528 = vst [vmem:[#allocation2 + $0x60] sm:$0xff] (!%p1857_p11), %v2860_v3  ;;  %529 = vst [vmem:[#allocation2 + $0x68] sm:$0xff] (!%p1857_p11), %v2860_v3  ;;  %v2159_v20 = vpack.c.bf16 (!%p1857_p11), %v559_v19, %v558_v18  ;;  %v561_v22 = vld [vmem:[#allocation13 + $0x68] sm:$0xff] (!%p1857_p11)  ;;  %v562_v24 = vld [vmem:[#allocation13 + $0x70] sm:$0xff] (!%p1857_p11) }
 0x125   : > { %530 = vst [vmem:[#allocation2 + $0x70] sm:$0xff] %v2860_v3  ;;  %531 = vst [vmem:[#allocation2 + $0x78] sm:$0xff] %v2860_v3  ;;  %2146 = vmatpush3.bf16.msra.mxu0 %v2143_v6  ;;  %2244 = vmatpush3.bf16.msra.mxu1 %v2143_v6  ;;  %v2163_v23 = vpack.c.bf16 %v561_v22, %v560_v21  ;;  %v563_v25 = vld [vmem:[#allocation13 + $0x78] sm:$0xff]  ;;  %v533_v27 = vld [vmem:[%s3370_s6 + $0x8] sm:$0xff] }
 0x126   : > { %2148 = vmatprep.subr.bf16.mxu0 %v2147_v9  ;;  %2237 = vmatprep.subr.bf16.mxu1 %v2147_v9  ;;  %v2167_v26 = vpack.c.bf16 %v563_v25, %v562_v24  ;;  %v541_v28 = vld [vmem:[%s3370_s6 + $0x48] sm:$0xff]  ;;  %v534_v29 = vld [vmem:[%s3370_s6 + $0x10] sm:$0xff]  ;;  %v535_v31 = vld [vmem:[%s3370_s6 + $0x18] sm:$0xff] }
 0x127   : > { %v542_v30 = vld [vmem:[%s3370_s6 + $0x50] sm:$0xff]  ;;  %v543_v32 = vld [vmem:[%s3370_s6 + $0x58] sm:$0xff]  ;;  %v536_v33 = vld [vmem:[%s3370_s6 + $0x20] sm:$0xff] }
 0x128   : > { %v544_v34 = vld [vmem:[%s3370_s6 + $0x60] sm:$0xff]  ;;  %v537_v35 = vld [vmem:[%s3370_s6 + $0x28] sm:$0xff]  ;;  %v538_v37 = vld [vmem:[%s3370_s6 + $0x30] sm:$0xff] }
 0x129   : > { %2150 = vmatpush3.bf16.msra.mxu0 %v2147_v9  ;;  %2245 = vmatpush3.bf16.msra.mxu1 %v2147_v9  ;;  %v545_v36 = vld [vmem:[%s3370_s6 + $0x68] sm:$0xff]  ;;  %v546_v38 = vld [vmem:[%s3370_s6 + $0x70] sm:$0xff]  ;;  %v539_v39 = vld [vmem:[%s3370_s6 + $0x38] sm:$0xff] }
 0x12a   : > { %2152 = vmatprep.subr.bf16.mxu0 %v2151_v14  ;;  %2238 = vmatprep.subr.bf16.mxu1 %v2151_v14  ;;  %v547_v40 = vld [vmem:[%s3370_s6 + $0x78] sm:$0xff]  ;;  %v1858_v41 = vld [vmem:[%s4127_s12] ss:$0 sm:$0xff] }
 0x12d   : > { %2154 = vmatpush3.bf16.msra.mxu0 %v2151_v14  ;;  %2246 = vmatpush3.bf16.msra.mxu1 %v2151_v14 }
 0x12e   : > { %2156 = vmatprep.subr.bf16.mxu0 %v2155_v17  ;;  %2239 = vmatprep.subr.bf16.mxu1 %v2155_v17 }
 0x131   : > { %2158 = vmatpush3.bf16.msra.mxu0 %v2155_v17  ;;  %2247 = vmatpush3.bf16.msra.mxu1 %v2155_v17 }
 0x132   : > { %2160 = vmatprep.subr.bf16.mxu0 %v2159_v20  ;;  %2240 = vmatprep.subr.bf16.mxu1 %v2159_v20 }
 0x135   : > { %2162 = vmatpush3.bf16.msra.mxu0 %v2159_v20  ;;  %2248 = vmatpush3.bf16.msra.mxu1 %v2159_v20 }
 0x136   : > { %2164 = vmatprep.subr.bf16.mxu0 %v2163_v23  ;;  %2241 = vmatprep.subr.bf16.mxu1 %v2163_v23 }
 0x139   : > { %2166 = vmatpush3.bf16.msra.mxu0 %v2163_v23  ;;  %2249 = vmatpush3.bf16.msra.mxu1 %v2163_v23 }
 0x13a   : > { %2168 = vmatprep.subr.bf16.mxu0 %v2167_v26  ;;  %2242 = vmatprep.subr.bf16.mxu1 %v2167_v26 }
 0x13d   : > { %2170 = vmatpush3.bf16.msra.mxu0 %v2167_v26  ;;  %2250 = vmatpush3.bf16.msra.mxu1 %v2167_v26 }
 0x140   : > { %2004 = vmatmul.mubr.f32.vlgmr.msra.gmra.mrb[0].mxu0 %v533_v27  ;;  %2016 = vmatmul.mubr.f32.vlgmr.msra.gmra.mrb[0].mxu1 %v541_v28 }
 0x141   : > { %2006 = vmatprep.mubr.f32.mxu0 %v534_v29  ;;  %2018 = vmatprep.mubr.f32.mxu1 %v542_v30 }
 0x144   : > { %2007 = vmatmul.mubr.f32.gmra.mrb[2].mxu0 %v535_v31  ;;  %2019 = vmatmul.mubr.f32.gmra.mrb[2].mxu1 %v543_v32 }
 0x145   : > { %2009 = vmatprep.mubr.f32.mxu0 %v536_v33  ;;  %2021 = vmatprep.mubr.f32.mxu1 %v544_v34 }
 0x148   : > { %2010 = vmatmul.mubr.f32.gmra.mrb[4].mxu0 %v537_v35  ;;  %2022 = vmatmul.mubr.f32.gmra.mrb[4].mxu1 %v545_v36 }
 0x149   : > { %2012 = vmatprep.mubr.f32.mxu0 %v538_v37  ;;  %2024 = vmatprep.mubr.f32.mxu1 %v546_v38 }
 0x14c   : > { %2013 = vmatmul.mubr.f32.gmra.mrb[6].mxu0 %v539_v39  ;;  %2025 = vmatmul.mubr.f32.gmra.mrb[6].mxu1 %v547_v40 }
 0x213   : > { %v2005_v42 = vpop.f32.mrb[0].mxu0  ;;  %v2017_v43 = vpop.f32.mrb[0].mxu1 }
 0x214   : > { %v643_v44 = vadd.f32 %v2005_v42, %v1858_v41  ;;  %v683_v45 = vadd.f32 %v2017_v43, %v1858_v41  ;;  %v637_v46 = vpop.f32.mrb[1].mxu0  ;;  %v677_v47 = vpop.f32.mrb[1].mxu1 }
 0x215   : > { %v638_v48 = vadd.f32 %v1858_v41, %v637_v46  ;;  %v678_v49 = vadd.f32 %v1858_v41, %v677_v47 }
 0x216   : > { %v717_v50 = vmax.f32 %v643_v44, 0.0  ;;  %v725_v51 = vmax.f32 %v683_v45, 0.0 }
 0x217   : > { %v716_v52 = vmax.f32 %v638_v48, 0.0  ;;  %v724_v53 = vmax.f32 %v678_v49, 0.0  ;;  %v2008_v54 = vpop.f32.mrb[2].mxu0  ;;  %v2020_v55 = vpop.f32.mrb[2].mxu1 }
 0x218   : > { %733 = vst [vmem:[#allocation3 + $0x8] sm:$0xff] %v717_v50  ;;  %741 = vst [vmem:[#allocation3 + $0x48] sm:$0xff] %v725_v51  ;;  %v653_v56 = vadd.f32 %v2008_v54, %v1858_v41  ;;  %v693_v57 = vadd.f32 %v2020_v55, %v1858_v41  ;;  %v647_v58 = vpop.f32.mrb[3].mxu0  ;;  %v687_v59 = vpop.f32.mrb[3].mxu1 }
 0x219   : > { %732 = vst [vmem:[#allocation3] sm:$0xff] %v716_v52  ;;  %740 = vst [vmem:[#allocation3 + $0x40] sm:$0xff] %v724_v53  ;;  %v648_v60 = vadd.f32 %v1858_v41, %v647_v58  ;;  %v688_v61 = vadd.f32 %v1858_v41, %v687_v59 }
 0x21a   : > { %v719_v62 = vmax.f32 %v653_v56, 0.0  ;;  %v727_v63 = vmax.f32 %v693_v57, 0.0 }
 0x21b   : > { %v718_v0 = vmax.f32 %v648_v60, 0.0  ;;  %v726_v1 = vmax.f32 %v688_v61, 0.0  ;;  %v2011_v2 = vpop.f32.mrb[4].mxu0  ;;  %v2023_v3 = vpop.f32.mrb[4].mxu1 }
 0x21c   : > { %735 = vst [vmem:[#allocation3 + $0x18] sm:$0xff] %v719_v62  ;;  %743 = vst [vmem:[#allocation3 + $0x58] sm:$0xff] %v727_v63  ;;  %v663_v4 = vadd.f32 %v2011_v2, %v1858_v41  ;;  %v703_v5 = vadd.f32 %v2023_v3, %v1858_v41  ;;  %v657_v6 = vpop.f32.mrb[5].mxu0  ;;  %v697_v7 = vpop.f32.mrb[5].mxu1 }
 0x21d   : > { %734 = vst [vmem:[#allocation3 + $0x10] sm:$0xff] %v718_v0  ;;  %742 = vst [vmem:[#allocation3 + $0x50] sm:$0xff] %v726_v1  ;;  %v658_v8 = vadd.f32 %v1858_v41, %v657_v6  ;;  %v698_v9 = vadd.f32 %v1858_v41, %v697_v7 }
 0x21e   : > { %v721_v10 = vmax.f32 %v663_v4, 0.0  ;;  %v729_v11 = vmax.f32 %v703_v5, 0.0 }
 0x21f   : > { %v720_v12 = vmax.f32 %v658_v8, 0.0  ;;  %v728_v13 = vmax.f32 %v698_v9, 0.0  ;;  %v2014_v14 = vpop.f32.mrb[6].mxu0  ;;  %v2026_v15 = vpop.f32.mrb[6].mxu1 }
 0x220   : > { %737 = vst [vmem:[#allocation3 + $0x28] sm:$0xff] %v721_v10  ;;  %745 = vst [vmem:[#allocation3 + $0x68] sm:$0xff] %v729_v11  ;;  %v673_v16 = vadd.f32 %v2014_v14, %v1858_v41  ;;  %v713_v17 = vadd.f32 %v2026_v15, %v1858_v41  ;;  %v667_v18 = vpop.f32.mrb[7].mxu0  ;;  %v707_v19 = vpop.f32.mrb[7].mxu1 }
 0x221   : > { %736 = vst [vmem:[#allocation3 + $0x20] sm:$0xff] %v720_v12  ;;  %744 = vst [vmem:[#allocation3 + $0x60] sm:$0xff] %v728_v13  ;;  %v668_v20 = vadd.f32 %v1858_v41, %v667_v18  ;;  %v708_v21 = vadd.f32 %v1858_v41, %v707_v19 }
 0x222   : > { %v723_v22 = vmax.f32 %v673_v16, 0.0  ;;  %v731_v23 = vmax.f32 %v713_v17, 0.0 }
 0x223   : > { %v722_v24 = vmax.f32 %v668_v20, 0.0  ;;  %v730_v25 = vmax.f32 %v708_v21, 0.0 }
 0x224   : > { %739 = vst [vmem:[#allocation3 + $0x38] sm:$0xff] %v723_v22  ;;  %747 = vst [vmem:[#allocation3 + $0x78] sm:$0xff] %v731_v23 }
 0x225   : > { %738 = vst [vmem:[#allocation3 + $0x30] sm:$0xff] %v722_v24  ;;  %746 = vst [vmem:[#allocation3 + $0x70] sm:$0xff] %v730_v25 }
 0x226 PF: > { %s4128_s11 = sld [smem:[#allocation31_spill]] }
 0x22c   : > { %p1859_p10 = scmp.ge.s32.totalorder %s4128_s11, %s3381_s15 }
 0x22d   : > { %v784_v26 = vld [vmem:[%s3361_s5] sm:$0xff] (!%p1859_p10)  ;;  %v785_v27 = vld [vmem:[%s3361_s5 + $0x8] sm:$0xff] (!%p1859_p10)  ;;  %v786_v28 = vld [vmem:[%s3361_s5 + $0x10] sm:$0xff] (!%p1859_p10) }
 0x22e   : > { %751 = sbr.rel (%p1859_p10) target bundleno = 820 (0x334), region = 84  ;;  %v2171_v29 = vpack.c.bf16 (!%p1859_p10), %v785_v27, %v784_v26  ;;  %v787_v30 = vld [vmem:[%s3361_s5 + $0x18] sm:$0xff] (!%p1859_p10)  ;;  %v788_v32 = vld [vmem:[%s3361_s5 + $0x20] sm:$0xff] (!%p1859_p10)  ;;  %v789_v33 = vld [vmem:[%s3361_s5 + $0x28] sm:$0xff] (!%p1859_p10) }
 0x22f   : > { %v2175_v31 = vpack.c.bf16 (!%p1859_p10), %v787_v30, %v786_v28  ;;  %v2179_v34 = vpack.c.bf16 (!%p1859_p10), %v789_v33, %v788_v32  ;;  %v768_v35 = vld [vmem:[%s3353_s7] sm:$0xff] (!%p1859_p10)  ;;  %v790_v37 = vld [vmem:[%s3361_s5 + $0x30] sm:$0xff] (!%p1859_p10)  ;;  %v791_v38 = vld [vmem:[%s3361_s5 + $0x38] sm:$0xff] (!%p1859_p10) }
 0x230   : > { %2172 = vmatprep.subr.bf16.mxu0 (!%p1859_p10), %v2171_v29  ;;  %2251 = vmatprep.subr.bf16.mxu1 (!%p1859_p10), %v2171_v29  ;;  %v776_v36 = vld [vmem:[%s3353_s7 + $0x40] sm:$0xff] (!%p1859_p10)  ;;  %v2183_v39 = vpack.c.bf16 (!%p1859_p10), %v791_v38, %v790_v37  ;;  %v793_v41 = vld [vmem:[%s3361_s5 + $0x48] sm:$0xff] (!%p1859_p10)  ;;  %v794_v43 = vld [vmem:[%s3361_s5 + $0x50] sm:$0xff] (!%p1859_p10) }
 0x231   : > { %2174 = vmatpush3.bf16.msra.mxu0 (!%p1859_p10), %v2171_v29  ;;  %2259 = vmatpush3.bf16.msra.mxu1 (!%p1859_p10), %v2171_v29  ;;  %v792_v40 = vld [vmem:[%s3361_s5 + $0x40] sm:$0xff] (!%p1859_p10)  ;;  %v795_v44 = vld [vmem:[%s3361_s5 + $0x58] sm:$0xff] (!%p1859_p10)  ;;  %v797_v47 = vld [vmem:[%s3361_s5 + $0x68] sm:$0xff] (!%p1859_p10) }
 0x232   : > { %2176 = vmatprep.subr.bf16.mxu0 (!%p1859_p10), %v2175_v31  ;;  %2252 = vmatprep.subr.bf16.mxu1 (!%p1859_p10), %v2175_v31  ;;  %v2187_v42 = vpack.c.bf16 (!%p1859_p10), %v793_v41, %v792_v40  ;;  %v2191_v45 = vpack.c.bf16 (!%p1859_p10), %v795_v44, %v794_v43  ;;  %v796_v46 = vld [vmem:[%s3361_s5 + $0x60] sm:$0xff] (!%p1859_p10)  ;;  %v798_v49 = vld [vmem:[%s3361_s5 + $0x70] sm:$0xff] (!%p1859_p10)  ;;  %v799_v50 = vld [vmem:[%s3361_s5 + $0x78] sm:$0xff] (!%p1859_p10) }
 0x233   : > { %2059 = vmatprep.mubr.f32.mxu0 (!%p1859_p10), %v768_v35  ;;  %2071 = vmatprep.mubr.f32.mxu1 (!%p1859_p10), %v776_v36  ;;  %v2195_v48 = vpack.c.bf16 (!%p1859_p10), %v797_v47, %v796_v46  ;;  %v2199_v51 = vpack.c.bf16 (!%p1859_p10), %v799_v50, %v798_v49  ;;  %v769_v52 = vld [vmem:[%s3353_s7 + $0x8] sm:$0xff] (!%p1859_p10)  ;;  %v770_v54 = vld [vmem:[%s3353_s7 + $0x10] sm:$0xff] (!%p1859_p10)  ;;  %v771_v56 = vld [vmem:[%s3353_s7 + $0x18] sm:$0xff] (!%p1859_p10) }
 0x234   : > { %v777_v53 = vld [vmem:[%s3353_s7 + $0x48] sm:$0xff] (!%p1859_p10)  ;;  %v778_v55 = vld [vmem:[%s3353_s7 + $0x50] sm:$0xff] (!%p1859_p10)  ;;  %v779_v57 = vld [vmem:[%s3353_s7 + $0x58] sm:$0xff] (!%p1859_p10) }
 0x235   : > { %2178 = vmatpush3.bf16.msra.mxu0 %v2175_v31  ;;  %2260 = vmatpush3.bf16.msra.mxu1 %v2175_v31  ;;  %v772_v58 = vld [vmem:[%s3353_s7 + $0x20] sm:$0xff]  ;;  %v773_v60 = vld [vmem:[%s3353_s7 + $0x28] sm:$0xff]  ;;  %v774_v62 = vld [vmem:[%s3353_s7 + $0x30] sm:$0xff] }
 0x236   : > { %2180 = vmatprep.subr.bf16.mxu0 %v2179_v34  ;;  %2253 = vmatprep.subr.bf16.mxu1 %v2179_v34  ;;  %v780_v59 = vld [vmem:[%s3353_s7 + $0x60] sm:$0xff]  ;;  %v781_v61 = vld [vmem:[%s3353_s7 + $0x68] sm:$0xff]  ;;  %v782_v63 = vld [vmem:[%s3353_s7 + $0x70] sm:$0xff] }
 0x237   : > { %v775_v0 = vld [vmem:[%s3353_s7 + $0x38] sm:$0xff]  ;;  %v753_v2 = vld [vmem:[#allocation2 + $0x8] sm:$0xff]  ;;  %v752_v4 = vld [vmem:[#allocation2] sm:$0xff] }
 0x238   : > { %v783_v1 = vld [vmem:[%s3353_s7 + $0x78] sm:$0xff]  ;;  %v761_v3 = vld [vmem:[#allocation2 + $0x48] sm:$0xff]  ;;  %v760_v5 = vld [vmem:[#allocation2 + $0x40] sm:$0xff] }
 0x239   : > { %2182 = vmatpush3.bf16.msra.mxu0 %v2179_v34  ;;  %2261 = vmatpush3.bf16.msra.mxu1 %v2179_v34  ;;  %v755_v14 = vld [vmem:[#allocation2 + $0x18] sm:$0xff]  ;;  %v754_v16 = vld [vmem:[#allocation2 + $0x10] sm:$0xff]  ;;  %v757_v26 = vld [vmem:[#allocation2 + $0x28] sm:$0xff] }
 0x23a   : > { %2184 = vmatprep.subr.bf16.mxu0 %v2183_v39  ;;  %2254 = vmatprep.subr.bf16.mxu1 %v2183_v39  ;;  %v763_v15 = vld [vmem:[#allocation2 + $0x58] sm:$0xff]  ;;  %v762_v17 = vld [vmem:[#allocation2 + $0x50] sm:$0xff]  ;;  %v765_v27 = vld [vmem:[#allocation2 + $0x68] sm:$0xff] }
 0x23b   : > { %v756_v28 = vld [vmem:[#allocation2 + $0x20] sm:$0xff]  ;;  %v759_v38 = vld [vmem:[#allocation2 + $0x38] sm:$0xff]  ;;  %v758_v40 = vld [vmem:[#allocation2 + $0x30] sm:$0xff] }
 0x23c   : > { %v764_v29 = vld [vmem:[#allocation2 + $0x60] sm:$0xff]  ;;  %v766_v41 = vld [vmem:[#allocation2 + $0x70] sm:$0xff] }
 0x23d   : > { %2186 = vmatpush3.bf16.msra.mxu0 %v2183_v39  ;;  %2262 = vmatpush3.bf16.msra.mxu1 %v2183_v39  ;;  %v767_v39 = vld [vmem:[#allocation2 + $0x78] sm:$0xff] }
 0x23e   : > { %2188 = vmatprep.subr.bf16.mxu0 %v2187_v42  ;;  %2255 = vmatprep.subr.bf16.mxu1 %v2187_v42 }
 0x241   : > { %2190 = vmatpush3.bf16.msra.mxu0 %v2187_v42  ;;  %2263 = vmatpush3.bf16.msra.mxu1 %v2187_v42 }
 0x242   : > { %2192 = vmatprep.subr.bf16.mxu0 %v2191_v45  ;;  %2256 = vmatprep.subr.bf16.mxu1 %v2191_v45 }
 0x245   : > { %2194 = vmatpush3.bf16.msra.mxu0 %v2191_v45  ;;  %2264 = vmatpush3.bf16.msra.mxu1 %v2191_v45 }
 0x246   : > { %2196 = vmatprep.subr.bf16.mxu0 %v2195_v48  ;;  %2257 = vmatprep.subr.bf16.mxu1 %v2195_v48 }
 0x249   : > { %2198 = vmatpush3.bf16.msra.mxu0 %v2195_v48  ;;  %2265 = vmatpush3.bf16.msra.mxu1 %v2195_v48 }
 0x24a   : > { %2200 = vmatprep.subr.bf16.mxu0 %v2199_v51  ;;  %2258 = vmatprep.subr.bf16.mxu1 %v2199_v51 }
 0x24d   : > { %2202 = vmatpush3.bf16.msra.mxu0 %v2199_v51  ;;  %2266 = vmatpush3.bf16.msra.mxu1 %v2199_v51 }
 0x250   : > { %2060 = vmatmul.mubr.f32.vlgmr.msra.gmra.mrb[0].mxu0 %v769_v52  ;;  %2072 = vmatmul.mubr.f32.vlgmr.msra.gmra.mrb[0].mxu1 %v777_v53 }
 0x251   : > { %2062 = vmatprep.mubr.f32.mxu0 %v770_v54  ;;  %2074 = vmatprep.mubr.f32.mxu1 %v778_v55 }
 0x254   : > { %2063 = vmatmul.mubr.f32.gmra.mrb[2].mxu0 %v771_v56  ;;  %2075 = vmatmul.mubr.f32.gmra.mrb[2].mxu1 %v779_v57 }
 0x255   : > { %2065 = vmatprep.mubr.f32.mxu0 %v772_v58  ;;  %2077 = vmatprep.mubr.f32.mxu1 %v780_v59 }
 0x258   : > { %2066 = vmatmul.mubr.f32.gmra.mrb[4].mxu0 %v773_v60  ;;  %2078 = vmatmul.mubr.f32.gmra.mrb[4].mxu1 %v781_v61 }
 0x259   : > { %2068 = vmatprep.mubr.f32.mxu0 %v774_v62  ;;  %2080 = vmatprep.mubr.f32.mxu1 %v782_v63 }
 0x25c   : > { %2069 = vmatmul.mubr.f32.gmra.mrb[6].mxu0 %v775_v0  ;;  %2081 = vmatmul.mubr.f32.gmra.mrb[6].mxu1 %v783_v1 }
 0x323   : > { %v2061_v6 = vpop.f32.mrb[0].mxu0  ;;  %v2073_v7 = vpop.f32.mrb[0].mxu1 }
 0x324   : > { %v946_v8 = vadd.f32 %v2061_v6, %v753_v2  ;;  %v954_v9 = vadd.f32 %v2073_v7, %v761_v3  ;;  %v866_v10 = vpop.f32.mrb[1].mxu0  ;;  %v906_v11 = vpop.f32.mrb[1].mxu1 }
 0x325   : > { %v945_v12 = vadd.f32 %v866_v10, %v752_v4  ;;  %v953_v13 = vadd.f32 %v906_v11, %v760_v5 }
 0x326   : > { %962 = vst [vmem:[#allocation2 + $0x8] sm:$0xff] %v946_v8  ;;  %970 = vst [vmem:[#allocation2 + $0x48] sm:$0xff] %v954_v9 }
 0x327   : > { %961 = vst [vmem:[#allocation2] sm:$0xff] %v945_v12  ;;  %969 = vst [vmem:[#allocation2 + $0x40] sm:$0xff] %v953_v13  ;;  %v2064_v18 = vpop.f32.mrb[2].mxu0  ;;  %v2076_v19 = vpop.f32.mrb[2].mxu1 }
 0x328   : > { %v948_v20 = vadd.f32 %v2064_v18, %v755_v14  ;;  %v956_v21 = vadd.f32 %v2076_v19, %v763_v15  ;;  %v876_v22 = vpop.f32.mrb[3].mxu0  ;;  %v916_v23 = vpop.f32.mrb[3].mxu1 }
 0x329   : > { %v947_v24 = vadd.f32 %v876_v22, %v754_v16  ;;  %v955_v25 = vadd.f32 %v916_v23, %v762_v17 }
 0x32a   : > { %964 = vst [vmem:[#allocation2 + $0x18] sm:$0xff] %v948_v20  ;;  %972 = vst [vmem:[#allocation2 + $0x58] sm:$0xff] %v956_v21 }
 0x32b   : > { %963 = vst [vmem:[#allocation2 + $0x10] sm:$0xff] %v947_v24  ;;  %971 = vst [vmem:[#allocation2 + $0x50] sm:$0xff] %v955_v25  ;;  %v2067_v30 = vpop.f32.mrb[4].mxu0  ;;  %v2079_v31 = vpop.f32.mrb[4].mxu1 }
 0x32c   : > { %v950_v32 = vadd.f32 %v2067_v30, %v757_v26  ;;  %v958_v33 = vadd.f32 %v2079_v31, %v765_v27  ;;  %v886_v34 = vpop.f32.mrb[5].mxu0  ;;  %v926_v35 = vpop.f32.mrb[5].mxu1 }
 0x32d   : > { %v949_v36 = vadd.f32 %v886_v34, %v756_v28  ;;  %v957_v37 = vadd.f32 %v926_v35, %v764_v29 }
 0x32e   : > { %966 = vst [vmem:[#allocation2 + $0x28] sm:$0xff] %v950_v32  ;;  %974 = vst [vmem:[#allocation2 + $0x68] sm:$0xff] %v958_v33 }
 0x32f   : > { %965 = vst [vmem:[#allocation2 + $0x20] sm:$0xff] %v949_v36  ;;  %973 = vst [vmem:[#allocation2 + $0x60] sm:$0xff] %v957_v37  ;;  %v2070_v42 = vpop.f32.mrb[6].mxu0  ;;  %v2082_v43 = vpop.f32.mrb[6].mxu1 }
 0x330   : > { %v952_v44 = vadd.f32 %v2070_v42, %v759_v38  ;;  %v960_v45 = vadd.f32 %v2082_v43, %v767_v39  ;;  %v896_v46 = vpop.f32.mrb[7].mxu0  ;;  %v936_v47 = vpop.f32.mrb[7].mxu1 }
 0x331   : > { %v951_v48 = vadd.f32 %v896_v46, %v758_v40  ;;  %v959_v49 = vadd.f32 %v936_v47, %v766_v41 }
 0x332   : > { %968 = vst [vmem:[#allocation2 + $0x38] sm:$0xff] %v952_v44  ;;  %976 = vst [vmem:[#allocation2 + $0x78] sm:$0xff] %v960_v45 }
 0x333   : > { %967 = vst [vmem:[#allocation2 + $0x30] sm:$0xff] %v951_v48  ;;  %975 = vst [vmem:[#allocation2 + $0x70] sm:$0xff] %v959_v49 }
 0x334 PF: > { %s4129_s7 = sld [smem:[#allocation31_spill]] }
 0x33a   : > { %p1860_p2 = scmp.ne.s32.totalorder %s4129_s7, 1 }
 0x33b   : > { %v997_v50 = vld [vmem:[#allocation15] sm:$0xff] (!%p1860_p2)  ;;  %v998_v51 = vld [vmem:[#allocation15 + $0x8] sm:$0xff] (!%p1860_p2)  ;;  %v999_v52 = vld [vmem:[#allocation15 + $0x10] sm:$0xff] (!%p1860_p2)  ;;  %s4130_s3 = sld [smem:[#allocation44_spill]] (!%p1860_p2)  ;;  %s4132_s9 = sld [smem:[#allocation45_spill]] (!%p1860_p2) }
 0x33c   : > { %980 = sbr.rel (%p1860_p2) target bundleno = 1421 (0x58d), region = 88  ;;  %v2203_v53 = vpack.c.bf16 (!%p1860_p2), %v998_v51, %v997_v50  ;;  %v1000_v54 = vld [vmem:[#allocation15 + $0x18] sm:$0xff] (!%p1860_p2)  ;;  %v1001_v56 = vld [vmem:[#allocation15 + $0x20] sm:$0xff] (!%p1860_p2)  ;;  %v1002_v57 = vld [vmem:[#allocation15 + $0x28] sm:$0xff] (!%p1860_p2)  ;;  %s4133_s13 = sld [smem:[#allocation46_spill]] (!%p1860_p2) }
 0x33d   : > { %v2207_v55 = vpack.c.bf16 (!%p1860_p2), %v1000_v54, %v999_v52  ;;  %v2211_v58 = vpack.c.bf16 (!%p1860_p2), %v1002_v57, %v1001_v56  ;;  %v981_v59 = vld [vmem:[#allocation2] sm:$0xff] (!%p1860_p2)  ;;  %v1003_v60 = vld [vmem:[#allocation15 + $0x30] sm:$0xff] (!%p1860_p2)  ;;  %v1004_v61 = vld [vmem:[#allocation15 + $0x38] sm:$0xff] (!%p1860_p2) }
 0x33e   : > { %2204 = vmatprep.subr.bf16.mxu0 (!%p1860_p2), %v2203_v53  ;;  %2267 = vmatprep.subr.bf16.mxu1 (!%p1860_p2), %v2203_v53  ;;  %v989_v62 = vld [vmem:[#allocation2 + $0x40] sm:$0xff] (!%p1860_p2)  ;;  %v2215_v63 = vpack.c.bf16 (!%p1860_p2), %v1004_v61, %v1003_v60  ;;  %v1006_v1 = vld [vmem:[#allocation15 + $0x48] sm:$0xff] (!%p1860_p2)  ;;  %v3443_v3 = vld [vmem:[#allocation3 + $0x10] sm:$0xff] (!%p1860_p2) }
 0x33f   : > { %2206 = vmatpush3.bf16.msra.mxu0 (!%p1860_p2), %v2203_v53  ;;  %2275 = vmatpush3.bf16.msra.mxu1 (!%p1860_p2), %v2203_v53  ;;  %v1005_v0 = vld [vmem:[#allocation15 + $0x40] sm:$0xff] (!%p1860_p2)  ;;  %v3445_v4 = vld [vmem:[#allocation3 + $0x8] sm:$0xff] (!%p1860_p2)  ;;  %v1007_v6 = vld [vmem:[#allocation15 + $0x50] sm:$0xff] (!%p1860_p2) }
 0x340   : > { %2208 = vmatprep.subr.bf16.mxu0 (!%p1860_p2), %v2207_v55  ;;  %2268 = vmatprep.subr.bf16.mxu1 (!%p1860_p2), %v2207_v55  ;;  %v3440_v2 = vld [vmem:[#allocation3] sm:$0xff] (!%p1860_p2)  ;;  %v2219_v5 = vpack.c.bf16 (!%p1860_p2), %v1006_v1, %v1005_v0  ;;  %v1008_v7 = vld [vmem:[#allocation15 + $0x58] sm:$0xff] (!%p1860_p2)  ;;  %v1010_v12 = vld [vmem:[#allocation15 + $0x68] sm:$0xff] (!%p1860_p2) }
 0x341   : > { %2115 = vmatprep.mubr.f32.mxu0 (!%p1860_p2), %v981_v59  ;;  %2127 = vmatprep.mubr.f32.mxu1 (!%p1860_p2), %v989_v62  ;;  %v3449_v8 = vld [vmem:[#allocation3 + $0x18] sm:$0xff] (!%p1860_p2)  ;;  %v3451_v9 = vld [vmem:[#allocation3 + $0x20] sm:$0xff] (!%p1860_p2)  ;;  %v2223_v10 = vpack.c.bf16 (!%p1860_p2), %v1008_v7, %v1007_v6  ;;  %v3454_v13 = vld [vmem:[#allocation3 + $0x28] sm:$0xff] (!%p1860_p2) }
 0x342   : > { %1197 = vadd.xlane.f32.xlu0 (!%p1860_p2), %v3440_v2  ;;  %1201 = vadd.xlane.f32.xlu1 (!%p1860_p2), %v3443_v3  ;;  %v1009_v11 = vld [vmem:[#allocation15 + $0x60] sm:$0xff] (!%p1860_p2)  ;;  %v3457_v14 = vld [vmem:[#allocation3 + $0x30] sm:$0xff] (!%p1860_p2)  ;;  %v1012_v17 = vld [vmem:[#allocation15 + $0x78] sm:$0xff] (!%p1860_p2)  ;;  %s4134_s6 = smov (!%p1860_p2), %s4133_s13 }
 0x343   : > { %2210 = vmatpush3.bf16.msra.mxu0 %v2207_v55  ;;  %2276 = vmatpush3.bf16.msra.mxu1 %v2207_v55  ;;  %v2227_v15 = vpack.c.bf16 %v1010_v12, %v1009_v11  ;;  %v1011_v16 = vld [vmem:[#allocation15 + $0x70] sm:$0xff]  ;;  %v3460_v18 = vld [vmem:[#allocation3 + $0x38] sm:$0xff]  ;;  %v3463_v19 = vld [vmem:[#allocation3 + $0x40] sm:$0xff] }
 0x344   : > { %2212 = vmatprep.subr.bf16.mxu0 %v2211_v58  ;;  %2269 = vmatprep.subr.bf16.mxu1 %v2211_v58  ;;  %v2231_v20 = vpack.c.bf16 %v1012_v17, %v1011_v16  ;;  %v3466_v21 = vld [vmem:[#allocation3 + $0x48] sm:$0xff]  ;;  %v3469_v22 = vld [vmem:[#allocation3 + $0x50] sm:$0xff]  ;;  %v3472_v23 = vld [vmem:[#allocation3 + $0x58] sm:$0xff] }
 0x345   : > { %v982_v24 = vld [vmem:[#allocation2 + $0x8] sm:$0xff]  ;;  %v983_v26 = vld [vmem:[#allocation2 + $0x10] sm:$0xff]  ;;  %v3476_v28 = vld [vmem:[#allocation3 + $0x60] sm:$0xff] }
 0x346   : > { %1199 = vadd.xlane.f32.xlu0 %v3445_v4  ;;  %1203 = vadd.xlane.f32.xlu1 %v3449_v8  ;;  %v990_v25 = vld [vmem:[#allocation2 + $0x48] sm:$0xff]  ;;  %v991_v27 = vld [vmem:[#allocation2 + $0x50] sm:$0xff]  ;;  %v984_v30 = vld [vmem:[#allocation2 + $0x18] sm:$0xff] }
 0x347   : > { %2214 = vmatpush3.bf16.msra.mxu0 %v2211_v58  ;;  %2277 = vmatpush3.bf16.msra.mxu1 %v2211_v58  ;;  %v3478_v29 = vld [vmem:[#allocation3 + $0x68] sm:$0xff]  ;;  %v992_v31 = vld [vmem:[#allocation2 + $0x58] sm:$0xff]  ;;  %v985_v32 = vld [vmem:[#allocation2 + $0x20] sm:$0xff] }
 0x348   : > { %2216 = vmatprep.subr.bf16.mxu0 %v2215_v63  ;;  %2270 = vmatprep.subr.bf16.mxu1 %v2215_v63  ;;  %v993_v33 = vld [vmem:[#allocation2 + $0x60] sm:$0xff]  ;;  %v3482_v34 = vld [vmem:[#allocation3 + $0x70] sm:$0xff]  ;;  %v3484_v35 = vld [vmem:[#allocation3 + $0x78] sm:$0xff] }
 0x349   : > { %v986_v36 = vld [vmem:[#allocation2 + $0x28] sm:$0xff]  ;;  %v987_v38 = vld [vmem:[#allocation2 + $0x30] sm:$0xff]  ;;  %v988_v40 = vld [vmem:[#allocation2 + $0x38] sm:$0xff] }
 0x34a   : > { %1205 = vadd.xlane.f32.xlu0 %v3451_v9  ;;  %1207 = vadd.xlane.f32.xlu1 %v3454_v13  ;;  %v994_v37 = vld [vmem:[#allocation2 + $0x68] sm:$0xff]  ;;  %v995_v39 = vld [vmem:[#allocation2 + $0x70] sm:$0xff]  ;;  %v996_v41 = vld [vmem:[#allocation2 + $0x78] sm:$0xff] }
 0x34b   : > { %2218 = vmatpush3.bf16.msra.mxu0 %v2215_v63  ;;  %2278 = vmatpush3.bf16.msra.mxu1 %v2215_v63  ;;  %v3491_v42 = vld [vmem:[%s4130_s3] ss:$0 sm:$0xff] }
 0x34c   : > { %2220 = vmatprep.subr.bf16.mxu0 %v2219_v5  ;;  %2271 = vmatprep.subr.bf16.mxu1 %v2219_v5 }
 0x34e   : > { %1209 = vadd.xlane.f32.xlu0 %v3457_v14  ;;  %1211 = vadd.xlane.f32.xlu1 %v3460_v18 }
 0x34f   : > { %2222 = vmatpush3.bf16.msra.mxu0 %v2219_v5  ;;  %2279 = vmatpush3.bf16.msra.mxu1 %v2219_v5 }
 0x350   : > { %2224 = vmatprep.subr.bf16.mxu0 %v2223_v10  ;;  %2272 = vmatprep.subr.bf16.mxu1 %v2223_v10 }
 0x352   : > { %1213 = vadd.xlane.f32.xlu0 %v3463_v19  ;;  %1215 = vadd.xlane.f32.xlu1 %v3466_v21 }
 0x353   : > { %2226 = vmatpush3.bf16.msra.mxu0 %v2223_v10  ;;  %2280 = vmatpush3.bf16.msra.mxu1 %v2223_v10 }
 0x354   : > { %2228 = vmatprep.subr.bf16.mxu0 %v2227_v15  ;;  %2273 = vmatprep.subr.bf16.mxu1 %v2227_v15 }
 0x356   : > { %1217 = vadd.xlane.f32.xlu0 %v3469_v22  ;;  %1219 = vadd.xlane.f32.xlu1 %v3472_v23 }
 0x357   : > { %2230 = vmatpush3.bf16.msra.mxu0 %v2227_v15  ;;  %2281 = vmatpush3.bf16.msra.mxu1 %v2227_v15 }
 0x358   : > { %2232 = vmatprep.subr.bf16.mxu0 %v2231_v20  ;;  %2274 = vmatprep.subr.bf16.mxu1 %v2231_v20 }
 0x35a   : > { %1221 = vadd.xlane.f32.xlu0 %v3476_v28  ;;  %1223 = vadd.xlane.f32.xlu1 %v3478_v29 }
 0x35b   : > { %2234 = vmatpush3.bf16.msra.mxu0 %v2231_v20  ;;  %2282 = vmatpush3.bf16.msra.mxu1 %v2231_v20 }
 0x35e   : > { %2116 = vmatmul.mubr.f32.vlgmr.msra.gmra.mrb[0].mxu0 %v982_v24  ;;  %2128 = vmatmul.mubr.f32.vlgmr.msra.gmra.mrb[0].mxu1 %v990_v25 }
 0x35f   : > { %2118 = vmatprep.mubr.f32.mxu0 %v983_v26  ;;  %2130 = vmatprep.mubr.f32.mxu1 %v991_v27 }
 0x360   : > { %1225 = vadd.xlane.f32.xlu0 %v3482_v34  ;;  %1227 = vadd.xlane.f32.xlu1 %v3484_v35 }
 0x362   : > { %2119 = vmatmul.mubr.f32.gmra.mrb[2].mxu0 %v984_v30  ;;  %2131 = vmatmul.mubr.f32.gmra.mrb[2].mxu1 %v992_v31 }
 0x363   : > { %2121 = vmatprep.mubr.f32.mxu0 %v985_v32  ;;  %2133 = vmatprep.mubr.f32.mxu1 %v993_v33 }
 0x366   : > { %2122 = vmatmul.mubr.f32.gmra.mrb[4].mxu0 %v986_v36  ;;  %2134 = vmatmul.mubr.f32.gmra.mrb[4].mxu1 %v994_v37 }
 0x367   : > { %2124 = vmatprep.mubr.f32.mxu0 %v987_v38  ;;  %2136 = vmatprep.mubr.f32.mxu1 %v995_v39 }
 0x36a   : > { %2125 = vmatmul.mubr.f32.gmra.mrb[6].mxu0 %v988_v40  ;;  %2137 = vmatmul.mubr.f32.gmra.mrb[6].mxu1 %v996_v41 }
 0x3cf   : > { %v1202_v61 = vpop.xlane.xlu1 %1201  ;;  %v1198_v11 = vpop.xlane.xlu0 %1197 }
 0x3d3   : > { %v1204_v27 = vpop.xlane.xlu1 %1203  ;;  %v1200_v32 = vpop.xlane.xlu0 %1199 }
 0x3d7   : > { %v1208_v37 = vpop.xlane.xlu1 %1207  ;;  %v1206_v40 = vpop.xlane.xlu0 %1205 }
 0x431   : > { %v2117_v43 = vpop.f32.mrb[0].mxu0  ;;  %v2129_v44 = vpop.f32.mrb[0].mxu1 }
 0x432   : > { %v3494_v45 = vadd.f32 %v2117_v43, %v3491_v42  ;;  %v1086_v46 = vpop.f32.mrb[1].mxu0  ;;  %v3497_v47 = vadd.f32 %v2129_v44, %v3491_v42  ;;  %v1126_v48 = vpop.f32.mrb[1].mxu1 }
 0x433   : > { %v3500_v49 = vadd.f32 %v3491_v42, %v1086_v46  ;;  %v3503_v50 = vadd.f32 %v3491_v42, %v1126_v48  ;;  %v1231_v48 = vmul.f32 0.0078125, %v1200_v32  ;;  %v1234_v32 = vmul.f32 0.0078125, %v1206_v40 }
 0x434   : > { %v1166_v51 = vmax.f32 %v3494_v45, 0.0  ;;  %v1174_v55 = vmax.f32 %v3497_v47, 0.0 }
 0x435   : > { %v1165_v52 = vmax.f32 %v3500_v49, 0.0  ;;  %v2120_v53 = vpop.f32.mrb[2].mxu0  ;;  %v2132_v54 = vpop.f32.mrb[2].mxu1  ;;  %v1173_v59 = vmax.f32 %v3503_v50, 0.0 }
 0x436   : > { %1418 = vadd.xlane.f32.xlu1 %v1166_v51  ;;  %v3511_v56 = vadd.f32 %v2120_v53, %v3491_v42  ;;  %v1096_v57 = vpop.f32.mrb[3].mxu0  ;;  %v1136_v58 = vpop.f32.mrb[3].mxu1  ;;  %v3523_v1 = vadd.f32 %v2132_v54, %v3491_v42  ;;  %v1230_v54 = vmul.f32 0.0078125, %v1198_v11 }
 0x437   : > { %1416 = vadd.xlane.f32.xlu0 %v1165_v52  ;;  %v3517_v60 = vadd.f32 %v3491_v42, %v1096_v57  ;;  %v3529_v10 = vadd.f32 %v3491_v42, %v1136_v58  ;;  %v1212_v58 = vpop.xlane.xlu1 %1211 }
 0x438   : > { %v1168_v0 = vmax.f32 %v3511_v56, 0.0  ;;  %v1176_v16 = vmax.f32 %v3523_v1, 0.0 }
 0x439   : > { %v2123_v62 = vpop.f32.mrb[4].mxu0  ;;  %v2135_v63 = vpop.f32.mrb[4].mxu1  ;;  %v1167_v7 = vmax.f32 %v3517_v60, 0.0  ;;  %v1175_v25 = vmax.f32 %v3529_v10, 0.0 }
 0x43a   : > { %1434 = vadd.xlane.f32.xlu1 %v1174_v55  ;;  %v1106_v5 = vpop.f32.mrb[5].mxu0  ;;  %v1146_v6 = vpop.f32.mrb[5].mxu1  ;;  %v3535_v17 = vadd.f32 %v2123_v62, %v3491_v42  ;;  %v3547_v31 = vadd.f32 %v2135_v63, %v3491_v42 }
 0x43b   : > { %1432 = vadd.xlane.f32.xlu0 %v1173_v59  ;;  %v3541_v26 = vadd.f32 %v3491_v42, %v1106_v5  ;;  %v3553_v36 = vadd.f32 %v3491_v42, %v1146_v6  ;;  %v1210_v62 = vpop.xlane.xlu0 %1209  ;;  %v3583_v5 = vsub.f32 %v3445_v4, %v1231_v48  ;;  %v1233_v6 = vmul.f32 0.0078125, %v1204_v27 }
 0x43c   : > { %v1170_v30 = vmax.f32 %v3535_v17, 0.0  ;;  %v1178_v38 = vmax.f32 %v3547_v31, 0.0 }
 0x43d   : > { %v2126_v12 = vpop.f32.mrb[6].mxu0  ;;  %v2138_v15 = vpop.f32.mrb[6].mxu1  ;;  %v1169_v33 = vmax.f32 %v3541_v26, 0.0  ;;  %v1177_v41 = vmax.f32 %v3553_v36, 0.0  ;;  %v1263_v4 = vmul.f32 %v3583_v5, %v3583_v5 }
 0x43e   : > { %1422 = vadd.xlane.f32.xlu1 %v1168_v0  ;;  %v1116_v20 = vpop.f32.mrb[7].mxu0  ;;  %v1156_v24 = vpop.f32.mrb[7].mxu1  ;;  %v3559_v39 = vadd.f32 %v2126_v12, %v3491_v42  ;;  %v3571_v46 = vadd.f32 %v2138_v15, %v3491_v42  ;;  %v3586_v12 = vsub.f32 %v3440_v2, %v1230_v54  ;;  %v1232_v15 = vmul.f32 0.0078125, %v1202_v61 }
 0x43f   : > { %1420 = vadd.xlane.f32.xlu0 %v1167_v7  ;;  %v3565_v43 = vadd.f32 %v3491_v42, %v1116_v20  ;;  %v3577_v57 = vadd.f32 %v3491_v42, %v1156_v24  ;;  %v1216_v42 = vpop.xlane.xlu1 %1215  ;;  %v3594_v20 = vsub.f32 %v3449_v8, %v1233_v6  ;;  %v1235_v24 = vmul.f32 0.0078125, %v1208_v37  ;;  %v1214_v27 = vpop.xlane.xlu0 %1213 }
 0x440   : > { %v1172_v44 = vmax.f32 %v3559_v39, 0.0  ;;  %v1180_v63 = vmax.f32 %v3571_v46, 0.0  ;;  %v3599_v2 = vsub.f32 %v3443_v3, %v1232_v15  ;;  %v1262_v61 = vmul.f32 %v3586_v12, %v3586_v12 }
 0x441   : > { %v1171_v53 = vmax.f32 %v3565_v43, 0.0  ;;  %v4054_v11 = vmax.f32 %v3577_v57, 0.0  ;;  %v3606_v48 = vsub.f32 %v3454_v13, %v1235_v24  ;;  %v1265_v8 = vmul.f32 %v3594_v20, %v3594_v20 }
 0x442   : > { %1438 = vadd.xlane.f32.xlu1 %v1176_v16  ;;  %v1237_v54 = vmul.f32 0.0078125, %v1212_v58  ;;  %v3611_v37 = vsub.f32 %v3451_v9, %v1234_v32  ;;  %v1264_v3 = vmul.f32 %v3599_v2, %v3599_v2  ;;  %v1236_v6 = vmul.f32 0.0078125, %v1210_v62 }
 0x443   : > { %1436 = vadd.xlane.f32.xlu0 %v1175_v25  ;;  %v1220_v15 = vpop.xlane.xlu1 %1219  ;;  %v1267_v13 = vmul.f32 %v3606_v48, %v3606_v48  ;;  %v1238_v24 = vmul.f32 0.0078125, %v1214_v27  ;;  %v4131_v43 = vmax.f32 %v3577_v57, 0.0 }
 0x444   : > { %v3616_v40 = vsub.f32 %v3460_v18, %v1237_v54  ;;  %v3621_v58 = vsub.f32 %v3457_v14, %v1236_v6  ;;  %v1266_v9 = vmul.f32 %v3611_v37, %v3611_v37  ;;  %v1241_v32 = vmul.f32 0.0078125, %v1220_v15 }
 0x446   : > { %1426 = vadd.xlane.f32.xlu1 %v1170_v30  ;;  %v1269_v18 = vmul.f32 %v3616_v40, %v3616_v40  ;;  %v1268_v14 = vmul.f32 %v3621_v58, %v3621_v58  ;;  %v3636_v27 = vsub.f32 %v3472_v23, %v1241_v32 }
 0x447   : > { %1424 = vadd.xlane.f32.xlu0 %v1169_v33 }
 0x448   : > { %v1273_v23 = vmul.f32 %v3636_v27, %v3636_v27 }
 0x44a   : > { %1442 = vadd.xlane.f32.xlu1 %v1178_v38 }
 0x44b   : > { %1440 = vadd.xlane.f32.xlu0 %v1177_v41 }
 0x44e   : > { %1430 = vadd.xlane.f32.xlu1 %v1172_v44 }
 0x44f   : > { %1428 = vadd.xlane.f32.xlu0 %v1171_v53 }
 0x452   : > { %1446 = vadd.xlane.f32.xlu1 %v1180_v63 }
 0x453   : > { %1444 = vadd.xlane.f32.xlu0 %v4054_v11  ;;  %v1218_v11 = vpop.xlane.xlu0 %1217 }
 0x454   : > { %v1240_v54 = vmul.f32 0.0078125, %v1218_v11 }
 0x456   : > { %1280 = vadd.xlane.f32.xlu1 %v1263_v4  ;;  %v1239_v4 = vmul.f32 0.0078125, %v1216_v42  ;;  %v3631_v42 = vsub.f32 %v3463_v19, %v1238_v24  ;;  %v3641_v6 = vsub.f32 %v3469_v22, %v1240_v54 }
 0x457   : > { %1278 = vadd.xlane.f32.xlu0 %v1262_v61  ;;  %v1224_v61 = vpop.xlane.xlu1 %1223 }
 0x458   : > { %v3626_v62 = vsub.f32 %v3466_v21, %v1239_v4  ;;  %v1270_v19 = vmul.f32 %v3631_v42, %v3631_v42  ;;  %v1272_v22 = vmul.f32 %v3641_v6, %v3641_v6 }
 0x45a   : > { %1284 = vadd.xlane.f32.xlu1 %v1265_v8  ;;  %v1222_v8 = vpop.xlane.xlu0 %1221  ;;  %v1271_v21 = vmul.f32 %v3626_v62, %v3626_v62 }
 0x45b   : > { %1282 = vadd.xlane.f32.xlu0 %v1264_v3  ;;  %v1243_v3 = vmul.f32 0.0078125, %v1224_v61  ;;  %v1242_v15 = vmul.f32 0.0078125, %v1222_v8 }
 0x45d   : > { %v3646_v11 = vsub.f32 %v3478_v29, %v1243_v3  ;;  %v3651_v24 = vsub.f32 %v3476_v28, %v1242_v15 }
 0x45e   : > { %1288 = vadd.xlane.f32.xlu1 %v1267_v13  ;;  %v1228_v13 = vpop.xlane.xlu1 %1227  ;;  %v1226_v4 = vpop.xlane.xlu0 %1225 }
 0x45f   : > { %1286 = vadd.xlane.f32.xlu0 %v1266_v9  ;;  %v1245_v9 = vmul.f32 0.0078125, %v1228_v13  ;;  %v1244_v61 = vmul.f32 0.0078125, %v1226_v4  ;;  %v1275_v29 = vmul.f32 %v3646_v11, %v3646_v11  ;;  %v1274_v8 = vmul.f32 %v3651_v24, %v3651_v24 }
 0x461   : > { %v3661_v32 = vsub.f32 %v3482_v34, %v1244_v61 }
 0x462   : > { %1292 = vadd.xlane.f32.xlu1 %v1269_v18  ;;  %v3656_v18 = vsub.f32 %v3484_v35, %v1245_v9 }
 0x463   : > { %1290 = vadd.xlane.f32.xlu0 %v1268_v14  ;;  %v1276_v14 = vmul.f32 %v3661_v32, %v3661_v32 }
 0x464   : > { %v1277_v28 = vmul.f32 %v3656_v18, %v3656_v18 }
 0x466   : > { %1296 = vadd.xlane.f32.xlu1 %v1271_v21 }
 0x467   : > { %1294 = vadd.xlane.f32.xlu0 %v1270_v19 }
 0x46a   : > { %1300 = vadd.xlane.f32.xlu1 %v1273_v23 }
 0x46b   : > { %1298 = vadd.xlane.f32.xlu0 %v1272_v22 }
 0x46e   : > { %1304 = vadd.xlane.f32.xlu1 %v1275_v29 }
 0x46f   : > { %1302 = vadd.xlane.f32.xlu0 %v1274_v8 }
 0x472   : > { %1308 = vadd.xlane.f32.xlu1 %v1277_v28 }
 0x473   : > { %1306 = vadd.xlane.f32.xlu0 %v1276_v14 }
 0x4c3   : > { %v1419_v35 = vpop.xlane.xlu1 %1418 }
 0x4c4   : > { %v1449_v54 = vmul.f32 0.0078125, %v1419_v35  ;;  %v1417_v21 = vpop.xlane.xlu0 %1416 }
 0x4c5   : > { %v1448_v3 = vmul.f32 0.0078125, %v1417_v21 }
 0x4c6   : > { %v3671_v34 = vsub.f32 %v1166_v51, %v1449_v54 }
 0x4c7   : > { %v3675_v19 = vsub.f32 %v1165_v52, %v1448_v3  ;;  %v1435_v15 = vpop.xlane.xlu1 %1434 }
 0x4c8   : > { %v1457_v13 = vmul.f32 0.0078125, %v1435_v15  ;;  %v1433_v4 = vpop.xlane.xlu0 %1432  ;;  %v1481_v23 = vmul.f32 %v3671_v34, %v3671_v34 }
 0x4c9   : > { %v1456_v9 = vmul.f32 0.0078125, %v1433_v4  ;;  %v1480_v22 = vmul.f32 %v3675_v19, %v3675_v19 }
 0x4ca   : > { %v3683_v61 = vsub.f32 %v1174_v55, %v1457_v13  ;;  %1498 = vadd.xlane.f32.xlu1 %v1481_v23 }
 0x4cb   : > { %v3687_v45 = vsub.f32 %v1173_v59, %v1456_v9  ;;  %v1423_v49 = vpop.xlane.xlu1 %1422  ;;  %1496 = vadd.xlane.f32.xlu0 %v1480_v22 }
 0x4cc   : > { %v1451_v51 = vmul.f32 0.0078125, %v1423_v49  ;;  %v1421_v52 = vpop.xlane.xlu0 %1420  ;;  %v1489_v29 = vmul.f32 %v3683_v61, %v3683_v61 }
 0x4cd   : > { %v1450_v8 = vmul.f32 0.0078125, %v1421_v52  ;;  %v1488_v28 = vmul.f32 %v3687_v45, %v3687_v45 }
 0x4ce   : > { %v3695_v47 = vsub.f32 %v1168_v0, %v1451_v51  ;;  %1514 = vadd.xlane.f32.xlu1 %v1489_v29 }
 0x4cf   : > { %v3699_v50 = vsub.f32 %v1167_v7, %v1450_v8  ;;  %v1439_v55 = vpop.xlane.xlu1 %1438  ;;  %1512 = vadd.xlane.f32.xlu0 %v1488_v28 }
 0x4d0   : > { %v1459_v59 = vmul.f32 0.0078125, %v1439_v55  ;;  %v1437_v14 = vpop.xlane.xlu0 %1436  ;;  %v1483_v35 = vmul.f32 %v3695_v47, %v3695_v47 }
 0x4d1   : > { %v1458_v54 = vmul.f32 0.0078125, %v1437_v14  ;;  %v1482_v21 = vmul.f32 %v3699_v50, %v3699_v50 }
 0x4d2   : > { %v3707_v56 = vsub.f32 %v1176_v16, %v1459_v59  ;;  %1502 = vadd.xlane.f32.xlu1 %v1483_v35 }
 0x4d3   : > { %v3711_v60 = vsub.f32 %v1175_v25, %v1458_v54  ;;  %v1427_v0 = vpop.xlane.xlu1 %1426  ;;  %1500 = vadd.xlane.f32.xlu0 %v1482_v21 }
 0x4d4   : > { %v1453_v7 = vmul.f32 0.0078125, %v1427_v0  ;;  %v1425_v3 = vpop.xlane.xlu0 %1424  ;;  %v1491_v15 = vmul.f32 %v3707_v56, %v3707_v56 }
 0x4d5   : > { %v1452_v13 = vmul.f32 0.0078125, %v1425_v3  ;;  %v1490_v4 = vmul.f32 %v3711_v60, %v3711_v60 }
 0x4d6   : > { %v3719_v1 = vsub.f32 %v1170_v30, %v1453_v7  ;;  %1518 = vadd.xlane.f32.xlu1 %v1491_v15 }
 0x4d7   : > { %v3723_v10 = vsub.f32 %v1169_v33, %v1452_v13  ;;  %v1443_v16 = vpop.xlane.xlu1 %1442  ;;  %1516 = vadd.xlane.f32.xlu0 %v1490_v4 }
 0x4d8   : > { %v1461_v25 = vmul.f32 0.0078125, %v1443_v16  ;;  %v1441_v23 = vpop.xlane.xlu0 %1440  ;;  %v1485_v9 = vmul.f32 %v3719_v1, %v3719_v1 }
 0x4d9   : > { %v1460_v22 = vmul.f32 0.0078125, %v1441_v23  ;;  %v1484_v49 = vmul.f32 %v3723_v10, %v3723_v10 }
 0x4da   : > { %v3731_v17 = vsub.f32 %v1178_v38, %v1461_v25  ;;  %1506 = vadd.xlane.f32.xlu1 %v1485_v9 }
 0x4db   : > { %v3735_v26 = vsub.f32 %v1177_v41, %v1460_v22  ;;  %v1431_v30 = vpop.xlane.xlu1 %1430  ;;  %1504 = vadd.xlane.f32.xlu0 %v1484_v49 }
 0x4dc   : > { %v1455_v33 = vmul.f32 0.0078125, %v1431_v30  ;;  %v1429_v51 = vpop.xlane.xlu0 %1428  ;;  %v1493_v52 = vmul.f32 %v3731_v17, %v3731_v17 }
 0x4dd   : > { %v1454_v29 = vmul.f32 0.0078125, %v1429_v51  ;;  %v1492_v8 = vmul.f32 %v3735_v26, %v3735_v26 }
 0x4de   : > { %v3743_v31 = vsub.f32 %v1172_v44, %v1455_v33  ;;  %1522 = vadd.xlane.f32.xlu1 %v1493_v52 }
 0x4df   : > { %v3747_v36 = vsub.f32 %v1171_v53, %v1454_v29  ;;  %v1447_v38 = vpop.xlane.xlu1 %1446  ;;  %1520 = vadd.xlane.f32.xlu0 %v1492_v8 }
 0x4e0   : > { %v1463_v41 = vmul.f32 0.0078125, %v1447_v38  ;;  %v1445_v28 = vpop.xlane.xlu0 %1444  ;;  %v1487_v55 = vmul.f32 %v3743_v31, %v3743_v31 }
 0x4e1   : > { %v1462_v59 = vmul.f32 0.0078125, %v1445_v28  ;;  %v1486_v14 = vmul.f32 %v3747_v36, %v3747_v36 }
 0x4e2   : > { %v3755_v39 = vsub.f32 %v1180_v63, %v1463_v41  ;;  %1510 = vadd.xlane.f32.xlu1 %v1487_v55 }
 0x4e3   : > { %v3759_v44 = vsub.f32 %v4131_v43, %v1462_v59  ;;  %1508 = vadd.xlane.f32.xlu0 %v1486_v14  ;;  %v1281_v54 = vpop.xlane.xlu1 %1280 }
 0x4e4   : > { %v1495_v53 = vmul.f32 %v3755_v39, %v3755_v39  ;;  %v1279_v21 = vpop.xlane.xlu0 %1278  ;;  %v1311_v4 = vmul.f32 0.0078125, %v1281_v54 }
 0x4e5   : > { %v1494_v35 = vmul.f32 %v3759_v44, %v3759_v44  ;;  %v1310_v16 = vmul.f32 0.0078125, %v1279_v21 }
 0x4e6   : > { %1526 = vadd.xlane.f32.xlu1 %v1495_v53  ;;  %v1327_v25 = vadd.f32 1e-09, %v1311_v4 }
 0x4e7   : > { %1524 = vadd.xlane.f32.xlu0 %v1494_v35  ;;  %v1285_v0 = vpop.xlane.xlu1 %1284  ;;  %v1326_v30 = vadd.f32 1e-09, %v1310_v16 }
 0x4e8   : > { %v1283_v46 = vpop.xlane.xlu0 %1282  ;;  %v1313_v23 = vmul.f32 0.0078125, %v1285_v0  ;;  %2456 = vrsqrt.f32 %v1327_v25 }
 0x4e9   : > { %v1312_v22 = vmul.f32 0.0078125, %v1283_v46  ;;  %2458 = vrsqrt.f32 %v1326_v30  ;;  %v3768_v46 = vld [vmem:[%s4132_s9] ss:$0 sm:$0xff] }
 0x4ea   : > { %v1329_v33 = vadd.f32 1e-09, %v1313_v23 }
 0x4eb   : > { %v1289_v63 = vpop.xlane.xlu1 %1288  ;;  %v1328_v51 = vadd.f32 1e-09, %v1312_v22 }
 0x4ec   : > { %v1287_v7 = vpop.xlane.xlu0 %1286  ;;  %2460 = vrsqrt.f32 %v1329_v33  ;;  %v1315_v41 = vmul.f32 0.0078125, %v1289_v63 }
 0x4ed   : > { %2462 = vrsqrt.f32 %v1328_v51  ;;  %v1314_v28 = vmul.f32 0.0078125, %v1287_v7 }
 0x4ee   : > { %v1331_v43 = vadd.f32 1e-09, %v1315_v41 }
 0x4ef   : > { %v1293_v3 = vpop.xlane.xlu1 %1292  ;;  %v1330_v54 = vadd.f32 1e-09, %v1314_v28 }
 0x4f0   : > { %v1291_v15 = vpop.xlane.xlu0 %1290  ;;  %v1317_v59 = vmul.f32 0.0078125, %v1293_v3 }
 0x4f2   : > { %v2457_v0 = vpop.eup %2456 }
 0x4f3   : > { %v1297_v57 = vpop.xlane.xlu1 %1296  ;;  %v2459_v4 = vpop.eup %2458  ;;  %v1365_v16 = vmul.f32 %v2457_v0, %v3768_v46 }
 0x4f4   : > { %v1295_v13 = vpop.xlane.xlu0 %1294  ;;  %v1319_v52 = vmul.f32 0.0078125, %v1297_v57  ;;  %v1333_v57 = vadd.f32 1e-09, %v1317_v59 }
 0x4f5   : > { %v1318_v8 = vmul.f32 0.0078125, %v1295_v13  ;;  %v1316_v13 = vmul.f32 0.0078125, %v1291_v15 }
 0x4f6   : > { %v1335_v55 = vadd.f32 1e-09, %v1319_v52 }
 0x4f7   : > { %v1301_v9 = vpop.xlane.xlu1 %1300  ;;  %v1334_v14 = vadd.f32 1e-09, %v1318_v8  ;;  %v1332_v33 = vadd.f32 1e-09, %v1316_v13 }
 0x4f8   : > { %v1299_v49 = vpop.xlane.xlu0 %1298  ;;  %v1321_v53 = vmul.f32 0.0078125, %v1301_v9  ;;  %2464 = vrsqrt.f32 %v1335_v55  ;;  %v2461_v9 = vpop.eup %2460  ;;  %v1364_v55 = vmul.f32 %v2459_v4, %v3768_v46 }
 0x4f9   : > { %2466 = vrsqrt.f32 %v1334_v14  ;;  %v1320_v7 = vmul.f32 0.0078125, %v1299_v49  ;;  %v2463_v30 = vpop.eup %2462  ;;  %v1381_v49 = vmul.f32 %v1365_v16, %v3583_v5 }
 0x4fa   : > { %2468 = vrsqrt.f32 %v1331_v43  ;;  %v1337_v63 = vadd.f32 1e-09, %v1321_v53  ;;  %v3776_v43 = vld [vmem:[%s4133_s13] ss:$0 sm:$0xff]  ;;  %v1366_v53 = vmul.f32 %v2463_v30, %v3768_v46 }
 0x4fb   : > { %v1305_v29 = vpop.xlane.xlu1 %1304  ;;  %2470 = vrsqrt.f32 %v1330_v54  ;;  %v1336_v15 = vadd.f32 1e-09, %v1320_v7  ;;  %v3781_v16 = vadd.f32 %v3776_v43, %v1381_v49 }
 0x4fc   : > { %v1303_v38 = vpop.xlane.xlu0 %1302  ;;  %2472 = vrsqrt.f32 %v1333_v57  ;;  %v1323_v51 = vmul.f32 0.0078125, %v1305_v29  ;;  %v1367_v29 = vmul.f32 %v2461_v9, %v3768_v46 }
 0x4fd   : > { %2474 = vrsqrt.f32 %v1337_v63  ;;  %v1322_v8 = vmul.f32 0.0078125, %v1303_v38 }
 0x4fe   : > { %v1339_v54 = vadd.f32 1e-09, %v1323_v51  ;;  %v1383_v30 = vmul.f32 %v1367_v29, %v3594_v20 }
 0x4ff   : > { %v1309_v35 = vpop.xlane.xlu1 %1308  ;;  %v1338_v13 = vadd.f32 1e-09, %v1322_v8 }
 0x500   : > { %v1307_v21 = vpop.xlane.xlu0 %1306  ;;  %v1325_v0 = vmul.f32 0.0078125, %v1309_v35  ;;  %v1382_v35 = vmul.f32 %v1366_v53, %v3599_v2  ;;  %v3798_v53 = vadd.f32 %v3776_v43, %v1383_v30 }
 0x501   : > { %v1324_v63 = vmul.f32 0.0078125, %v1307_v21 }
 0x502   : > { %v2465_v57 = vpop.eup %2464 }
 0x503   : > { %v2467_v4 = vpop.eup %2466  ;;  %v1373_v21 = vmul.f32 %v2465_v57, %v3768_v46 }
 0x504   : > { %v1372_v8 = vmul.f32 %v2467_v4, %v3768_v46 }
 0x505   : > { %v1389_v57 = vmul.f32 %v1373_v21, %v3626_v62 }
 0x557   : > { %v1499_v3 = vpop.xlane.xlu1 %1498 }
 0x558   : > { %v1529_v25 = vmul.f32 0.0078125, %v1499_v3  ;;  %v1497_v23 = vpop.xlane.xlu0 %1496 }
 0x559   : > { %v1528_v22 = vmul.f32 0.0078125, %v1497_v23 }
 0x55a   : > { %v1545_v52 = vadd.f32 1e-09, %v1529_v25  ;;  %v1380_v25 = vmul.f32 %v1364_v55, %v3586_v12  ;;  %v1340_v12 = vadd.f32 1e-09, %v1324_v63  ;;  %v3795_v55 = vld [vmem:[%s4132_s9 + $0x1] ss:$0 sm:$0xff] }
 0x55b   : > { %v1544_v41 = vadd.f32 1e-09, %v1528_v22  ;;  %v1515_v28 = vpop.xlane.xlu1 %1514  ;;  %v2469_v22 = vpop.eup %2468 }
 0x55c   : > { %2476 = vrsqrt.f32 %v1545_v52  ;;  %v1537_v59 = vmul.f32 0.0078125, %v1515_v28  ;;  %v1513_v14 = vpop.xlane.xlu0 %1512  ;;  %v2471_v51 = vpop.eup %2470  ;;  %v1341_v52 = vadd.f32 1e-09, %v1325_v0  ;;  %v1400_v20 = vadd.f32 %v3776_v43, %v1380_v25 }
 0x55d   : > { %2478 = vrsqrt.f32 %v1544_v41  ;;  %v1536_v38 = vmul.f32 0.0078125, %v1513_v14  ;;  %v3788_v49 = vpop.eup %2472  ;;  %v1369_v2 = vmul.f32 %v2469_v22, %v3768_v46  ;;  %v3815_v22 = vld [vmem:[%s4134_s6 + $0x1] ss:$0 sm:$0xff] }
 0x55e   : > { %2480 = vrsqrt.f32 %v1332_v33  ;;  %v1553_v5 = vadd.f32 1e-09, %v1537_v59  ;;  %v2475_v29 = vpop.eup %2474 }
 0x55f   : > { %2482 = vrsqrt.f32 %v1336_v15  ;;  %v1552_v7 = vadd.f32 1e-09, %v1536_v38  ;;  %v1503_v3 = vpop.xlane.xlu1 %1502  ;;  %v1368_v38 = vmul.f32 %v2471_v51, %v3768_v46 }
 0x560   : > { %2484 = vrsqrt.f32 %v1553_v5  ;;  %v1531_v23 = vmul.f32 0.0078125, %v1503_v3  ;;  %v1501_v9 = vpop.xlane.xlu0 %1500  ;;  %v3802_v5 = vadd.f32 %v3776_v43, %v1382_v35 }
 0x561   : > { %2486 = vrsqrt.f32 %v1552_v7  ;;  %v1530_v33 = vmul.f32 0.0078125, %v1501_v9  ;;  %v1388_v7 = vmul.f32 %v1372_v8, %v3631_v42  ;;  %v3810_v9 = vmul.f32 %v1369_v2, %v3606_v48 }
 0x562   : > { %2488 = vrsqrt.f32 %v1339_v54  ;;  %v1547_v15 = vadd.f32 1e-09, %v1531_v23 }
 0x563   : > { %2490 = vrsqrt.f32 %v1338_v13  ;;  %v1546_v41 = vadd.f32 1e-09, %v1530_v33  ;;  %v1519_v28 = vpop.xlane.xlu1 %1518  ;;  %v3819_v33 = vmul.f32 %v1368_v38, %v3611_v37 }
 0x564   : > { %2492 = vrsqrt.f32 %v1547_v15  ;;  %v1539_v59 = vmul.f32 0.0078125, %v1519_v28  ;;  %v1517_v14 = vpop.xlane.xlu0 %1516  ;;  %v1375_v15 = vmul.f32 %v2475_v29, %v3768_v46  ;;  %v1408_v28 = vadd.f32 %v3776_v43, %v1388_v7 }
 0x565   : > { %2494 = vrsqrt.f32 %v1546_v41  ;;  %v1538_v54 = vmul.f32 0.0078125, %v1517_v14 }
 0x566   : > { %v2477_v0 = vpop.eup %2476  ;;  %2496 = vrsqrt.f32 %v1341_v52  ;;  %v1555_v13 = vadd.f32 1e-09, %v1539_v59  ;;  %v1409_v52 = vadd.f32 %v3776_v43, %v1389_v57 }
 0x567   : > { %v2479_v63 = vpop.eup %2478  ;;  %2498 = vrsqrt.f32 %v1340_v12  ;;  %v1583_v3 = vmul.f32 %v2477_v0, %v3795_v55  ;;  %v1554_v4 = vadd.f32 1e-09, %v1538_v54  ;;  %v1507_v25 = vpop.xlane.xlu1 %1506 }
 0x568   : > { %v3807_v23 = vpop.eup %2480  ;;  %v1582_v62 = vmul.f32 %v2479_v63, %v3795_v55  ;;  %2500 = vrsqrt.f32 %v1555_v13  ;;  %v1533_v30 = vmul.f32 0.0078125, %v1507_v25  ;;  %v1505_v42 = vpop.xlane.xlu0 %1504 }
 0x569   : > { %v2483_v35 = vpop.eup %2482  ;;  %v1599_v51 = vmul.f32 %v1583_v3, %v3671_v34  ;;  %2502 = vrsqrt.f32 %v1554_v4  ;;  %v1532_v21 = vmul.f32 0.0078125, %v1505_v42  ;;  %v1391_v42 = vmul.f32 %v1375_v15, %v3636_v27 }
 0x56a   : > { %v2485_v48 = vpop.eup %2484  ;;  %v1598_v8 = vmul.f32 %v1582_v62, %v3675_v19  ;;  %v1549_v12 = vadd.f32 1e-09, %v1533_v30  ;;  %v1374_v3 = vmul.f32 %v2483_v35, %v3768_v46 }
 0x56b   : > { %v2487_v41 = vpop.eup %2486  ;;  %v1619_v2 = vadd.f32 %v3815_v22, %v1599_v51  ;;  %v1591_v37 = vmul.f32 %v2485_v48, %v3795_v55  ;;  %v1548_v59 = vadd.f32 1e-09, %v1532_v21  ;;  %v1523_v14 = vpop.xlane.xlu1 %1522 }
 0x56c   : > { %v2489_v34 = vpop.eup %2488  ;;  %v1618_v38 = vadd.f32 %v3815_v22, %v1598_v8  ;;  %v1590_v54 = vmul.f32 %v2487_v41, %v3795_v55  ;;  %2504 = vrsqrt.f32 %v1549_v12  ;;  %v1541_v29 = vmul.f32 0.0078125, %v1523_v14  ;;  %v1521_v0 = vpop.xlane.xlu0 %1520 }
 0x56d   : > { %v2491_v19 = vpop.eup %2490  ;;  %v1635_v57 = vadd.f32 %v1619_v2, %v3781_v16  ;;  %v1607_v13 = vmul.f32 %v1591_v37, %v3683_v61  ;;  %2506 = vrsqrt.f32 %v1548_v59  ;;  %v1540_v63 = vmul.f32 0.0078125, %v1521_v0 }
 0x56e   : > { %v2493_v7 = vpop.eup %2492  ;;  %v1634_v4 = vadd.f32 %v1618_v38, %v1400_v20  ;;  %v1606_v25 = vmul.f32 %v1590_v54, %v3687_v45  ;;  %v1557_v62 = vadd.f32 1e-09, %v1541_v29  ;;  %v1390_v37 = vmul.f32 %v1374_v3, %v3641_v6 }
 0x56f   : > { %v2495_v30 = vpop.eup %2494  ;;  %1651 = vst [vmem:[%s3383_s20 + $0x8] sm:$0xff] %v1635_v57  ;;  %v1627_v51 = vadd.f32 %v3815_v22, %v1607_v13  ;;  %v1585_v16 = vmul.f32 %v2493_v7, %v3795_v55  ;;  %v1556_v21 = vadd.f32 1e-09, %v1540_v63  ;;  %v1511_v61 = vpop.xlane.xlu1 %1510  ;;  %v1411_v29 = vadd.f32 %v3776_v43, %v1391_v42 }
 0x570   : > { %v3838_v48 = vpop.eup %2496  ;;  %1650 = vst [vmem:[%s3383_s20] sm:$0xff] %v1634_v4  ;;  %v1626_v8 = vadd.f32 %v3815_v22, %v1606_v25  ;;  %v1584_v20 = vmul.f32 %v2495_v30, %v3795_v55  ;;  %2508 = vrsqrt.f32 %v1557_v62  ;;  %v1535_v45 = vmul.f32 0.0078125, %v1511_v61  ;;  %v1509_v35 = vpop.xlane.xlu0 %1508 }
 0x571   : > { %v3843_v12 = vpop.eup %2498  ;;  %v1643_v27 = vadd.f32 %v1627_v51, %v1409_v52  ;;  %v1601_v15 = vmul.f32 %v1585_v16, %v3695_v47  ;;  %2510 = vrsqrt.f32 %v1556_v21  ;;  %v1534_v41 = vmul.f32 0.0078125, %v1509_v35 }
 0x572   : > { %v2501_v2 = vpop.eup %2500  ;;  %v1642_v59 = vadd.f32 %v1626_v8, %v1408_v28  ;;  %v1600_v14 = vmul.f32 %v1584_v20, %v3699_v50  ;;  %v1551_v38 = vadd.f32 1e-09, %v1535_v45  ;;  %v1377_v25 = vmul.f32 %v2489_v34, %v3768_v46 }
 0x573   : > { %v2503_v54 = vpop.eup %2502  ;;  %1659 = vst [vmem:[%s3383_s20 + $0x48] sm:$0xff] %v1643_v27  ;;  %v1621_v0 = vadd.f32 %v3815_v22, %v1601_v15  ;;  %v1593_v52 = vmul.f32 %v2501_v2, %v3795_v55  ;;  %v1550_v57 = vadd.f32 1e-09, %v1534_v41  ;;  %v1527_v13 = vpop.xlane.xlu1 %1526  ;;  %v1410_v16 = vadd.f32 %v3776_v43, %v1390_v37 }
 0x574   : > { %1658 = vst [vmem:[%s3383_s20 + $0x40] sm:$0xff] %v1642_v59  ;;  %v1620_v47 = vadd.f32 %v3815_v22, %v1600_v14  ;;  %v1592_v6 = vmul.f32 %v2503_v54, %v3795_v55  ;;  %2512 = vrsqrt.f32 %v1551_v38  ;;  %v1543_v28 = vmul.f32 0.0078125, %v1527_v13  ;;  %v1525_v50 = vpop.xlane.xlu0 %1524 }
 0x575   : > { %v1637_v63 = vadd.f32 %v1621_v0, %v3798_v53  ;;  %v1609_v7 = vmul.f32 %v1593_v52, %v3707_v56  ;;  %2514 = vrsqrt.f32 %v1550_v57  ;;  %v1542_v3 = vmul.f32 0.0078125, %v1525_v50 }
 0x576   : > { %v2505_v4 = vpop.eup %2504  ;;  %v1636_v62 = vadd.f32 %v1620_v47, %v3802_v5  ;;  %v1608_v30 = vmul.f32 %v1592_v6, %v3711_v60  ;;  %v1559_v42 = vadd.f32 1e-09, %v1543_v28  ;;  %v1376_v56 = vmul.f32 %v2491_v19, %v3768_v46 }
 0x577   : > { %v2507_v51 = vpop.eup %2506  ;;  %1653 = vst [vmem:[%s3383_s20 + $0x18] sm:$0xff] %v1637_v63  ;;  %v1629_v21 = vadd.f32 %v3815_v22, %v1609_v7  ;;  %v1587_v53 = vmul.f32 %v2505_v4, %v3795_v55  ;;  %v1558_v61 = vadd.f32 1e-09, %v1542_v3  ;;  %v1371_v45 = vmul.f32 %v3788_v49, %v3768_v46 }
 0x578   : > { %1652 = vst [vmem:[%s3383_s20 + $0x10] sm:$0xff] %v1636_v62  ;;  %v1628_v34 = vadd.f32 %v3815_v22, %v1608_v30  ;;  %v1586_v5 = vmul.f32 %v2507_v51, %v3795_v55  ;;  %2516 = vrsqrt.f32 %v1559_v42  ;;  %v1370_v35 = vmul.f32 %v3807_v23, %v3768_v46 }
 0x579   : > { %v1645_v60 = vadd.f32 %v1629_v21, %v1411_v29  ;;  %v1603_v8 = vmul.f32 %v1587_v53, %v3719_v1  ;;  %2518 = vrsqrt.f32 %v1558_v61  ;;  %v1405_v41 = vadd.f32 %v3776_v43, %v3810_v9 }
 0x57a   : > { %v2509_v20 = vpop.eup %2508  ;;  %v1644_v19 = vadd.f32 %v1628_v34, %v1410_v16  ;;  %v1602_v27 = vmul.f32 %v1586_v5, %v3723_v10  ;;  %v1393_v2 = vmul.f32 %v1377_v25, %v3646_v11  ;;  %v1404_v49 = vadd.f32 %v3776_v43, %v3819_v33 }
 0x57b   : > { %v2511_v15 = vpop.eup %2510  ;;  %1661 = vst [vmem:[%s3383_s20 + $0x58] sm:$0xff] %v1645_v60  ;;  %v1623_v1 = vadd.f32 %v3815_v22, %v1603_v8  ;;  %v1595_v37 = vmul.f32 %v2509_v20, %v3795_v55  ;;  %v1392_v23 = vmul.f32 %v1376_v56, %v3651_v24  ;;  %v1387_v38 = vmul.f32 %v1371_v45, %v3616_v40 }
 0x57c   : > { %1660 = vst [vmem:[%s3383_s20 + $0x50] sm:$0xff] %v1644_v19  ;;  %v1622_v10 = vadd.f32 %v3815_v22, %v1602_v27  ;;  %v1594_v59 = vmul.f32 %v2511_v15, %v3795_v55  ;;  %v1386_v54 = vmul.f32 %v1370_v35, %v3621_v58  ;;  %v1413_v24 = vadd.f32 %v3776_v43, %v1393_v2 }
 0x57d   : > { %v1639_v9 = vadd.f32 %v1623_v1, %v1405_v41  ;;  %v1611_v11 = vmul.f32 %v1595_v37, %v3731_v17  ;;  %v1379_v52 = vmul.f32 %v3838_v48, %v3768_v46  ;;  %v1412_v13 = vadd.f32 %v3776_v43, %v1392_v23 }
 0x57e   : > { %v2513_v14 = vpop.eup %2512  ;;  %v1638_v29 = vadd.f32 %v1622_v10, %v1404_v49  ;;  %v1610_v0 = vmul.f32 %v1594_v59, %v3735_v26  ;;  %v1378_v40 = vmul.f32 %v3843_v12, %v3768_v46  ;;  %v1407_v7 = vadd.f32 %v3776_v43, %v1387_v38 }
 0x57f   : > { %v2515_v33 = vpop.eup %2514  ;;  %1655 = vst [vmem:[%s3383_s20 + $0x28] sm:$0xff] %v1639_v9  ;;  %v1631_v57 = vadd.f32 %v3815_v22, %v1611_v11  ;;  %v1589_v17 = vmul.f32 %v2513_v14, %v3795_v55  ;;  %v1395_v3 = vmul.f32 %v1379_v52, %v3656_v18  ;;  %v1406_v4 = vadd.f32 %v3776_v43, %v1386_v54 }
 0x580   : > { %1654 = vst [vmem:[%s3383_s20 + $0x20] sm:$0xff] %v1638_v29  ;;  %v1630_v58 = vadd.f32 %v3815_v22, %v1610_v0  ;;  %v1588_v26 = vmul.f32 %v2515_v33, %v3795_v55 }
 0x581   : > { %v1647_v47 = vadd.f32 %v1631_v57, %v1413_v24  ;;  %v1605_v48 = vmul.f32 %v1589_v17, %v3743_v31  ;;  %v1394_v31 = vmul.f32 %v1378_v40, %v3661_v32  ;;  %v1415_v51 = vadd.f32 %v3776_v43, %v1395_v3 }
 0x582   : > { %v2517_v6 = vpop.eup %2516  ;;  %v1646_v28 = vadd.f32 %v1630_v58, %v1412_v13  ;;  %v1604_v50 = vmul.f32 %v1588_v26, %v3747_v36 }
 0x583   : > { %v2519_v63 = vpop.eup %2518  ;;  %1663 = vst [vmem:[%s3383_s20 + $0x68] sm:$0xff] %v1647_v47  ;;  %v1625_v46 = vadd.f32 %v3815_v22, %v1605_v48  ;;  %v1597_v12 = vmul.f32 %v2517_v6, %v3795_v55  ;;  %v1414_v32 = vadd.f32 %v3776_v43, %v1394_v31 }
 0x584   : > { %1662 = vst [vmem:[%s3383_s20 + $0x60] sm:$0xff] %v1646_v28  ;;  %v1624_v36 = vadd.f32 %v3815_v22, %v1604_v50  ;;  %v1596_v25 = vmul.f32 %v2519_v63, %v3795_v55 }
 0x585   : > { %v1641_v62 = vadd.f32 %v1625_v46, %v1407_v7  ;;  %v1613_v18 = vmul.f32 %v1597_v12, %v3755_v39 }
 0x586   : > { %v1640_v30 = vadd.f32 %v1624_v36, %v1406_v4  ;;  %v1612_v42 = vmul.f32 %v1596_v25, %v3759_v44 }
 0x587   : > { %1657 = vst [vmem:[%s3383_s20 + $0x38] sm:$0xff] %v1641_v62  ;;  %v1633_v16 = vadd.f32 %v3815_v22, %v1613_v18 }
 0x588   : > { %1656 = vst [vmem:[%s3383_s20 + $0x30] sm:$0xff] %v1640_v30  ;;  %v1632_v21 = vadd.f32 %v3815_v22, %v1612_v42 }
 0x589   : > { %v1649_v53 = vadd.f32 %v1633_v16, %v1415_v51 }
 0x58a   : > { %v1648_v61 = vadd.f32 %v1632_v21, %v1414_v32 }
 0x58b   : > { %1665 = vst [vmem:[%s3383_s20 + $0x78] sm:$0xff] %v1649_v53 }
 0x58c   : > { %1664 = vst [vmem:[%s3383_s20 + $0x70] sm:$0xff] %v1648_v61 }
 0x58d PF: > { %s4135_s10 = sld [smem:[#allocation32_spill]]  ;;  %s4137_s0 = sld [smem:[#allocation47_spill]] }
 0x58e   : > { %s1680_s1 = sshll.u32 %s3383_s20, 4  ;;  %s3935_s5 = scalar_lea.sflag [#allocation9], %s446_s14  ;;  %s3931_s1 = int_to_ptr.vmem [resolvable:$true] %s1680_s1 }
 0x58f   : > { %s2688_s17 = scalar_lea.vmem %s3931_s1, 2048  ;;  %s2861_s13 = smov [#allocation16]  }
 0x590   : > { %p2689_p12 = scmp.ne.s32.totalorder %s3931_s1, %s2688_s17  ;;  %s2692_s8 = sshll.u32 %s2861_s13, 4  ;;  %s2693_s8 = int_to_ptr.vmem [resolvable:$false] %s2692_s8 }
 0x591   : > { %s2694_s15 = scalar_lea.vmem %s2693_s8, 4096  ;;  %p2695_p7 = scmp.lt.s32.totalorder %s3931_s1, %s2693_s8 }
 0x592   : > { %p2690_p6 = pnand %p2689_p12, %p3291_p1  ;;  %p2696_p0 = scmp.lt.s32.totalorder %s2694_s15, %s2688_s17 }
 0x593   : > { %s1874_s11 = sshll.u32 %s4135_s10, 11  ;;  %s4138_s3 = smov %s4137_s0 }
 0x594   : > { %s3928_s27 = scalar_lea.hbm %s4137_s0, %s1874_s11  ;;  %p2691_p5 = pneg %p2690_p6 }
 0x595   : > { %p2697_p8 = por %p2696_p0, %p2695_p7 }
 0x597   : > { %p2698_p3 = pnand %p2697_p8, %p2691_p5 }
 0x599   : > { %2701 = shalt.err (!%p2698_p3)
}
 0x59a   : > { %s2702_s14 = scalar_lea.hbm %s3928_s27, 2048  ;;  %s2706_s25 = scalar_lea.hbm %s4138_s3, 4096 }
 0x59b   : > { %p2703_p9 = scmp.ne.s32.totalorder %s3928_s27, %s2702_s14  ;;  %p2707_p11 = scmp.lt.u32.totalorder %s3928_s27, %s4138_s3 }
 0x59c   : > { %p2708_p10 = scmp.lt.u32.totalorder %s2706_s25, %s2702_s14  ;;  %p2710_p12 = scmp.lt.u32.totalorder %s2702_s14, %s3928_s27 }
 0x59d   : > { %p2704_p13 = pnand %p2703_p9, %p3291_p1 }
 0x59e   : > { %p2709_p2 = por %p2708_p10, %p2707_p11 }
 0x59f   : > { %p2705_p4 = pneg %p2704_p13 }
 0x5a0   : > { %p2711_p6 = por %p2710_p12, %p2709_p2 }
 0x5a2   : > { %p2712_p5 = pnand %p2711_p6, %p2705_p4 }
 0x5a4   : > { %2715 = shalt.err (!%p2712_p5)
}
 0x5a5   : > { %s2862_s11 = smov 128   ;;  %s2863_s7 = smov 8  }
 0x5a6   : > { %2301 = dma.vmem_to_hbm [thread:$0]  (%p3291_p1), %s3931_s1, 2048, %s3928_s27, %s3935_s5, %s2862_s11, %s2862_s11, %s2863_s7  }
 0x5a7 PF: > { %s4139_s4 = sld [smem:[#allocation27_spill]]  ;;  %p2333_p7 = scmp.ge.s32.totalorder %s2848_s24, 2 }
 0x5a8   : > { %p4140_p0 = scmp.ne.s32.totalorder %s4110_s26, 0 }
 0x5aa   : > { %p2325_p8 = pnand %p2333_p7, %p4140_p0 }
 0x5ad   : > { %s1695_s0 = sand.u32 1, %s4139_s4  }
 0x5ae   : > { %s1696_s17 = scalar_lea.sflag [#allocation9], %s1695_s0 }
 0x5af   : > { %2791 = dma.done.wait (!%p2325_p8), %s1696_s17, 2048  }
 0x5b0   : > { %2793 = vsyncadd (!%p2325_p8), %s1696_s17, 4294965248  ;;  %s39_s24 = sadd.s32 1, %s2848_s24   ;;  %s4142_s0 = sld [smem:[#allocation28_spill]] }
 0x5b1   : > { %p3964_p3 = scmp.ge.s32.totalorder %s39_s24, 6   ;;  %s4143_s1 = sld [smem:[#allocation29_spill]] }
 0x5b2   : > { %s4144_s14 = sld [smem:[#allocation30_spill]]  ;;  %s4145_s20 = sld [smem:[#allocation33_spill]] }
 0x5b3   : > { %s4146_s22 = sld [smem:[#allocation35_spill]]  ;;  %s4147_s29 = sld [smem:[#allocation36_spill]] }
 0x5b4   : > { %s4149_s13 = smov %s3284_s2  ;;  %s4150_s15 = smov %s2816_s16 }
 0x5b5   : > { %s4151_s16 = smov %s3111_s21  ;;  %s4152_s17 = smov %s2824_s18 }
 0x5b6   : > { %s4153_s18 = smov %s2828_s19  ;;  %s4154_s19 = smov %s3192_s28 }
 0x5b7   : > { %s4155_s21 = smov %s2844_s23  ;;  %38 = sbr.rel (!%p3964_p3) target bundleno = 40 (0x28), region = 145 }
 0x5b9   : > { %s4156_s23 = smov %s4147_s29 }
 0x5be   :  { %1701 = vsyncpa [#allocation8], 1 }
 0x5bf   :  { %1703 = vsyncpa [#allocation8 + $0x1], 1 }
 0x5c0   :  { %1704 = vsyncpa [#allocation11], 1 }
 0x5c1   :  { %1706 = vsyncpa [#allocation11 + $0x1], 1 }
 0x5c2   :  { %1707 = vsyncpa [#allocation14], 1 }
 0x5c3   :  { %1708 = vsyncpa [#allocation9], 1 }
 0x5c4   :  { %1710 = vsyncpa [#allocation9 + $0x1], 1 }

</bundles_post_ra>
